<compile_context>
chip_gen: v5e
topology: v5e:2x2
jax: 0.10.0
libtpu: 0.0.40
codegen_flags: <defaults>
</compile_context>

<pallas_src>
import functools

import jax
import jax.numpy as jnp
from jax.experimental import pallas as pl
from jax.experimental.pallas import tpu as pltpu

# Layer sizes of the autoencoder.
IN_DIM = 28 * 28          # 784
DIMS = [IN_DIM, 256, 128, 64, 128, 256, IN_DIM]


def _round_up(n, m):
    return ((n + m - 1) // m) * m


def _mlp_kernel(x_ref,
                w1, b1, w2, b2, w3, b3, w4, b4, w5, b5, w6, b6,
                o_ref):
    """Fused 6-layer MLP on one (block_b, 784) batch tile.

    x_ref is f32 (cast to bf16 here), weights are bf16, biases are f32 (1, F).
    Matmuls accumulate in f32 on the MXU; bias/ReLU/sigmoid stay f32 (VPU/EUP).
    """

    def dense(h_bf16, w_ref, b_ref):
        z = jnp.dot(h_bf16, w_ref[...], preferred_element_type=jnp.float32)
        return z + b_ref[...]

    # In-kernel bf16 cast (replaces a wrapper-side HBM pad/cast pass).
    h = x_ref[...].astype(jnp.bfloat16)

    # Five hidden layers: Linear -> ReLU (f32), back to bf16 for the MXU.
    for w_ref, b_ref in ((w1, b1), (w2, b2), (w3, b3), (w4, b4), (w5, b5)):
        h = jnp.maximum(dense(h, w_ref, b_ref), 0.0).astype(jnp.bfloat16)

    # Output layer: Linear -> Sigmoid.  sigmoid(z) = 0.5*(tanh(z/2)+1) uses a
    # single EUP transcendental instead of exp + reciprocal.
    z = dense(h, w6, b6)
    o_ref[...] = (0.5 * (jnp.tanh(0.5 * z) + 1.0)).astype(o_ref.dtype)


@functools.partial(jax.jit, static_argnames=("block_b", "out_dtype"))
def denoising_model_forward(x, params, *, block_b=512, out_dtype=jnp.bfloat16):
    """x: (B, 784) float32. params: list of (W, b), W shaped (F_in, F_out).

    block_b: batch tile size (default 512; sweep 512-1024 for large batches —
    VMEM use stays well under the explicit 48 MiB limit).  out_dtype defaults
    to bfloat16 to halve the output HBM writeback on mem-bound v5e/v6e; pass
    jnp.float32 if a consumer needs full-precision output from the kernel.
    """
    B, F = x.shape
    assert F == IN_DIM

    # Guarantee >= 2 grid steps so both v7x TensorCores get work (no-op cost on
    # single-TC v5e/v6e).  Tile rows stay a multiple of 8 sublanes, >= 128.
    if B <= 2 * block_b:
        block_b = max(128, _round_up((B + 1) // 2, 8))

    Bp = _round_up(B, block_b)
    x_p = x if Bp == B else jnp.pad(x, ((0, Bp - B), (0, 0)))

    # Flatten params: weights bf16 (halves DMA, 2-4x MXU throughput), biases
    # f32 reshaped to (1, F_out) lane-major tiles.  No feature padding needed:
    # 784-wide blocks use the full-array-dim exemption of the (8,128) rule.
    flat_params = []
    for w, b in params:
        flat_params.append(w.astype(jnp.bfloat16))
        flat_params.append(b.astype(jnp.float32).reshape(1, -1))

    # Whole-array, VMEM-resident parameter blocks; constant (0, 0) index_map so
    # the same block is reused by every batch tile.
    param_specs = [pl.BlockSpec(p.shape, lambda i: (0, 0)) for p in flat_params]

    grid = (Bp // block_b,)

    out = pl.pallas_call(
        _mlp_kernel,
        out_shape=jax.ShapeDtypeStruct((Bp, IN_DIM), out_dtype),
        grid_spec=pltpu.PrefetchScalarGridSpec(
            num_scalar_prefetch=0,
            grid=grid,
            in_specs=[pl.BlockSpec((block_b, IN_DIM), lambda i: (i, 0))]
                     + param_specs,
            out_specs=pl.BlockSpec((block_b, IN_DIM), lambda i: (i, 0)),
        ),
        compiler_params=pltpu.CompilerParams(
            dimension_semantics=("parallel",),
            vmem_limit_bytes=48 * 1024 * 1024,
        ),
    )(x_p, *flat_params)

    # Only slice when the batch was actually padded (avoids an extra HBM pass
    # in the common case where B is a multiple of block_b).
    return out if Bp == B else out[:B]


def init_params(key):
    """Deterministic init matching nn.Linear (uniform +-1/sqrt(fan_in)).
    Returns list of (W, b) with W already transposed to (F_in, F_out)."""
    params = []
    for idx in range(len(DIMS) - 1):
        fan_in, fan_out = DIMS[idx], DIMS[idx + 1]
        key, kw, kb = jax.random.split(key, 3)
        bound = 1.0 / jnp.sqrt(fan_in)
        w = jax.random.uniform(kw, (fan_in, fan_out), jnp.float32,
                               minval=-bound, maxval=bound)
        b = jax.random.uniform(kb, (fan_out,), jnp.float32,
                               minval=-bound, maxval=bound)
        params.append((w, b))
    return params


def reference_forward(x, params):
    """Plain-JAX f32 reference of the same forward pass."""
    h = x
    n = len(params)
    for i, (w, b) in enumerate(params):
        h = h @ w + b
        if i < n - 1:
            h = jnp.maximum(h, 0.0)
        else:
            h = jax.nn.sigmoid(h)
    return h


if __name__ == "__main__":
    key = jax.random.PRNGKey(0)
    key, kx = jax.random.split(key)

    B = 8  # small smoke-test batch (padded to one 128-row tile inside)
    x = jax.random.uniform(kx, (B, IN_DIM), jnp.float32)  # pixel-like inputs

    params = init_params(jax.random.PRNGKey(0))

    out = denoising_model_forward(x, params)
    out = jax.block_until_ready(out)

    ref = reference_forward(x, params)
    assert out.shape == (B, IN_DIM)
    # bf16 matmul inputs / bf16 output store with f32 accumulation -> loosened
    # tolerance vs the pure-f32 reference (sigmoid outputs in [0,1]).
    max_err = float(jnp.max(jnp.abs(out.astype(jnp.float32) - ref)))
    assert max_err < 3e-2, f"mismatch vs reference, max abs err {max_err}"

    print("KERNEL_OK")
</pallas_src>

<mosaic_0001>
module attributes {stable_mosaic.version = 11 : i64} {
  func.func @_mlp_kernel(%arg0: i32, %arg1: memref<128x784xf32, #tpu.memory_space<vmem>>, %arg2: memref<784x256xbf16, #tpu.memory_space<vmem>>, %arg3: memref<1x256xf32, #tpu.memory_space<vmem>>, %arg4: memref<256x128xbf16, #tpu.memory_space<vmem>>, %arg5: memref<1x128xf32, #tpu.memory_space<vmem>>, %arg6: memref<128x64xbf16, #tpu.memory_space<vmem>>, %arg7: memref<1x64xf32, #tpu.memory_space<vmem>>, %arg8: memref<64x128xbf16, #tpu.memory_space<vmem>>, %arg9: memref<1x128xf32, #tpu.memory_space<vmem>>, %arg10: memref<128x256xbf16, #tpu.memory_space<vmem>>, %arg11: memref<1x256xf32, #tpu.memory_space<vmem>>, %arg12: memref<256x784xbf16, #tpu.memory_space<vmem>>, %arg13: memref<1x784xf32, #tpu.memory_space<vmem>>, %arg14: memref<128x784xbf16, #tpu.memory_space<vmem>>) attributes {dimension_semantics = [#tpu.dimension_semantics<parallel>], iteration_bounds = array<i64: 1>, scalar_prefetch = 0 : i64, scratch_operands = 0 : i64, tpu.core_type = #tpu.core_type<tc>, window_params = [{transform_indices = @transform_0, window_bounds = array<i64: 128, 784>}, {pipeline_mode = #tpu.pipeline_mode<synchronous>, transform_indices = @transform_1, window_bounds = array<i64: 784, 256>}, {pipeline_mode = #tpu.pipeline_mode<synchronous>, transform_indices = @transform_2, window_bounds = array<i64: 1, 256>}, {pipeline_mode = #tpu.pipeline_mode<synchronous>, transform_indices = @transform_3, window_bounds = array<i64: 256, 128>}, {pipeline_mode = #tpu.pipeline_mode<synchronous>, transform_indices = @transform_4, window_bounds = array<i64: 1, 128>}, {pipeline_mode = #tpu.pipeline_mode<synchronous>, transform_indices = @transform_5, window_bounds = array<i64: 128, 64>}, {pipeline_mode = #tpu.pipeline_mode<synchronous>, transform_indices = @transform_6, window_bounds = array<i64: 1, 64>}, {pipeline_mode = #tpu.pipeline_mode<synchronous>, transform_indices = @transform_7, window_bounds = array<i64: 64, 128>}, {pipeline_mode = #tpu.pipeline_mode<synchronous>, transform_indices = @transform_8, window_bounds = array<i64: 1, 128>}, {pipeline_mode = #tpu.pipeline_mode<synchronous>, transform_indices = @transform_9, window_bounds = array<i64: 128, 256>}, {pipeline_mode = #tpu.pipeline_mode<synchronous>, transform_indices = @transform_10, window_bounds = array<i64: 1, 256>}, {pipeline_mode = #tpu.pipeline_mode<synchronous>, transform_indices = @transform_11, window_bounds = array<i64: 256, 784>}, {pipeline_mode = #tpu.pipeline_mode<synchronous>, transform_indices = @transform_12, window_bounds = array<i64: 1, 784>}, {transform_indices = @transform_13, window_bounds = array<i64: 128, 784>}]} {
    %c0 = arith.constant 0 : index
    %c0_0 = arith.constant 0 : index
    %0 = vector.load %arg1[%c0, %c0_0] : memref<128x784xf32, #tpu.memory_space<vmem>>, vector<128x784xf32>
    %1 = arith.truncf %0 : vector<128x784xf32> to vector<128x784xbf16>
    %c0_1 = arith.constant 0 : index
    %c0_2 = arith.constant 0 : index
    %2 = vector.load %arg2[%c0_1, %c0_2] : memref<784x256xbf16, #tpu.memory_space<vmem>>, vector<784x256xbf16>
    %cst = arith.constant dense<0.000000e+00> : vector<128x256xf32>
    %3 = tpu.matmul %1, %2, %cst {dimension_numbers = #tpu.dot_dimension_numbers<[1], [0], [0], [1], [0, 0, 1, 1], [], []>} : vector<128x784xbf16>, vector<784x256xbf16>, vector<128x256xf32> -> vector<128x256xf32>
    %c0_3 = arith.constant 0 : index
    %c0_4 = arith.constant 0 : index
    %4 = vector.load %arg3[%c0_3, %c0_4] : memref<1x256xf32, #tpu.memory_space<vmem>>, vector<1x256xf32>
    %5 = vector.broadcast %4 : vector<1x256xf32> to vector<128x256xf32>
    %6 = arith.addf %3, %5 : vector<128x256xf32>
    %cst_5 = arith.constant 0.000000e+00 : f32
    %7 = vector.broadcast %cst_5 : f32 to vector<128x256xf32>
    %8 = arith.maximumf %6, %7 : vector<128x256xf32>
    %9 = arith.truncf %8 : vector<128x256xf32> to vector<128x256xbf16>
    %c0_6 = arith.constant 0 : index
    %c0_7 = arith.constant 0 : index
    %10 = vector.load %arg4[%c0_6, %c0_7] : memref<256x128xbf16, #tpu.memory_space<vmem>>, vector<256x128xbf16>
    %cst_8 = arith.constant dense<0.000000e+00> : vector<128x128xf32>
    %11 = tpu.matmul %9, %10, %cst_8 {dimension_numbers = #tpu.dot_dimension_numbers<[1], [0], [0], [1], [0, 0, 1, 1], [], []>} : vector<128x256xbf16>, vector<256x128xbf16>, vector<128x128xf32> -> vector<128x128xf32>
    %c0_9 = arith.constant 0 : index
    %c0_10 = arith.constant 0 : index
    %12 = vector.load %arg5[%c0_9, %c0_10] : memref<1x128xf32, #tpu.memory_space<vmem>>, vector<1x128xf32>
    %13 = vector.broadcast %12 : vector<1x128xf32> to vector<128x128xf32>
    %14 = arith.addf %11, %13 : vector<128x128xf32>
    %cst_11 = arith.constant 0.000000e+00 : f32
    %15 = vector.broadcast %cst_11 : f32 to vector<128x128xf32>
    %16 = arith.maximumf %14, %15 : vector<128x128xf32>
    %17 = arith.truncf %16 : vector<128x128xf32> to vector<128x128xbf16>
    %c0_12 = arith.constant 0 : index
    %c0_13 = arith.constant 0 : index
    %18 = vector.load %arg6[%c0_12, %c0_13] : memref<128x64xbf16, #tpu.memory_space<vmem>>, vector<128x64xbf16>
    %cst_14 = arith.constant dense<0.000000e+00> : vector<128x64xf32>
    %19 = tpu.matmul %17, %18, %cst_14 {dimension_numbers = #tpu.dot_dimension_numbers<[1], [0], [0], [1], [0, 0, 1, 1], [], []>} : vector<128x128xbf16>, vector<128x64xbf16>, vector<128x64xf32> -> vector<128x64xf32>
    %c0_15 = arith.constant 0 : index
    %c0_16 = arith.constant 0 : index
    %20 = vector.load %arg7[%c0_15, %c0_16] : memref<1x64xf32, #tpu.memory_space<vmem>>, vector<1x64xf32>
    %21 = vector.broadcast %20 : vector<1x64xf32> to vector<128x64xf32>
    %22 = arith.addf %19, %21 : vector<128x64xf32>
    %cst_17 = arith.constant 0.000000e+00 : f32
    %23 = vector.broadcast %cst_17 : f32 to vector<128x64xf32>
    %24 = arith.maximumf %22, %23 : vector<128x64xf32>
    %25 = arith.truncf %24 : vector<128x64xf32> to vector<128x64xbf16>
    %c0_18 = arith.constant 0 : index
    %c0_19 = arith.constant 0 : index
    %26 = vector.load %arg8[%c0_18, %c0_19] : memref<64x128xbf16, #tpu.memory_space<vmem>>, vector<64x128xbf16>
    %cst_20 = arith.constant dense<0.000000e+00> : vector<128x128xf32>
    %27 = tpu.matmul %25, %26, %cst_20 {dimension_numbers = #tpu.dot_dimension_numbers<[1], [0], [0], [1], [0, 0, 1, 1], [], []>} : vector<128x64xbf16>, vector<64x128xbf16>, vector<128x128xf32> -> vector<128x128xf32>
    %c0_21 = arith.constant 0 : index
    %c0_22 = arith.constant 0 : index
    %28 = vector.load %arg9[%c0_21, %c0_22] : memref<1x128xf32, #tpu.memory_space<vmem>>, vector<1x128xf32>
    %29 = vector.broadcast %28 : vector<1x128xf32> to vector<128x128xf32>
    %30 = arith.addf %27, %29 : vector<128x128xf32>
    %cst_23 = arith.constant 0.000000e+00 : f32
    %31 = vector.broadcast %cst_23 : f32 to vector<128x128xf32>
    %32 = arith.maximumf %30, %31 : vector<128x128xf32>
    %33 = arith.truncf %32 : vector<128x128xf32> to vector<128x128xbf16>
    %c0_24 = arith.constant 0 : index
    %c0_25 = arith.constant 0 : index
    %34 = vector.load %arg10[%c0_24, %c0_25] : memref<128x256xbf16, #tpu.memory_space<vmem>>, vector<128x256xbf16>
    %cst_26 = arith.constant dense<0.000000e+00> : vector<128x256xf32>
    %35 = tpu.matmul %33, %34, %cst_26 {dimension_numbers = #tpu.dot_dimension_numbers<[1], [0], [0], [1], [0, 0, 1, 1], [], []>} : vector<128x128xbf16>, vector<128x256xbf16>, vector<128x256xf32> -> vector<128x256xf32>
    %c0_27 = arith.constant 0 : index
    %c0_28 = arith.constant 0 : index
    %36 = vector.load %arg11[%c0_27, %c0_28] : memref<1x256xf32, #tpu.memory_space<vmem>>, vector<1x256xf32>
    %37 = vector.broadcast %36 : vector<1x256xf32> to vector<128x256xf32>
    %38 = arith.addf %35, %37 : vector<128x256xf32>
    %cst_29 = arith.constant 0.000000e+00 : f32
    %39 = vector.broadcast %cst_29 : f32 to vector<128x256xf32>
    %40 = arith.maximumf %38, %39 : vector<128x256xf32>
    %41 = arith.truncf %40 : vector<128x256xf32> to vector<128x256xbf16>
    %c0_30 = arith.constant 0 : index
    %c0_31 = arith.constant 0 : index
    %42 = vector.load %arg12[%c0_30, %c0_31] : memref<256x784xbf16, #tpu.memory_space<vmem>>, vector<256x784xbf16>
    %cst_32 = arith.constant dense<0.000000e+00> : vector<128x784xf32>
    %43 = tpu.matmul %41, %42, %cst_32 {dimension_numbers = #tpu.dot_dimension_numbers<[1], [0], [0], [1], [0, 0, 1, 1], [], []>} : vector<128x256xbf16>, vector<256x784xbf16>, vector<128x784xf32> -> vector<128x784xf32>
    %c0_33 = arith.constant 0 : index
    %c0_34 = arith.constant 0 : index
    %44 = vector.load %arg13[%c0_33, %c0_34] : memref<1x784xf32, #tpu.memory_space<vmem>>, vector<1x784xf32>
    %45 = vector.broadcast %44 : vector<1x784xf32> to vector<128x784xf32>
    %46 = arith.addf %43, %45 : vector<128x784xf32>
    %cst_35 = arith.constant 5.000000e-01 : f32
    %47 = vector.broadcast %cst_35 : f32 to vector<128x784xf32>
    %48 = arith.mulf %47, %46 : vector<128x784xf32>
    %49 = math.tanh %48 : vector<128x784xf32>
    %cst_36 = arith.constant 1.000000e+00 : f32
    %50 = vector.broadcast %cst_36 : f32 to vector<128x784xf32>
    %51 = arith.addf %49, %50 : vector<128x784xf32>
    %cst_37 = arith.constant 5.000000e-01 : f32
    %52 = vector.broadcast %cst_37 : f32 to vector<128x784xf32>
    %53 = arith.mulf %52, %51 : vector<128x784xf32>
    %54 = arith.truncf %53 : vector<128x784xf32> to vector<128x784xbf16>
    %c0_38 = arith.constant 0 : index
    %c0_39 = arith.constant 0 : index
    %55 = vector.load %arg14[%c0_38, %c0_39] : memref<128x784xbf16, #tpu.memory_space<vmem>>, vector<128x784xbf16>
    tpu.vector_store %arg14[%c0_38, %c0_39], %54 {strides = array<i32>} : memref<128x784xbf16, #tpu.memory_space<vmem>>, vector<128x784xbf16>,
    return
  }
  func.func @transform_0(%arg0: i32) -> (i32, i32) {
    %c0_i32 = arith.constant 0 : i32
    %c0_i32_0 = arith.constant 0 : i32
    return %arg0, %c0_i32 : i32, i32
  }
  func.func @transform_1(%arg0: i32) -> (i32, i32) {
    %c0_i32 = arith.constant 0 : i32
    %c0_i32_0 = arith.constant 0 : i32
    %c0_i32_1 = arith.constant 0 : i32
    return %c0_i32, %c0_i32_0 : i32, i32
  }
  func.func @transform_2(%arg0: i32) -> (i32, i32) {
    %c0_i32 = arith.constant 0 : i32
    %c0_i32_0 = arith.constant 0 : i32
    %c0_i32_1 = arith.constant 0 : i32
    return %c0_i32, %c0_i32_0 : i32, i32
  }
  func.func @transform_3(%arg0: i32) -> (i32, i32) {
    %c0_i32 = arith.constant 0 : i32
    %c0_i32_0 = arith.constant 0 : i32
    %c0_i32_1 = arith.constant 0 : i32
    return %c0_i32, %c0_i32_0 : i32, i32
  }
  func.func @transform_4(%arg0: i32) -> (i32, i32) {
    %c0_i32 = arith.constant 0 : i32
    %c0_i32_0 = arith.constant 0 : i32
    %c0_i32_1 = arith.constant 0 : i32
    return %c0_i32, %c0_i32_0 : i32, i32
  }
  func.func @transform_5(%arg0: i32) -> (i32, i32) {
    %c0_i32 = arith.constant 0 : i32
    %c0_i32_0 = arith.constant 0 : i32
    %c0_i32_1 = arith.constant 0 : i32
    return %c0_i32, %c0_i32_0 : i32, i32
  }
  func.func @transform_6(%arg0: i32) -> (i32, i32) {
    %c0_i32 = arith.constant 0 : i32
    %c0_i32_0 = arith.constant 0 : i32
    %c0_i32_1 = arith.constant 0 : i32
    return %c0_i32, %c0_i32_0 : i32, i32
  }
  func.func @transform_7(%arg0: i32) -> (i32, i32) {
    %c0_i32 = arith.constant 0 : i32
    %c0_i32_0 = arith.constant 0 : i32
    %c0_i32_1 = arith.constant 0 : i32
    return %c0_i32, %c0_i32_0 : i32, i32
  }
  func.func @transform_8(%arg0: i32) -> (i32, i32) {
    %c0_i32 = arith.constant 0 : i32
    %c0_i32_0 = arith.constant 0 : i32
    %c0_i32_1 = arith.constant 0 : i32
    return %c0_i32, %c0_i32_0 : i32, i32
  }
  func.func @transform_9(%arg0: i32) -> (i32, i32) {
    %c0_i32 = arith.constant 0 : i32
    %c0_i32_0 = arith.constant 0 : i32
    %c0_i32_1 = arith.constant 0 : i32
    return %c0_i32, %c0_i32_0 : i32, i32
  }
  func.func @transform_10(%arg0: i32) -> (i32, i32) {
    %c0_i32 = arith.constant 0 : i32
    %c0_i32_0 = arith.constant 0 : i32
    %c0_i32_1 = arith.constant 0 : i32
    return %c0_i32, %c0_i32_0 : i32, i32
  }
  func.func @transform_11(%arg0: i32) -> (i32, i32) {
    %c0_i32 = arith.constant 0 : i32
    %c0_i32_0 = arith.constant 0 : i32
    %c0_i32_1 = arith.constant 0 : i32
    return %c0_i32, %c0_i32_0 : i32, i32
  }
  func.func @transform_12(%arg0: i32) -> (i32, i32) {
    %c0_i32 = arith.constant 0 : i32
    %c0_i32_0 = arith.constant 0 : i32
    %c0_i32_1 = arith.constant 0 : i32
    return %c0_i32, %c0_i32_0 : i32, i32
  }
  func.func @transform_13(%arg0: i32) -> (i32, i32) {
    %c0_i32 = arith.constant 0 : i32
    %c0_i32_0 = arith.constant 0 : i32
    return %arg0, %c0_i32 : i32, i32
  }
}

</mosaic_0001>

<bundles_post_ra>
// kernel: denoising_model_forward.1
= control target key start
LH: loop header
LB: loop body
LE: loop exit
PB: predicated region body
PF: predicated region fallthrough
CT: control target
= control target key end

     0   :  { %vm807_vm0 = vcmask 130048   ;;  %vm1997_vm1 = vcmask 523264   ;;  %vm4264_vm2 = vcmask 125952   ;;  %s8794_s1 = inlined_call_operand.vmem [shape: bf16[784,256], index: 1, kind: input, shape index: {}]   ;;  %s8795_s0 = inlined_call_operand.vmem [shape: f32[128,784], index: 0, kind: input, shape index: {}]   ;;  %s8796_s2 = inlined_call_operand.vmem [shape: f32[1,256], index: 2, kind: input, shape index: {}]   ;;  %s8797_s3 = inlined_call_operand.vmem [shape: bf16[256,128], index: 3, kind: input, shape index: {}]   ;;  %s8798_s4 = inlined_call_operand.vmem [shape: f32[1,128], index: 4, kind: input, shape index: {}]   ;;  %s8799_s5 = inlined_call_operand.vmem [shape: bf16[128,64], index: 5, kind: input, shape index: {}]   ;;  %s8800_s7 = inlined_call_operand.vmem [shape: bf16[64,128], index: 7, kind: input, shape index: {}]   ;;  %s8801_s6 = inlined_call_operand.vmem [shape: f32[1,64], index: 6, kind: input, shape index: {}]   ;;  %s8802_s9 = inlined_call_operand.vmem [shape: bf16[128,256], index: 9, kind: input, shape index: {}]   ;;  %s8803_s8 = inlined_call_operand.vmem [shape: f32[1,128], index: 8, kind: input, shape index: {}]   ;;  %s8804_s11 = inlined_call_operand.vmem [shape: bf16[256,784], index: 11, kind: input, shape index: {}]   ;;  %s8805_s10 = inlined_call_operand.vmem [shape: f32[1,256], index: 10, kind: input, shape index: {}]   ;;  %s8806_s12 = inlined_call_operand.vmem [shape: f32[1,784], index: 12, kind: input, shape index: {}]   ;;  %s8807_s13 = inlined_call_operand.vmem [shape: bf16[128,784], index: 13, kind: output, shape index: {}]  }
   0x1   :  { %v4388_v0 = vld [vmem:[%s8794_s1 + $0x70] sm:$0xf]  ;;  %v5385_v1 = vld [vmem:[%s8794_s1 + $0x74] sm:$0xf0]  ;;  %v4380_v5 = vld [vmem:[%s8794_s1 + $0x60] sm:$0xf] }
   0x2   :  { %v4452_v2 = vld [vmem:[%s8794_s1 + $0xf0] sm:$0xf]  ;;  %v4389_v3 = vor.u32 %v5385_v1, %v4388_v0  ;;  %v5401_v4 = vld [vmem:[%s8794_s1 + $0xf4] sm:$0xf0]  ;;  %v5383_v6 = vld [vmem:[%s8794_s1 + $0x64] sm:$0xf0] }
   0x3   :  { %v4453_v7 = vor.u32 %v5401_v4, %v4452_v2  ;;  %v4444_v8 = vld [vmem:[%s8794_s1 + $0xe0] sm:$0xf]  ;;  %v5399_v9 = vld [vmem:[%s8794_s1 + $0xe4] sm:$0xf0]  ;;  %v4381_v10 = vor.u32 %v5383_v6, %v4380_v5  ;;  %v4372_v12 = vld [vmem:[%s8794_s1 + $0x50] sm:$0xf] }
   0x4   :  { %5624 = vmatpush.bf16.msra.mxu2 %v4389_v3  ;;  %832 = vmatpush.bf16.msra.mxu0 %v4389_v3  ;;  %v4445_v11 = vor.u32 %v5399_v9, %v4444_v8  ;;  %v5381_v13 = vld [vmem:[%s8794_s1 + $0x54] sm:$0xf0]  ;;  %v4436_v14 = vld [vmem:[%s8794_s1 + $0xd0] sm:$0xf]  ;;  %v4364_v18 = vld [vmem:[%s8794_s1 + $0x40] sm:$0xf] }
   0x5   :  { %5632 = vmatpush.bf16.msra.mxu3 %v4453_v7  ;;  %881 = vmatpush.bf16.msra.mxu1 %v4453_v7  ;;  %v5397_v15 = vld [vmem:[%s8794_s1 + $0xd4] sm:$0xf0]  ;;  %v4373_v16 = vor.u32 %v5381_v13, %v4372_v12  ;;  %v5379_v19 = vld [vmem:[%s8794_s1 + $0x44] sm:$0xf0]  ;;  %v4428_v20 = vld [vmem:[%s8794_s1 + $0xc0] sm:$0xf] }
   0x6   :  { %v4437_v17 = vor.u32 %v5397_v15, %v4436_v14  ;;  %v5395_v21 = vld [vmem:[%s8794_s1 + $0xc4] sm:$0xf0]  ;;  %v4365_v22 = vor.u32 %v5379_v19, %v4364_v18  ;;  %v4356_v24 = vld [vmem:[%s8794_s1 + $0x30] sm:$0xf]  ;;  %v5377_v25 = vld [vmem:[%s8794_s1 + $0x34] sm:$0xf0] }
   0x7   :  { %v4429_v23 = vor.u32 %v5395_v21, %v4428_v20  ;;  %v4420_v26 = vld [vmem:[%s8794_s1 + $0xb0] sm:$0xf]  ;;  %v5393_v27 = vld [vmem:[%s8794_s1 + $0xb4] sm:$0xf0]  ;;  %v4357_v28 = vor.u32 %v5377_v25, %v4356_v24  ;;  %v4348_v30 = vld [vmem:[%s8794_s1 + $0x20] sm:$0xf] }
   0x8   :  { %5625 = vmatpush.bf16.msra.mxu2 %v4381_v10  ;;  %833 = vmatpush.bf16.msra.mxu0 %v4381_v10  ;;  %v4421_v29 = vor.u32 %v5393_v27, %v4420_v26  ;;  %v5375_v31 = vld [vmem:[%s8794_s1 + $0x24] sm:$0xf0]  ;;  %v4412_v32 = vld [vmem:[%s8794_s1 + $0xa0] sm:$0xf]  ;;  %v4340_v36 = vld [vmem:[%s8794_s1 + $0x10] sm:$0xf] }
   0x9   :  { %5633 = vmatpush.bf16.msra.mxu3 %v4445_v11  ;;  %882 = vmatpush.bf16.msra.mxu1 %v4445_v11  ;;  %v5391_v33 = vld [vmem:[%s8794_s1 + $0xa4] sm:$0xf0]  ;;  %v4349_v34 = vor.u32 %v5375_v31, %v4348_v30  ;;  %v5373_v37 = vld [vmem:[%s8794_s1 + $0x14] sm:$0xf0]  ;;  %v4404_v38 = vld [vmem:[%s8794_s1 + $0x90] sm:$0xf] }
   0xa   :  { %v4413_v35 = vor.u32 %v5391_v33, %v4412_v32  ;;  %v5389_v39 = vld [vmem:[%s8794_s1 + $0x94] sm:$0xf0]  ;;  %v4341_v40 = vor.u32 %v5373_v37, %v4340_v36  ;;  %v4332_v41 = vld [vmem:[%s8794_s1] sm:$0xf]  ;;  %v5371_v43 = vld [vmem:[%s8794_s1 + $0x4] sm:$0xf0] }
   0xb   :  { %v4405_v42 = vor.u32 %v5389_v39, %v4404_v38  ;;  %v4396_v44 = vld [vmem:[%s8794_s1 + $0x80] sm:$0xf]  ;;  %v5387_v45 = vld [vmem:[%s8794_s1 + $0x84] sm:$0xf0]  ;;  %v108_v47 = vld [vmem:[%s8795_s0 + $0x1f8] sm:$0xff]  ;;  %v4333_v54 = vor.u32 %v5371_v43, %v4332_v41 }
   0xc   :  { %5626 = vmatpush.bf16.msra.mxu2 %v4373_v16  ;;  %834 = vmatpush.bf16.msra.mxu0 %v4373_v16  ;;  %v101_v46 = vld [vmem:[%s8795_s0 + $0x1c0] sm:$0xff]  ;;  %v4516_v48 = vld [vmem:[%s8794_s1 + $0x170] sm:$0xf]  ;;  %v5417_v49 = vld [vmem:[%s8794_s1 + $0x174] sm:$0xf0]  ;;  %v4397_v58 = vor.u32 %v5387_v45, %v4396_v44 }
   0xd   :  { %5634 = vmatpush.bf16.msra.mxu3 %v4437_v17  ;;  %883 = vmatpush.bf16.msra.mxu1 %v4437_v17  ;;  %v102_v50 = vld [vmem:[%s8795_s0 + $0x1c8] sm:$0xff]  ;;  %v109_v51 = vld [vmem:[%s8795_s0 + $0x200] sm:$0xff]  ;;  %v4580_v52 = vld [vmem:[%s8794_s1 + $0x1f0] sm:$0xf]  ;;  %v4517_v59 = vor.u32 %v5417_v49, %v4516_v48  ;;  %v6085_v3 = vpack.c.bf16 %v108_v47, %v101_v46 }
   0xe   :  { %v5433_v53 = vld [vmem:[%s8794_s1 + $0x1f4] sm:$0xf0]  ;;  %v45_v55 = vld [vmem:[%s8795_s0] sm:$0xff]  ;;  %v46_v57 = vld [vmem:[%s8795_s0 + $0x8] sm:$0xff]  ;;  %v6098_v8 = vpack.c.bf16 %v109_v51, %v102_v50 }
   0xf   :  { %v52_v56 = vld [vmem:[%s8795_s0 + $0x38] sm:$0xff]  ;;  %v53_v60 = vld [vmem:[%s8795_s0 + $0x40] sm:$0xff]  ;;  %v4644_v61 = vld [vmem:[%s8794_s1 + $0x270] sm:$0xf]  ;;  %v4581_v63 = vor.u32 %v5433_v53, %v4580_v52 }
  0x10   :  { %5627 = vmatpush.bf16.msra.mxu2 %v4365_v22  ;;  %835 = vmatpush.bf16.msra.mxu0 %v4365_v22  ;;  %v5449_v62 = vld [vmem:[%s8794_s1 + $0x274] sm:$0xf0]  ;;  %v4508_v0 = vld [vmem:[%s8794_s1 + $0x160] sm:$0xf]  ;;  %v5415_v1 = vld [vmem:[%s8794_s1 + $0x164] sm:$0xf0]  ;;  %v6087_v4 = vpack.c.bf16 %v52_v56, %v45_v55  ;;  %v6100_v10 = vpack.c.bf16 %v53_v60, %v46_v57 }
  0x11   :  { %5635 = vmatpush.bf16.msra.mxu3 %v4429_v23  ;;  %884 = vmatpush.bf16.msra.mxu1 %v4429_v23  ;;  %v4572_v2 = vld [vmem:[%s8794_s1 + $0x1e0] sm:$0xf]  ;;  %v5431_v5 = vld [vmem:[%s8794_s1 + $0x1e4] sm:$0xf0]  ;;  %v4708_v6 = vld [vmem:[%s8794_s1 + $0x2f0] sm:$0xf]  ;;  %v4645_v9 = vor.u32 %v5449_v62, %v4644_v61  ;;  %v4509_v11 = vor.u32 %v5415_v1, %v4508_v0 }
  0x12   :  { %v5465_v7 = vld [vmem:[%s8794_s1 + $0x2f4] sm:$0xf0]  ;;  %v4636_v12 = vld [vmem:[%s8794_s1 + $0x260] sm:$0xf]  ;;  %v5447_v13 = vld [vmem:[%s8794_s1 + $0x264] sm:$0xf0]  ;;  %v4573_v14 = vor.u32 %v5431_v5, %v4572_v2 }
  0x13   :  { %v4709_v15 = vor.u32 %v5465_v7, %v4708_v6  ;;  %v4500_v16 = vld [vmem:[%s8794_s1 + $0x150] sm:$0xf]  ;;  %v5413_v17 = vld [vmem:[%s8794_s1 + $0x154] sm:$0xf0]  ;;  %v4700_v20 = vld [vmem:[%s8794_s1 + $0x2e0] sm:$0xf]  ;;  %v4637_v22 = vor.u32 %v5447_v13, %v4636_v12 }
  0x14   :  { %5628 = vmatpush.bf16.msra.mxu2 %v4357_v28  ;;  %836 = vmatpush.bf16.msra.mxu0 %v4357_v28  ;;  %v4564_v18 = vld [vmem:[%s8794_s1 + $0x1d0] sm:$0xf]  ;;  %v5429_v19 = vld [vmem:[%s8794_s1 + $0x1d4] sm:$0xf0]  ;;  %v5463_v21 = vld [vmem:[%s8794_s1 + $0x2e4] sm:$0xf0]  ;;  %v4501_v23 = vor.u32 %v5413_v17, %v4500_v16 }
  0x15   :  { %5636 = vmatpush.bf16.msra.mxu3 %v4421_v29  ;;  %885 = vmatpush.bf16.msra.mxu1 %v4421_v29  ;;  %v4628_v24 = vld [vmem:[%s8794_s1 + $0x250] sm:$0xf]  ;;  %v5445_v25 = vld [vmem:[%s8794_s1 + $0x254] sm:$0xf0]  ;;  %v4565_v26 = vor.u32 %v5429_v19, %v4564_v18  ;;  %v4701_v27 = vor.u32 %v5463_v21, %v4700_v20  ;;  %v4492_v28 = vld [vmem:[%s8794_s1 + $0x140] sm:$0xf] }
  0x16   :  { %v5411_v29 = vld [vmem:[%s8794_s1 + $0x144] sm:$0xf0]  ;;  %v4556_v30 = vld [vmem:[%s8794_s1 + $0x1c0] sm:$0xf]  ;;  %v4692_v32 = vld [vmem:[%s8794_s1 + $0x2d0] sm:$0xf] }
  0x17   :  { %v5427_v31 = vld [vmem:[%s8794_s1 + $0x1c4] sm:$0xf0]  ;;  %v5461_v33 = vld [vmem:[%s8794_s1 + $0x2d4] sm:$0xf0]  ;;  %v4620_v36 = vld [vmem:[%s8794_s1 + $0x240] sm:$0xf] }
  0x18   :  { %5629 = vmatpush.bf16.msra.mxu2 %v4349_v34  ;;  %837 = vmatpush.bf16.msra.mxu0 %v4349_v34  ;;  %v4629_v34 = vor.u32 %v5445_v25, %v4628_v24  ;;  %v5443_v37 = vld [vmem:[%s8794_s1 + $0x244] sm:$0xf0]  ;;  %v115_v38 = vld [vmem:[%s8795_s0 + $0x230] sm:$0xff]  ;;  %v4693_v41 = vor.u32 %v5461_v33, %v4692_v32  ;;  %v5409_v43 = vld [vmem:[%s8794_s1 + $0x134] sm:$0xf0] }
  0x19   :  { %5637 = vmatpush.bf16.msra.mxu3 %v4413_v35  ;;  %886 = vmatpush.bf16.msra.mxu1 %v4413_v35  ;;  %v4493_v35 = vor.u32 %v5411_v29, %v4492_v28  ;;  %v122_v39 = vld [vmem:[%s8795_s0 + $0x268] sm:$0xff]  ;;  %v4548_v44 = vld [vmem:[%s8794_s1 + $0x1b0] sm:$0xf]  ;;  %v116_v45 = vld [vmem:[%s8795_s0 + $0x238] sm:$0xff]  ;;  %v4621_v53 = vor.u32 %v5443_v37, %v4620_v36 }
  0x1a   :  { %v123_v46 = vld [vmem:[%s8795_s0 + $0x270] sm:$0xff]  ;;  %v5425_v47 = vld [vmem:[%s8794_s1 + $0x1b4] sm:$0xf0]  ;;  %v4684_v48 = vld [vmem:[%s8794_s1 + $0x2c0] sm:$0xf] }
  0x1b   :  { %v5459_v49 = vld [vmem:[%s8794_s1 + $0x2c4] sm:$0xf0]  ;;  %v59_v50 = vld [vmem:[%s8795_s0 + $0x70] sm:$0xff]  ;;  %v60_v52 = vld [vmem:[%s8795_s0 + $0x78] sm:$0xff]  ;;  %v6230_v6 = vpack.c.bf16 %v123_v46, %v116_v45 }
  0x1c   :  { %5630 = vmatpush.bf16.msra.mxu2 %v4341_v40  ;;  %838 = vmatpush.bf16.msra.mxu0 %v4341_v40  ;;  %v4557_v40 = vor.u32 %v5427_v31, %v4556_v30  ;;  %v66_v51 = vld [vmem:[%s8795_s0 + $0xa8] sm:$0xff]  ;;  %v4612_v56 = vld [vmem:[%s8794_s1 + $0x230] sm:$0xf]  ;;  %v5441_v57 = vld [vmem:[%s8794_s1 + $0x234] sm:$0xf0] }
  0x1d   :  { %5638 = vmatpush.bf16.msra.mxu3 %v4405_v42  ;;  %887 = vmatpush.bf16.msra.mxu1 %v4405_v42  ;;  %v4484_v42 = vld [vmem:[%s8794_s1 + $0x130] sm:$0xf]  ;;  %v4476_v60 = vld [vmem:[%s8794_s1 + $0x120] sm:$0xf]  ;;  %v5407_v61 = vld [vmem:[%s8794_s1 + $0x124] sm:$0xf0]  ;;  %v6219_v0 = vpack.c.bf16 %v66_v51, %v59_v50  ;;  %v4613_v7 = vor.u32 %v5441_v57, %v4612_v56 }
  0x1e   :  { %v4485_v55 = vor.u32 %v5409_v43, %v4484_v42  ;;  %v4540_v62 = vld [vmem:[%s8794_s1 + $0x1a0] sm:$0xf]  ;;  %v5423_v1 = vld [vmem:[%s8794_s1 + $0x1a4] sm:$0xf0]  ;;  %v4676_v2 = vld [vmem:[%s8794_s1 + $0x2b0] sm:$0xf] }
  0x1f   :  { %v5457_v5 = vld [vmem:[%s8794_s1 + $0x2b4] sm:$0xf0]  ;;  %v4541_v12 = vor.u32 %v5423_v1, %v4540_v62  ;;  %v4532_v16 = vld [vmem:[%s8794_s1 + $0x190] sm:$0xf]  ;;  %v4604_v19 = vld [vmem:[%s8794_s1 + $0x220] sm:$0xf] }
  0x20   :  { %5631 = vmatpush.bf16.msra.mxu2 %v4333_v54  ;;  %839 = vmatpush.bf16.msra.mxu0 %v4333_v54  ;;  %v67_v54 = vld [vmem:[%s8795_s0 + $0xb0] sm:$0xff]  ;;  %v4677_v13 = vor.u32 %v5457_v5, %v4676_v2  ;;  %v5421_v18 = vld [vmem:[%s8794_s1 + $0x194] sm:$0xf0]  ;;  %v5439_v20 = vld [vmem:[%s8794_s1 + $0x224] sm:$0xf0] }
  0x21   :  { %5639 = vmatpush.bf16.msra.mxu3 %v4397_v58  ;;  %888 = vmatpush.bf16.msra.mxu1 %v4397_v58  ;;  %v4549_v58 = vor.u32 %v5425_v47, %v4548_v44  ;;  %v4533_v21 = vor.u32 %v5421_v18, %v4532_v16  ;;  %v5455_v24 = vld [vmem:[%s8794_s1 + $0x2a4] sm:$0xf0]  ;;  %v4460_v25 = vld [vmem:[%s8794_s1 + $0x100] sm:$0xf]  ;;  %v4596_v30 = vld [vmem:[%s8794_s1 + $0x210] sm:$0xf] }
  0x22   :  { %v4524_v28 = vld [vmem:[%s8794_s1 + $0x180] sm:$0xf]  ;;  %v5419_v29 = vld [vmem:[%s8794_s1 + $0x184] sm:$0xf0]  ;;  %v5437_v32 = vld [vmem:[%s8794_s1 + $0x214] sm:$0xf0] }
  0x23   :  { %860 = vmatmul.bf16.vlgmr.msra.gmra.mxu2 %v6085_v3  ;;  %840 = vmatmul.bf16.vlgmr.msra.gmra.mxu0 %v6087_v4  ;;  %v4660_v33 = vld [vmem:[%s8794_s1 + $0x290] sm:$0xf]  ;;  %v4597_v36 = vor.u32 %v5437_v32, %v4596_v30  ;;  %v73_v42 = vld [vmem:[%s8795_s0 + $0xe0] sm:$0xff]  ;;  %v80_v43 = vld [vmem:[%s8795_s0 + $0x118] sm:$0xff] }
  0x24   :  { %930 = vmatpush.bf16.msrb.mxu2 %v4517_v59  ;;  %909 = vmatmul.bf16.vlgmr.msra.gmra.mxu3 %v6098_v8  ;;  %v4685_v59 = vor.u32 %v5459_v49, %v4684_v48  ;;  %v130_v45 = vld [vmem:[%s8795_s0 + $0x2a8] sm:$0xff]  ;;  %v137_v46 = vld [vmem:[%s8795_s0 + $0x2e0] sm:$0xff]  ;;  %v6318_v50 = vpack.c.bf16 %v80_v43, %v73_v42  ;;  %v5400_v62 = vld [vmem:[%s8794_s1 + $0xf4] sm:$0xf] }
  0x25   :  { %979 = vmatpush.bf16.msrb.mxu3 %v4581_v63  ;;  %1028 = vmatpush.bf16.msrb.mxu0 %v4645_v9  ;;  %v6217_v63 = vpack.c.bf16 %v122_v39, %v115_v38  ;;  %v6232_v9 = vpack.c.bf16 %v67_v54, %v60_v52  ;;  %v4588_v38 = vld [vmem:[%s8794_s1 + $0x200] sm:$0xf]  ;;  %v5435_v39 = vld [vmem:[%s8794_s1 + $0x204] sm:$0xf0]  ;;  %v6320_v51 = vpack.c.bf16 %v137_v46, %v130_v45  ;;  %v4454_v1 = vld [vmem:[%s8794_s1 + $0xf8] sm:$0xf0] }
  0x26   :  { %889 = vmatmul.bf16.vlgmr.msra.gmra.mxu1 %v6100_v10  ;;  %v4589_v44 = vor.u32 %v5435_v39, %v4588_v38  ;;  %v74_v47 = vld [vmem:[%s8795_s0 + $0xe8] sm:$0xff]  ;;  %v81_v48 = vld [vmem:[%s8795_s0 + $0x120] sm:$0xff]  ;;  %v5416_v2 = vld [vmem:[%s8794_s1 + $0x174] sm:$0xf]  ;;  %v4457_v5 = vor.u32 %v5400_v62, %v4454_v1 }
  0x27   :  { %1077 = vmatpush.bf16.msrb.mxu1 %v4709_v15  ;;  %v5405_v15 = vld [vmem:[%s8794_s1 + $0x114] sm:$0xf0]  ;;  %v6322_v52 = vpack.c.bf16 %v81_v48, %v74_v47  ;;  %v5451_v54 = vld [vmem:[%s8794_s1 + $0x284] sm:$0xf0]  ;;  %v4716_v56 = vld [vmem:[%s8794_s1 + $0x300] sm:$0xf] }
  0x28   :  { %931 = vmatpush.bf16.msrb.mxu2 %v4509_v11  ;;  %v4477_v11 = vor.u32 %v5407_v61, %v4476_v60  ;;  %v5467_v57 = vld [vmem:[%s8794_s1 + $0x304] sm:$0xf0]  ;;  %v4390_v60 = vld [vmem:[%s8794_s1 + $0x78] sm:$0xf0]  ;;  %v5414_v30 = vld [vmem:[%s8794_s1 + $0x164] sm:$0xf] }
  0x29   :  { %980 = vmatpush.bf16.msrb.mxu3 %v4573_v14  ;;  %1029 = vmatpush.bf16.msrb.mxu0 %v4637_v22  ;;  %v4468_v14 = vld [vmem:[%s8794_s1 + $0x110] sm:$0xf]  ;;  %v4605_v22 = vor.u32 %v5439_v20, %v4604_v19  ;;  %v144_v16 = vld [vmem:[%s8795_s0 + $0x318] sm:$0xff]  ;;  %v50_v39 = vld [vmem:[%s8795_s0 + $0x28] sm:$0xff] }
  0x2a   :  { %v4469_v17 = vor.u32 %v5405_v15, %v4468_v14  ;;  %v87_v14 = vld [vmem:[%s8795_s0 + $0x150] sm:$0xff]  ;;  %v94_v15 = vld [vmem:[%s8795_s0 + $0x188] sm:$0xff]  ;;  %v88_v18 = vld [vmem:[%s8795_s0 + $0x158] sm:$0xff] }
  0x2b   :  { %1078 = vmatpush.bf16.msrb.mxu1 %v4701_v27  ;;  %v95_v19 = vld [vmem:[%s8795_s0 + $0x190] sm:$0xff]  ;;  %v4374_v46 = vld [vmem:[%s8794_s1 + $0x58] sm:$0xf0]  ;;  %v62_v62 = vld [vmem:[%s8795_s0 + $0x88] sm:$0xff] }
  0x2c   :  { %932 = vmatpush.bf16.msrb.mxu2 %v4501_v23  ;;  %v4668_v23 = vld [vmem:[%s8794_s1 + $0x2a0] sm:$0xf]  ;;  %v55_v38 = vld [vmem:[%s8795_s0 + $0x50] sm:$0xff] }
  0x2d   :  { %981 = vmatpush.bf16.msrb.mxu3 %v4565_v26  ;;  %1030 = vmatpush.bf16.msrb.mxu0 %v4629_v34  ;;  %v5403_v26 = vld [vmem:[%s8794_s1 + $0x104] sm:$0xf0]  ;;  %v4669_v27 = vor.u32 %v5455_v24, %v4668_v23  ;;  %v5453_v34 = vld [vmem:[%s8794_s1 + $0x294] sm:$0xf0]  ;;  %v6388_v23 = vpack.c.bf16 %v95_v19, %v88_v18  ;;  %v5382_v24 = vld [vmem:[%s8794_s1 + $0x64] sm:$0xf] }
  0x2e   :  { %v4461_v31 = vor.u32 %v5403_v26, %v4460_v25  ;;  %v4661_v37 = vor.u32 %v5453_v34, %v4660_v33  ;;  %v4382_v25 = vld [vmem:[%s8794_s1 + $0x68] sm:$0xf0]  ;;  %v47_v33 = vld [vmem:[%s8795_s0 + $0x10] sm:$0xff]  ;;  %v69_v1 = vld [vmem:[%s8795_s0 + $0xc0] sm:$0xff] }
  0x2f   :  { %1079 = vmatpush.bf16.msrb.mxu1 %v4693_v41  ;;  %v136_v41 = vld [vmem:[%s8795_s0 + $0x2d8] sm:$0xff]  ;;  %v4385_v26 = vor.u32 %v5382_v24, %v4382_v25  ;;  %v54_v34 = vld [vmem:[%s8795_s0 + $0x48] sm:$0xff]  ;;  %v5380_v45 = vld [vmem:[%s8794_s1 + $0x54] sm:$0xf] }
  0x30   :  { %933 = vmatpush.bf16.msrb.mxu2 %v4493_v35  ;;  %v4525_v35 = vor.u32 %v5419_v29, %v4524_v28  ;;  %v4446_v28 = vld [vmem:[%s8794_s1 + $0xe8] sm:$0xf0]  ;;  %v4377_v47 = vor.u32 %v5380_v45, %v4374_v46  ;;  %v5396_v48 = vld [vmem:[%s8794_s1 + $0xd4] sm:$0xf]  ;;  %v5410_v24 = vld [vmem:[%s8794_s1 + $0x144] sm:$0xf] }
  0x31   :  { %982 = vmatpush.bf16.msrb.mxu3 %v4557_v40  ;;  %1031 = vmatpush.bf16.msrb.mxu0 %v4621_v53  ;;  %v129_v40 = vld [vmem:[%s8795_s0 + $0x2a0] sm:$0xff]  ;;  %v4430_v18 = vld [vmem:[%s8794_s1 + $0xc8] sm:$0xf0] }
  0x32   :  { %v6316_v49 = vpack.c.bf16 %v136_v41, %v129_v40  ;;  %v4652_v53 = vld [vmem:[%s8794_s1 + $0x280] sm:$0xf]  ;;  %v6436_v41 = vpack.c.bf16 %v54_v34, %v47_v33  ;;  %v4494_v25 = vld [vmem:[%s8794_s1 + $0x148] sm:$0xf0] }
  0x33   :  { %1080 = vmatpush.bf16.msrb.mxu1 %v4685_v59  ;;  %865 = vmatmul.bf16.gmra.mxu2 %v6217_v63  ;;  %v4717_v59 = vor.u32 %v5467_v57, %v4716_v56  ;;  %v57_v40 = vld [vmem:[%s8795_s0 + $0x60] sm:$0xff]  ;;  %v4502_v56 = vld [vmem:[%s8794_s1 + $0x158] sm:$0xf0]  ;;  %v78_v33 = vld [vmem:[%s8795_s0 + $0x108] sm:$0xff] }
  0x34   :  { %934 = vmatpush.bf16.msrb.mxu2 %v4485_v55  ;;  %845 = vmatmul.bf16.gmra.mxu0 %v6219_v0  ;;  %v4653_v55 = vor.u32 %v5451_v54, %v4652_v53  ;;  %v4438_v53 = vld [vmem:[%s8794_s1 + $0xd8] sm:$0xf0]  ;;  %v85_v34 = vld [vmem:[%s8795_s0 + $0x140] sm:$0xff] }
  0x35   :  { %983 = vmatpush.bf16.msrb.mxu3 %v4549_v58  ;;  %1032 = vmatpush.bf16.msrb.mxu0 %v4613_v7  ;;  %v5384_v58 = vld [vmem:[%s8794_s1 + $0x74] sm:$0xf]  ;;  %v4518_v7 = vld [vmem:[%s8794_s1 + $0x178] sm:$0xf0]  ;;  %v4441_v54 = vor.u32 %v5396_v48, %v4438_v53  ;;  %v89_v46 = vld [vmem:[%s8795_s0 + $0x160] sm:$0xff] }
  0x36   :  { %914 = vmatmul.bf16.gmra.mxu3 %v6230_v6  ;;  %894 = vmatmul.bf16.gmra.mxu1 %v6232_v9  ;;  %v4393_v61 = vor.u32 %v5384_v58, %v4390_v60  ;;  %v61_v58 = vld [vmem:[%s8795_s0 + $0x80] sm:$0xff]  ;;  %v63_v60 = vld [vmem:[%s8795_s0 + $0x90] sm:$0xff]  ;;  %v4422_v48 = vld [vmem:[%s8794_s1 + $0xb8] sm:$0xf0] }
  0x37   :  { %1081 = vmatpush.bf16.msrb.mxu1 %v4677_v13  ;;  %v150_v13 = vld [vmem:[%s8795_s0 + $0x348] sm:$0xff]  ;;  %v96_v53 = vld [vmem:[%s8795_s0 + $0x198] sm:$0xff] }
  0x38   :  { %935 = vmatpush.bf16.msrb.mxu2 %v4477_v11  ;;  %v4521_v11 = vor.u32 %v5416_v2, %v4518_v7  ;;  %v64_v2 = vld [vmem:[%s8795_s0 + $0x98] sm:$0xff] }
  0x39   :  { %984 = vmatpush.bf16.msrb.mxu3 %v4541_v12  ;;  %1033 = vmatpush.bf16.msrb.mxu0 %v4605_v22  ;;  %v143_v12 = vld [vmem:[%s8795_s0 + $0x310] sm:$0xff] }
  0x3a   :  { %v6382_v20 = vpack.c.bf16 %v150_v13, %v143_v12  ;;  %v6494_v12 = vpack.c.bf16 %v69_v1, %v62_v62 }
  0x3b   :  { %1082 = vmatpush.bf16.msrb.mxu1 %v4669_v27  ;;  %v5398_v27 = vld [vmem:[%s8794_s1 + $0xe4] sm:$0xf] }
  0x3c   :  { %936 = vmatpush.bf16.msrb.mxu2 %v4469_v17  ;;  %v151_v17 = vld [vmem:[%s8795_s0 + $0x350] sm:$0xff]  ;;  %v4449_v29 = vor.u32 %v5398_v27, %v4446_v28  ;;  %v82_v28 = vld [vmem:[%s8795_s0 + $0x128] sm:$0xff] }
  0x3d   :  { %985 = vmatpush.bf16.msrb.mxu3 %v4533_v21  ;;  %1034 = vmatpush.bf16.msrb.mxu0 %v4597_v36  ;;  %v6384_v21 = vpack.c.bf16 %v94_v15, %v87_v14  ;;  %v6386_v22 = vpack.c.bf16 %v151_v17, %v144_v16  ;;  %v56_v36 = vld [vmem:[%s8795_s0 + $0x58] sm:$0xff]  ;;  %v5378_v14 = vld [vmem:[%s8794_s1 + $0x44] sm:$0xf]  ;;  %v4366_v15 = vld [vmem:[%s8794_s1 + $0x48] sm:$0xf0] }
  0x3e   :  { %v4369_v16 = vor.u32 %v5378_v14, %v4366_v15  ;;  %v5394_v17 = vld [vmem:[%s8794_s1 + $0xc4] sm:$0xf]  ;;  %v75_v27 = vld [vmem:[%s8795_s0 + $0xf0] sm:$0xff]  ;;  %v4486_v14 = vld [vmem:[%s8794_s1 + $0x138] sm:$0xf0] }
  0x3f   :  { %1083 = vmatpush.bf16.msrb.mxu1 %v4661_v37  ;;  %v48_v37 = vld [vmem:[%s8795_s0 + $0x18] sm:$0xff]  ;;  %v4433_v19 = vor.u32 %v5394_v17, %v4430_v18  ;;  %v4350_v17 = vld [vmem:[%s8794_s1 + $0x28] sm:$0xf0] }
  0x40   :  { %937 = vmatpush.bf16.msrb.mxu2 %v4461_v31  ;;  %v4510_v31 = vld [vmem:[%s8794_s1 + $0x168] sm:$0xf0]  ;;  %v6440_v43 = vpack.c.bf16 %v55_v38, %v48_v37  ;;  %v6550_v38 = vpack.c.bf16 %v85_v34, %v78_v33  ;;  %v113_v34 = vld [vmem:[%s8795_s0 + $0x220] sm:$0xff] }
  0x41   :  { %986 = vmatpush.bf16.msrb.mxu3 %v4525_v35  ;;  %1035 = vmatpush.bf16.msrb.mxu0 %v4589_v44  ;;  %v4513_v32 = vor.u32 %v5414_v30, %v4510_v31  ;;  %v49_v35 = vld [vmem:[%s8795_s0 + $0x20] sm:$0xff]  ;;  %v6442_v44 = vpack.c.bf16 %v57_v40, %v50_v39  ;;  %v84_v30 = vld [vmem:[%s8795_s0 + $0x138] sm:$0xff]  ;;  %v5376_v39 = vld [vmem:[%s8794_s1 + $0x34] sm:$0xf] }
  0x42   :  { %v6438_v42 = vpack.c.bf16 %v56_v36, %v49_v35  ;;  %v76_v31 = vld [vmem:[%s8795_s0 + $0xf8] sm:$0xff]  ;;  %v6544_v35 = vpack.c.bf16 %v82_v28, %v75_v27  ;;  %v110_v27 = vld [vmem:[%s8795_s0 + $0x208] sm:$0xff]  ;;  %v105_v28 = vld [vmem:[%s8795_s0 + $0x1e0] sm:$0xff] }
  0x43   :  { %870 = vmatmul.bf16.gmra.mxu2 %v6316_v49  ;;  %1084 = vmatpush.bf16.msrb.mxu1 %v4653_v55  ;;  %v5412_v55 = vld [vmem:[%s8794_s1 + $0x154] sm:$0xf]  ;;  %v4358_v40 = vld [vmem:[%s8794_s1 + $0x38] sm:$0xf0]  ;;  %v106_v33 = vld [vmem:[%s8795_s0 + $0x1e8] sm:$0xff] }
  0x44   :  { %850 = vmatmul.bf16.gmra.mxu0 %v6318_v50  ;;  %1133 = vmatpush.bf16.msra.mxu2 %v4717_v59  ;;  %v4505_v57 = vor.u32 %v5412_v55, %v4502_v56  ;;  %v68_v59 = vld [vmem:[%s8795_s0 + $0xb8] sm:$0xff]  ;;  %v4361_v45 = vor.u32 %v5376_v39, %v4358_v40  ;;  %v98_v55 = vld [vmem:[%s8795_s0 + $0x1a8] sm:$0xff] }
  0x45   :  { %1175 = vmatpush.bf16.msra.mxu3 %v4393_v61  ;;  %1224 = vmatpush.bf16.msra.mxu0 %v4457_v5  ;;  %v70_v61 = vld [vmem:[%s8795_s0 + $0xc8] sm:$0xff]  ;;  %v71_v5 = vld [vmem:[%s8795_s0 + $0xd0] sm:$0xff]  ;;  %v6490_v7 = vpack.c.bf16 %v68_v59, %v61_v58  ;;  %v97_v58 = vld [vmem:[%s8795_s0 + $0x1a0] sm:$0xff] }
  0x46   :  { %919 = vmatmul.bf16.gmra.mxu3 %v6320_v51  ;;  %899 = vmatmul.bf16.gmra.mxu1 %v6322_v52  ;;  %v6496_v13 = vpack.c.bf16 %v71_v5, %v64_v2  ;;  %v92_v59 = vld [vmem:[%s8795_s0 + $0x178] sm:$0xff]  ;;  %v5408_v5 = vld [vmem:[%s8794_s1 + $0x134] sm:$0xf] }
  0x47   :  { %1273 = vmatpush.bf16.msra.mxu1 %v4521_v11  ;;  %v6492_v11 = vpack.c.bf16 %v70_v61, %v63_v60  ;;  %v99_v60 = vld [vmem:[%s8795_s0 + $0x1b0] sm:$0xff]  ;;  %v6592_v61 = vpack.c.bf16 %v96_v53, %v89_v46  ;;  %v4489_v15 = vor.u32 %v5408_v5, %v4486_v14  ;;  %v6661_v53 = vpack.c.bf16 %v113_v34, %v106_v33  ;;  %v118_v34 = vld [vmem:[%s8795_s0 + $0x248] sm:$0xff] }
  0x48   :  { %v6598_v2 = vpack.c.bf16 %v99_v60, %v92_v59  ;;  %v5372_v59 = vld [vmem:[%s8794_s1 + $0x14] sm:$0xf]  ;;  %v4342_v60 = vld [vmem:[%s8794_s1 + $0x18] sm:$0xf0] }
  0x49   :  { %1176 = vmatpush.bf16.msra.mxu3 %v4385_v26  ;;  %1225 = vmatpush.bf16.msra.mxu0 %v4449_v29  ;;  %v4497_v26 = vor.u32 %v5410_v24, %v4494_v25  ;;  %v77_v29 = vld [vmem:[%s8795_s0 + $0x100] sm:$0xff]  ;;  %v103_v24 = vld [vmem:[%s8795_s0 + $0x1d0] sm:$0xff]  ;;  %8830 = vst [vmem:[#allocation8_spill] sm:$0xff] %v6661_v53  ;;  %v4345_v5 = vor.u32 %v5372_v59, %v4342_v60 }
  0x4a   :  { %v6546_v36 = vpack.c.bf16 %v84_v30, %v77_v29  ;;  %8827 = vst [vmem:[#allocation5_spill] sm:$0xff] %v6598_v2  ;;  %v5390_v25 = vld [vmem:[%s8794_s1 + $0xa4] sm:$0xf]  ;;  %v112_v29 = vld [vmem:[%s8795_s0 + $0x218] sm:$0xff]  ;;  %v6654_v40 = vpack.c.bf16 %v110_v27, %v103_v24 }
  0x4b   :  { %1274 = vmatpush.bf16.msra.mxu1 %v4513_v32  ;;  %v83_v32 = vld [vmem:[%s8795_s0 + $0x130] sm:$0xff]  ;;  %v117_v27 = vld [vmem:[%s8795_s0 + $0x240] sm:$0xff] }
  0x4c   :  { %8824 = vst [vmem:[#allocation2_spill] sm:$0xff] %v6546_v36  ;;  %v6548_v37 = vpack.c.bf16 %v83_v32, %v76_v31  ;;  %v104_v31 = vld [vmem:[%s8795_s0 + $0x1d8] sm:$0xff]  ;;  %v111_v32 = vld [vmem:[%s8795_s0 + $0x210] sm:$0xff] }
  0x4d   :  { %1177 = vmatpush.bf16.msra.mxu3 %v4377_v47  ;;  %1226 = vmatpush.bf16.msra.mxu0 %v4441_v54  ;;  %v5392_v47 = vld [vmem:[%s8794_s1 + $0xb4] sm:$0xf] }
  0x4e   :  { %v91_v54 = vld [vmem:[%s8795_s0 + $0x170] sm:$0xff]  ;;  %v4425_v56 = vor.u32 %v5392_v47, %v4422_v48  ;;  %v6658_v47 = vpack.c.bf16 %v111_v32, %v104_v31  ;;  %v126_v32 = vld [vmem:[%s8795_s0 + $0x288] sm:$0xff] }
  0x4f   :  { %1275 = vmatpush.bf16.msra.mxu1 %v4505_v57  ;;  %v90_v57 = vld [vmem:[%s8795_s0 + $0x168] sm:$0xff]  ;;  %v6594_v62 = vpack.c.bf16 %v98_v55, %v91_v54  ;;  %v5406_v54 = vld [vmem:[%s8794_s1 + $0x124] sm:$0xf]  ;;  %v119_v31 = vld [vmem:[%s8795_s0 + $0x250] sm:$0xff] }
  0x50   :  { %v6596_v1 = vpack.c.bf16 %v97_v58, %v90_v57  ;;  %8829 = vst [vmem:[#allocation7_spill] sm:$0xff] %v6658_v47  ;;  %v4478_v55 = vld [vmem:[%s8794_s1 + $0x128] sm:$0xf0]  ;;  %v6720_v60 = vpack.c.bf16 %v126_v32, %v119_v31 }
  0x51   :  { %1178 = vmatpush.bf16.msra.mxu3 %v4369_v16  ;;  %1227 = vmatpush.bf16.msra.mxu0 %v4433_v19  ;;  %8825 = vst [vmem:[#allocation3_spill] sm:$0xff] %v6594_v62  ;;  %v5374_v16 = vld [vmem:[%s8794_s1 + $0x24] sm:$0xf]  ;;  %v6619_v19 = vld [vmem:[%s8796_s2] sm:$0x3]  ;;  %v4481_v57 = vor.u32 %v5406_v54, %v4478_v55  ;;  %v120_v54 = vld [vmem:[%s8795_s0 + $0x258] sm:$0xff] }
  0x52   :  { %8826 = vst [vmem:[#allocation4_spill] sm:$0xff] %v6596_v1  ;;  %v4353_v18 = vor.u32 %v5374_v16, %v4350_v17  ;;  %v6652_v39 = vperm.slane %v6619_v19, 0  ;;  %v127_v55 = vld [vmem:[%s8795_s0 + $0x290] sm:$0xff]  ;;  %v4334_v31 = vld [vmem:[%s8794_s1 + $0x8] sm:$0xf0] }
  0x53   :  { %875 = vmatmul.bf16.gmra.mxu2 %v6382_v20  ;;  %1276 = vmatpush.bf16.msra.mxu1 %v4497_v26  ;;  %v4414_v26 = vld [vmem:[%s8794_s1 + $0xa8] sm:$0xf0]  ;;  %8831 = vst [vmem:[#allocation9_spill] sm:$0xff] %v6720_v60 }
  0x54   :  { %855 = vmatmul.bf16.gmra.mxu0 %v6384_v21  ;;  %v4417_v30 = vor.u32 %v5390_v25, %v4414_v26 }
  0x55   :  { %1179 = vmatpush.bf16.msra.mxu3 %v4361_v45  ;;  %1228 = vmatpush.bf16.msra.mxu0 %v4425_v56  ;;  %v6656_v45 = vpack.c.bf16 %v112_v29, %v105_v28  ;;  %v5388_v28 = vld [vmem:[%s8794_s1 + $0x94] sm:$0xf]  ;;  %v4406_v29 = vld [vmem:[%s8794_s1 + $0x98] sm:$0xf0] }
  0x56   :  { %924 = vmatmul.bf16.gmra.mxu3 %v6386_v22  ;;  %904 = vmatmul.bf16.gmra.mxu1 %v6388_v23  ;;  %v4409_v33 = vor.u32 %v5388_v28, %v4406_v29 }
  0x57   :  { %1277 = vmatpush.bf16.msra.mxu1 %v4489_v15  ;;  %8828 = vst [vmem:[#allocation6_spill] sm:$0xff] %v6656_v45 }
  0x59   :  { %1180 = vmatpush.bf16.msra.mxu3 %v4353_v18  ;;  %1229 = vmatpush.bf16.msra.mxu0 %v4417_v30  ;;  %v124_v30 = vld [vmem:[%s8795_s0 + $0x278] sm:$0xff] }
  0x5a   :  { %v6718_v59 = vpack.c.bf16 %v124_v30, %v117_v27  ;;  %v5370_v30 = vld [vmem:[%s8794_s1 + $0x4] sm:$0xf] }
  0x5b   :  { %1278 = vmatpush.bf16.msra.mxu1 %v4481_v57  ;;  %v4337_v32 = vor.u32 %v5370_v30, %v4334_v31  ;;  %v132_v31 = vld [vmem:[%s8795_s0 + $0x2b8] sm:$0xff] }
  0x5d   :  { %1181 = vmatpush.bf16.msra.mxu3 %v4345_v5  ;;  %1230 = vmatpush.bf16.msra.mxu0 %v4409_v33 }
  0x61   :  { %1182 = vmatpush.bf16.msra.mxu3 %v4337_v32  ;;  %v139_v32 = vld [vmem:[%s8795_s0 + $0x2f0] sm:$0xff] }
  0x63   :  { %938 = vmatmul.bf16.vlgmr.msrb.gmra.mxu2 %v6436_v41 }
  0x64   :  { %1036 = vmatmul.bf16.vlgmr.msrb.gmra.mxu0 %v6438_v42 }
  0x66   :  { %987 = vmatmul.bf16.vlgmr.msrb.gmra.mxu3 %v6440_v43  ;;  %1085 = vmatmul.bf16.vlgmr.msrb.gmra.mxu1 %v6442_v44 }
  0x73   :  { %943 = vmatmul.bf16.gmra.mxu2 %v6490_v7 }
  0x74   :  { %1041 = vmatmul.bf16.gmra.mxu0 %v6492_v11 }
  0x76   :  { %992 = vmatmul.bf16.gmra.mxu3 %v6494_v12  ;;  %1090 = vmatmul.bf16.gmra.mxu1 %v6496_v13 }
  0x83   :  { %948 = vmatmul.bf16.gmra.mxu2 %v6544_v35 }
  0x84   :  { %1046 = vmatmul.bf16.gmra.mxu0 %v6546_v36 }
  0x86   :  { %997 = vmatmul.bf16.gmra.mxu3 %v6548_v37  ;;  %1095 = vmatmul.bf16.gmra.mxu1 %v6550_v38 }
  0x93   :  { %953 = vmatmul.bf16.gmra.mxu2 %v6592_v61 }
  0x94   :  { %1051 = vmatmul.bf16.gmra.mxu0 %v6594_v62 }
  0x96   :  { %1002 = vmatmul.bf16.gmra.mxu3 %v6596_v1  ;;  %1100 = vmatmul.bf16.gmra.mxu1 %v6598_v2 }
  0xa0   :  { %v841_v46 = vpop.f32.mrf.mxu0 }
  0xa1   :  { %v842_v48 = vadd.f32 %v841_v46, %v6652_v39  ;;  %v125_v46 = vld [vmem:[%s8795_s0 + $0x280] sm:$0xff] }
  0xa3   :  { %v890_v56 = vpop.f32.mrf.mxu1  ;;  %958 = vmatmul.bf16.gmra.mxu2 %v6654_v40 }
  0xa4   :  { %v6670_v58 = vadd.f32 %v890_v56, %v842_v48  ;;  %1056 = vmatmul.bf16.gmra.mxu0 %v6656_v45 }
  0xa6   :  { %1007 = vmatmul.bf16.gmra.mxu3 %v6658_v47  ;;  %1105 = vmatmul.bf16.gmra.mxu1 %v6661_v53  ;;  %v861_v14 = vpop.f32.mrf.mxu2 }
  0xa7   :  { %v862_v15 = vadd.f32 %v861_v14, %v6652_v39  ;;  %v910_v16 = vpop.f32.mrf.mxu3  ;;  %v6722_v14 = vpack.c.bf16 %v125_v46, %v118_v34 }
  0xa8   :  { %v843_v17 = vpop.f32.mrf.mxu0 }
  0xa9   :  { %v6682_v18 = vadd.f32 %v910_v16, %v862_v15  ;;  %v844_v24 = vadd.f32 %v843_v17, %v6652_v39  ;;  %8832 = vst [vmem:[#allocation10_spill] sm:$0xff] %v6722_v14  ;;  %v6727_v17 = vpack.c.bf16 %v127_v55, %v120_v54 }
  0xab   :  { %v892_v25 = vpop.f32.mrf.mxu1  ;;  %8833 = vst [vmem:[#allocation11_spill] sm:$0xff] %v6727_v17 }
  0xac   :  { %v6685_v26 = vadd.f32 %v892_v25, %v844_v24  ;;  %v5404_v24 = vld [vmem:[%s8794_s1 + $0x114] sm:$0xf]  ;;  %v4470_v25 = vld [vmem:[%s8794_s1 + $0x118] sm:$0xf0] }
  0xad   :  { %v4473_v28 = vor.u32 %v5404_v24, %v4470_v25  ;;  %v4398_v24 = vld [vmem:[%s8794_s1 + $0x88] sm:$0xf0] }
  0xae   :  { %v863_v48 = vpop.f32.mrf.mxu2  ;;  %v138_v25 = vld [vmem:[%s8795_s0 + $0x2e8] sm:$0xff] }
  0xaf   :  { %v864_v56 = vadd.f32 %v863_v48, %v6652_v39  ;;  %v912_v57 = vpop.f32.mrf.mxu3  ;;  %1279 = vmatpush.bf16.msra.mxu1 %v4473_v28  ;;  %v140_v28 = vld [vmem:[%s8795_s0 + $0x2f8] sm:$0xff] }
  0xb1   :  { %v846_v5 = vpop.f32.mrf.mxu0  ;;  %v6724_v15 = vadd.f32 %v912_v57, %v864_v56 }
  0xb2   :  { %v847_v16 = vadd.f32 %v846_v5, %v6652_v39  ;;  %v131_v5 = vld [vmem:[%s8795_s0 + $0x2b0] sm:$0xff] }
  0xb3   :  { %v895_v27 = vpop.f32.mrf.mxu1  ;;  %963 = vmatmul.bf16.gmra.mxu2 %v6718_v59 }
  0xb4   :  { %v6736_v29 = vadd.f32 %v895_v27, %v847_v16  ;;  %1061 = vmatmul.bf16.gmra.mxu0 %v6720_v60  ;;  %v5386_v16 = vld [vmem:[%s8794_s1 + $0x84] sm:$0xf]  ;;  %v6788_v60 = vpack.c.bf16 %v139_v32, %v132_v31  ;;  %v5432_v31 = vld [vmem:[%s8794_s1 + $0x1f4] sm:$0xf]  ;;  %v4582_v32 = vld [vmem:[%s8794_s1 + $0x1f8] sm:$0xf0] }
  0xb5   :  { %v133_v27 = vld [vmem:[%s8795_s0 + $0x2c0] sm:$0xff]  ;;  %v4401_v30 = vor.u32 %v5386_v16, %v4398_v24 }
  0xb6   :  { %1012 = vmatmul.bf16.gmra.mxu3 %v6722_v14  ;;  %1110 = vmatmul.bf16.gmra.mxu1 %v6727_v17  ;;  %v866_v33 = vpop.f32.mrf.mxu2  ;;  %v6786_v16 = vpack.c.bf16 %v140_v28, %v133_v27  ;;  %8835 = vst [vmem:[#allocation13_spill] sm:$0xff] %v6788_v60 }
  0xb7   :  { %v867_v34 = vadd.f32 %v866_v33, %v6652_v39  ;;  %1231 = vmatpush.bf16.msra.mxu0 %v4401_v30  ;;  %v5402_v30 = vld [vmem:[%s8794_s1 + $0x104] sm:$0xf] }
  0xb8   :  { %8834 = vst [vmem:[#allocation12_spill] sm:$0xff] %v6786_v16 }
  0xb9   :  { %v915_v46 = vpop.f32.mrf.mxu3  ;;  %v848_v48 = vpop.f32.mrf.mxu0 }
  0xba   :  { %v6748_v54 = vadd.f32 %v915_v46, %v867_v34  ;;  %v849_v55 = vadd.f32 %v848_v48, %v6652_v39  ;;  %v134_v34 = vld [vmem:[%s8795_s0 + $0x2c8] sm:$0xff]  ;;  %v141_v46 = vld [vmem:[%s8795_s0 + $0x300] sm:$0xff] }
  0xbb   :  { %v897_v56 = vpop.f32.mrf.mxu1  ;;  %v6793_v45 = vpack.c.bf16 %v141_v46, %v134_v34  ;;  %v4646_v34 = vld [vmem:[%s8794_s1 + $0x278] sm:$0xf0] }
  0xbc   :  { %v6751_v57 = vadd.f32 %v897_v56, %v849_v55  ;;  %v6784_v56 = vpack.c.bf16 %v138_v25, %v131_v5  ;;  %v4462_v5 = vld [vmem:[%s8794_s1 + $0x108] sm:$0xf0] }
  0xbd   :  { %8836 = vst [vmem:[#allocation14_spill] sm:$0xff] %v6793_v45  ;;  %v4465_v27 = vor.u32 %v5402_v30, %v4462_v5 }
  0xbe   :  { %v868_v33 = vpop.f32.mrf.mxu2 }
  0xbf   :  { %v869_v48 = vadd.f32 %v868_v33, %v6652_v39  ;;  %1280 = vmatpush.bf16.msra.mxu1 %v4465_v27  ;;  %v5448_v33 = vld [vmem:[%s8794_s1 + $0x274] sm:$0xf] }
  0xc1   :  { %v917_v55 = vpop.f32.mrf.mxu3  ;;  %v851_v24 = vpop.f32.mrf.mxu0 }
  0xc2   :  { %v6790_v17 = vadd.f32 %v917_v55, %v869_v48  ;;  %v852_v14 = vadd.f32 %v851_v24, %v6652_v39  ;;  %v4649_v48 = vor.u32 %v5448_v33, %v4646_v34  ;;  %v4710_v33 = vld [vmem:[%s8794_s1 + $0x2f8] sm:$0xf0]  ;;  %v147_v34 = vld [vmem:[%s8795_s0 + $0x330] sm:$0xff] }
  0xc3   :  { %v900_v25 = vpop.f32.mrf.mxu1  ;;  %968 = vmatmul.bf16.gmra.mxu2 %v6784_v56 }
  0xc4   :  { %v6802_v28 = vadd.f32 %v900_v25, %v852_v14  ;;  %1066 = vmatmul.bf16.gmra.mxu0 %v6786_v16  ;;  %v4585_v14 = vor.u32 %v5432_v31, %v4582_v32  ;;  %1371 = vmatpush.bf16.msrb.mxu3 %v4649_v48  ;;  %v145_v31 = vld [vmem:[%s8795_s0 + $0x320] sm:$0xff]  ;;  %v5464_v32 = vld [vmem:[%s8794_s1 + $0x2f4] sm:$0xf] }
  0xc5   :  { %v4713_v48 = vor.u32 %v5464_v32, %v4710_v33 }
  0xc6   :  { %1017 = vmatmul.bf16.gmra.mxu3 %v6788_v60  ;;  %1115 = vmatmul.bf16.gmra.mxu1 %v6793_v45  ;;  %v871_v46 = vpop.f32.mrf.mxu2 }
  0xc7   :  { %v872_v55 = vadd.f32 %v871_v46, %v6652_v39  ;;  %1322 = vmatpush.bf16.msrb.mxu2 %v4585_v14  ;;  %v152_v14 = vld [vmem:[%s8795_s0 + $0x358] sm:$0xff]  ;;  %v154_v46 = vld [vmem:[%s8795_s0 + $0x368] sm:$0xff]  ;;  %1420 = vmatpush.bf16.msrb.mxu0 %v4713_v48 }
  0xc8   :  { %v6856_v45 = vpack.c.bf16 %v152_v14, %v145_v31  ;;  %v6858_v60 = vpack.c.bf16 %v154_v46, %v147_v34  ;;  %v5466_v31 = vld [vmem:[%s8794_s1 + $0x304] sm:$0xf]  ;;  %v4718_v14 = vld [vmem:[%s8794_s1 + $0x308] sm:$0xf0] }
  0xc9   :  { %v920_v24 = vpop.f32.mrf.mxu3  ;;  %v853_v30 = vpop.f32.mrf.mxu0  ;;  %v5430_v34 = vld [vmem:[%s8794_s1 + $0x1e4] sm:$0xf] }
  0xca   :  { %v6820_v5 = vadd.f32 %v920_v24, %v872_v55  ;;  %v854_v25 = vadd.f32 %v853_v30, %v6652_v39  ;;  %v146_v55 = vld [vmem:[%s8795_s0 + $0x328] sm:$0xff]  ;;  %v153_v24 = vld [vmem:[%s8795_s0 + $0x360] sm:$0xff]  ;;  %8837 = vst [vmem:[#allocation15_spill] sm:$0xff] %v6858_v60 }
  0xcb   :  { %v902_v27 = vpop.f32.mrf.mxu1  ;;  %v6860_v47 = vpack.c.bf16 %v153_v24, %v146_v55  ;;  %v4638_v55 = vld [vmem:[%s8794_s1 + $0x268] sm:$0xf0] }
  0xcc   :  { %v6823_v16 = vadd.f32 %v902_v27, %v854_v25  ;;  %v148_v25 = vld [vmem:[%s8795_s0 + $0x338] sm:$0xff]  ;;  %v155_v27 = vld [vmem:[%s8795_s0 + $0x370] sm:$0xff] }
  0xcd   :  { %8838 = vst [vmem:[#allocation16_spill] sm:$0xff] %v6860_v47  ;;  %v6865_v1 = vpack.c.bf16 %v155_v27, %v148_v25 }
  0xce   :  { %v873_v30 = vpop.f32.mrf.mxu2 }
  0xcf   :  { %v874_v32 = vadd.f32 %v873_v30, %v6652_v39  ;;  %8839 = vst [vmem:[#allocation17_spill] sm:$0xff] %v6865_v1 }
  0xd1   :  { %v922_v33 = vpop.f32.mrf.mxu3  ;;  %v856_v53 = vpop.f32.mrf.mxu0 }
  0xd2   :  { %v6862_v62 = vadd.f32 %v922_v33, %v874_v32  ;;  %v857_v2 = vadd.f32 %v856_v53, %v6652_v39  ;;  %v4721_v53 = vor.u32 %v5466_v31, %v4718_v14 }
  0xd3   :  { %v905_v36 = vpop.f32.mrf.mxu1  ;;  %973 = vmatmul.bf16.gmra.mxu2 %v6856_v45 }
  0xd4   :  { %v6868_v48 = vadd.f32 %v905_v36, %v857_v2  ;;  %1071 = vmatmul.bf16.gmra.mxu0 %v6858_v60  ;;  %v4574_v36 = vld [vmem:[%s8794_s1 + $0x1e8] sm:$0xf0]  ;;  %v5446_v2 = vld [vmem:[%s8794_s1 + $0x264] sm:$0xf]  ;;  %1476 = vmatpush.bf16.msrb.mxu1 %v4721_v53 }
  0xd5   :  { %v4577_v46 = vor.u32 %v5430_v34, %v4574_v36  ;;  %v4641_v30 = vor.u32 %v5446_v2, %v4638_v55  ;;  %v5462_v34 = vld [vmem:[%s8794_s1 + $0x2e4] sm:$0xf]  ;;  %v4702_v53 = vld [vmem:[%s8794_s1 + $0x2e8] sm:$0xf0]  ;;  %v51_v36 = vld [vmem:[%s8795_s0 + $0x30] sm:$0xff] }
  0xd6   :  { %1022 = vmatmul.bf16.gmra.mxu3 %v6860_v47  ;;  %1120 = vmatmul.bf16.gmra.mxu1 %v6865_v1  ;;  %v876_v24 = vpop.f32.mrf.mxu2  ;;  %v58_v2 = vld [vmem:[%s8795_s0 + $0x68] sm:$0xff] }
  0xd7   :  { %v877_v25 = vadd.f32 %v876_v24, %v6652_v39  ;;  %1323 = vmatpush.bf16.msrb.mxu2 %v4577_v46  ;;  %1372 = vmatpush.bf16.msrb.mxu3 %v4641_v30  ;;  %v4705_v46 = vor.u32 %v5462_v34, %v4702_v53  ;;  %v5444_v34 = vld [vmem:[%s8794_s1 + $0x254] sm:$0xf] }
  0xd9   :  { %v925_v27 = vpop.f32.mrf.mxu3  ;;  %v858_v32 = vpop.f32.mrf.mxu0  ;;  %1421 = vmatpush.bf16.msrb.mxu0 %v4705_v46 }
  0xda   :  { %v6892_v33 = vadd.f32 %v925_v27, %v877_v25  ;;  %v859_v31 = vadd.f32 %v858_v32, %v6652_v39  ;;  %v6910_v25 = vpack.c.bf16 %v58_v2, %v51_v36 }
  0xdb   :  { %v907_v14 = vpop.f32.mrf.mxu1 }
  0xdc   :  { %v6895_v60 = vadd.f32 %v907_v14, %v859_v31  ;;  %v5428_v14 = vld [vmem:[%s8794_s1 + $0x1d4] sm:$0xf] }
  0xde   :  { %v878_v55 = vpop.f32.mrf.mxu2 }
  0xdf   :  { %v879_v24 = vadd.f32 %v878_v55, %v6652_v39  ;;  %v4566_v39 = vld [vmem:[%s8794_s1 + $0x1d8] sm:$0xf0] }
  0xe0   :  { %v4569_v53 = vor.u32 %v5428_v14, %v4566_v39  ;;  %v4694_v14 = vld [vmem:[%s8794_s1 + $0x2d8] sm:$0xf0]  ;;  %v65_v39 = vld [vmem:[%s8795_s0 + $0xa0] sm:$0xff] }
  0xe1   :  { %v927_v30 = vpop.f32.mrf.mxu3  ;;  %v1037_v27 = vpop.f32.mrf.mxu0 }
  0xe2   :  { %v6912_v32 = vadd.f32 %v927_v30, %v879_v24  ;;  %1324 = vmatpush.bf16.msrb.mxu2 %v4569_v53 }
  0xe3   :  { %v1086_v31 = vpop.f32.mrf.mxu1  ;;  %4722 = vmatmul.msk.bf16.vlgmr.msra.gmra.mxu2 %vm807_vm0, %v6910_v25 }
  0xe4   :  { %1232 = vmatmul.bf16.vlgmr.msra.gmra.mxu0 %v6100_v10  ;;  %v4630_v10 = vld [vmem:[%s8794_s1 + $0x258] sm:$0xf0] }
  0xe5   :  { %v4633_v36 = vor.u32 %v5444_v34, %v4630_v10 }
  0xe6   :  { %1183 = vmatmul.bf16.vlgmr.msra.gmra.mxu3 %v6087_v4  ;;  %1281 = vmatmul.bf16.vlgmr.msra.gmra.mxu1 %v6436_v41  ;;  %v939_v4 = vpop.f32.mrf.mxu2  ;;  %v5460_v41 = vld [vmem:[%s8794_s1 + $0x2d4] sm:$0xf] }
  0xe7   :  { %v940_v2 = vadd.f32 %v939_v4, %v6670_v58  ;;  %1373 = vmatpush.bf16.msrb.mxu3 %v4633_v36  ;;  %v72_v58 = vld [vmem:[%s8795_s0 + $0xd8] sm:$0xff]  ;;  %v4697_v34 = vor.u32 %v5460_v41, %v4694_v14 }
  0xe8   :  { %v6947_v36 = vpack.c.bf16 %v72_v58, %v65_v39 }
  0xe9   :  { %v988_v46 = vpop.f32.mrf.mxu3  ;;  %v1039_v55 = vpop.f32.mrf.mxu0  ;;  %1422 = vmatpush.bf16.msrb.mxu0 %v4697_v34 }
  0xea   :  { %v989_v24 = vadd.f32 %v988_v46, %v940_v2 }
  0xeb   :  { %v1088_v30 = vpop.f32.mrf.mxu1 }
  0xec   :  { %v1038_v1 = vadd.f32 %v1037_v27, %v989_v24 }
  0xee   :  { %v6944_v53 = vadd.f32 %v1086_v31, %v1038_v1  ;;  %v941_v27 = vpop.f32.mrf.mxu2  ;;  %v5426_v1 = vld [vmem:[%s8794_s1 + $0x1c4] sm:$0xf] }
  0xef   :  { %v942_v10 = vadd.f32 %v941_v27, %v6685_v26  ;;  %v4558_v26 = vld [vmem:[%s8794_s1 + $0x1c8] sm:$0xf0]  ;;  %v5442_v31 = vld [vmem:[%s8794_s1 + $0x244] sm:$0xf] }
  0xf1   :  { %v990_v4 = vpop.f32.mrf.mxu3  ;;  %v1042_v2 = vpop.f32.mrf.mxu0 }
  0xf2   :  { %v991_v46 = vadd.f32 %v990_v4, %v942_v10 }
  0xf3   :  { %v1091_v24 = vpop.f32.mrf.mxu1  ;;  %4723 = vmatmul.msk.bf16.gmra.mxu2 %vm807_vm0, %v6947_v36 }
  0xf4   :  { %v1040_v47 = vadd.f32 %v1039_v55, %v991_v46  ;;  %1237 = vmatmul.bf16.gmra.mxu0 %v6232_v9  ;;  %v4561_v55 = vor.u32 %v5426_v1, %v4558_v26  ;;  %v4622_v9 = vld [vmem:[%s8794_s1 + $0x248] sm:$0xf0] }
  0xf5   :  { %v4625_v14 = vor.u32 %v5442_v31, %v4622_v9 }
  0xf6   :  { %1188 = vmatmul.bf16.gmra.mxu3 %v6219_v0  ;;  %1286 = vmatmul.bf16.gmra.mxu1 %v6490_v7  ;;  %v6966_v0 = vadd.f32 %v1088_v30, %v1040_v47  ;;  %v944_v41 = vpop.f32.mrf.mxu2  ;;  %v5458_v7 = vld [vmem:[%s8794_s1 + $0x2c4] sm:$0xf]  ;;  %v4686_v47 = vld [vmem:[%s8794_s1 + $0x2c8] sm:$0xf0]  ;;  %v79_v30 = vld [vmem:[%s8795_s0 + $0x110] sm:$0xff] }
  0xf7   :  { %v945_v39 = vadd.f32 %v944_v41, %v6736_v29  ;;  %1325 = vmatpush.bf16.msrb.mxu2 %v4561_v55  ;;  %1374 = vmatpush.bf16.msrb.mxu3 %v4625_v14  ;;  %v86_v29 = vld [vmem:[%s8795_s0 + $0x148] sm:$0xff]  ;;  %v4689_v46 = vor.u32 %v5458_v7, %v4686_v47 }
  0xf8   :  { %v6984_v55 = vpack.c.bf16 %v86_v29, %v79_v30 }
  0xf9   :  { %v993_v58 = vpop.f32.mrf.mxu3  ;;  %v1044_v34 = vpop.f32.mrf.mxu0  ;;  %1423 = vmatpush.bf16.msrb.mxu0 %v4689_v46 }
  0xfa   :  { %v994_v27 = vadd.f32 %v993_v58, %v945_v39  ;;  %v5440_v58 = vld [vmem:[%s8794_s1 + $0x234] sm:$0xf] }
  0xfb   :  { %v1093_v10 = vpop.f32.mrf.mxu1 }
  0xfc   :  { %v1043_v4 = vadd.f32 %v1042_v2, %v994_v27 }
  0xfe   :  { %v6981_v1 = vadd.f32 %v1091_v24, %v1043_v4  ;;  %v946_v2 = vpop.f32.mrf.mxu2  ;;  %v5424_v24 = vld [vmem:[%s8794_s1 + $0x1b4] sm:$0xf] }
  0xff   :  { %v947_v26 = vadd.f32 %v946_v2, %v6751_v57  ;;  %v4550_v57 = vld [vmem:[%s8794_s1 + $0x1b8] sm:$0xf0] }
 0x101   :  { %v995_v31 = vpop.f32.mrf.mxu3  ;;  %v1047_v9 = vpop.f32.mrf.mxu0 }
 0x102   :  { %v996_v41 = vadd.f32 %v995_v31, %v947_v26  ;;  %v93_v26 = vld [vmem:[%s8795_s0 + $0x180] sm:$0xff] }
 0x103   :  { %v1096_v14 = vpop.f32.mrf.mxu1  ;;  %4724 = vmatmul.msk.bf16.gmra.mxu2 %vm807_vm0, %v6984_v55 }
 0x104   :  { %v1045_v39 = vadd.f32 %v1044_v34, %v996_v41  ;;  %1242 = vmatmul.bf16.gmra.mxu0 %v6322_v52  ;;  %v4553_v34 = vor.u32 %v5424_v24, %v4550_v57  ;;  %v4614_v52 = vld [vmem:[%s8794_s1 + $0x238] sm:$0xf0] }
 0x105   :  { %v4617_v4 = vor.u32 %v5440_v58, %v4614_v52 }
 0x106   :  { %1193 = vmatmul.bf16.gmra.mxu3 %v6318_v50  ;;  %1291 = vmatmul.bf16.gmra.mxu1 %v6544_v35  ;;  %v7003_v50 = vadd.f32 %v1093_v10, %v1045_v39  ;;  %v949_v27 = vpop.f32.mrf.mxu2  ;;  %v5456_v35 = vld [vmem:[%s8794_s1 + $0x2b4] sm:$0xf]  ;;  %v4678_v10 = vld [vmem:[%s8794_s1 + $0x2b8] sm:$0xf0] }
 0x107   :  { %v950_v7 = vadd.f32 %v949_v27, %v6802_v28  ;;  %1326 = vmatpush.bf16.msrb.mxu2 %v4553_v34  ;;  %1375 = vmatpush.bf16.msrb.mxu3 %v4617_v4  ;;  %v100_v28 = vld [vmem:[%s8795_s0 + $0x1b8] sm:$0xff]  ;;  %v4681_v31 = vor.u32 %v5456_v35, %v4678_v10  ;;  %v5438_v4 = vld [vmem:[%s8794_s1 + $0x224] sm:$0xf] }
 0x108   :  { %v7021_v57 = vpack.c.bf16 %v100_v28, %v93_v26 }
 0x109   :  { %v998_v47 = vpop.f32.mrf.mxu3  ;;  %v1049_v30 = vpop.f32.mrf.mxu0  ;;  %1424 = vmatpush.bf16.msrb.mxu0 %v4681_v31  ;;  %v107_v31 = vld [vmem:[%s8795_s0 + $0x1f0] sm:$0xff] }
 0x10a   :  { %v999_v29 = vadd.f32 %v998_v47, %v950_v7 }
 0x10b   :  { %v1098_v46 = vpop.f32.mrf.mxu1 }
 0x10c   :  { %v1048_v2 = vadd.f32 %v1047_v9, %v999_v29 }
 0x10e   :  { %v7018_v41 = vadd.f32 %v1096_v14, %v1048_v2  ;;  %v951_v9 = vpop.f32.mrf.mxu2  ;;  %v5422_v14 = vld [vmem:[%s8794_s1 + $0x1a4] sm:$0xf] }
 0x10f   :  { %v952_v39 = vadd.f32 %v951_v9, %v6823_v16  ;;  %v4542_v16 = vld [vmem:[%s8794_s1 + $0x1a8] sm:$0xf0] }
 0x110   :  { %v4545_v7 = vor.u32 %v5422_v14, %v4542_v16 }
 0x111   :  { %v1000_v24 = vpop.f32.mrf.mxu3  ;;  %v1052_v58 = vpop.f32.mrf.mxu0 }
 0x112   :  { %v1001_v34 = vadd.f32 %v1000_v24, %v952_v39  ;;  %1327 = vmatpush.bf16.msrb.mxu2 %v4545_v7 }
 0x113   :  { %v1101_v52 = vpop.f32.mrf.mxu1  ;;  %4725 = vmatmul.msk.bf16.gmra.mxu2 %vm807_vm0, %v7021_v57 }
 0x114   :  { %v1050_v27 = vadd.f32 %v1049_v30, %v1001_v34  ;;  %1247 = vmatmul.bf16.gmra.mxu0 %v6388_v23  ;;  %v4606_v23 = vld [vmem:[%s8794_s1 + $0x228] sm:$0xf0] }
 0x115   :  { %v4609_v30 = vor.u32 %v5438_v4, %v4606_v23  ;;  %v5436_v23 = vld [vmem:[%s8794_s1 + $0x214] sm:$0xf] }
 0x116   :  { %1198 = vmatmul.bf16.gmra.mxu3 %v6384_v21  ;;  %1296 = vmatmul.bf16.gmra.mxu1 %v6592_v61  ;;  %v7040_v21 = vadd.f32 %v1098_v46, %v1050_v27  ;;  %v954_v47 = vpop.f32.mrf.mxu2  ;;  %v5454_v61 = vld [vmem:[%s8794_s1 + $0x2a4] sm:$0xf]  ;;  %v4670_v46 = vld [vmem:[%s8794_s1 + $0x2a8] sm:$0xf0] }
 0x117   :  { %v955_v29 = vadd.f32 %v954_v47, %v6868_v48  ;;  %1376 = vmatpush.bf16.msrb.mxu3 %v4609_v30  ;;  %v114_v48 = vld [vmem:[%s8795_s0 + $0x228] sm:$0xff]  ;;  %v4673_v9 = vor.u32 %v5454_v61, %v4670_v46 }
 0x118   :  { %v7058_v27 = vpack.c.bf16 %v114_v48, %v107_v31  ;;  %v121_v31 = vld [vmem:[%s8795_s0 + $0x260] sm:$0xff] }
 0x119   :  { %v1003_v2 = vpop.f32.mrf.mxu3  ;;  %v1054_v35 = vpop.f32.mrf.mxu0  ;;  %1425 = vmatpush.bf16.msrb.mxu0 %v4673_v9 }
 0x11a   :  { %v1004_v10 = vadd.f32 %v1003_v2, %v955_v29 }
 0x11b   :  { %v1103_v26 = vpop.f32.mrf.mxu1 }
 0x11c   :  { %v1053_v28 = vadd.f32 %v1052_v58, %v1004_v10 }
 0x11e   :  { %v7055_v39 = vadd.f32 %v1101_v52, %v1053_v28  ;;  %v956_v24 = vpop.f32.mrf.mxu2  ;;  %v5420_v52 = vld [vmem:[%s8794_s1 + $0x194] sm:$0xf] }
 0x11f   :  { %v957_v58 = vadd.f32 %v956_v24, %v6895_v60  ;;  %v4534_v60 = vld [vmem:[%s8794_s1 + $0x198] sm:$0xf0] }
 0x120   :  { %v4537_v47 = vor.u32 %v5420_v52, %v4534_v60 }
 0x121   :  { %v1005_v34 = vpop.f32.mrf.mxu3  ;;  %v1057_v14 = vpop.f32.mrf.mxu0 }
 0x122   :  { %v1006_v16 = vadd.f32 %v1005_v34, %v957_v58  ;;  %1328 = vmatpush.bf16.msrb.mxu2 %v4537_v47 }
 0x123   :  { %v1106_v4 = vpop.f32.mrf.mxu1  ;;  %4726 = vmatmul.msk.bf16.gmra.mxu2 %vm807_vm0, %v7058_v27 }
 0x124   :  { %v1055_v7 = vadd.f32 %v1054_v35, %v1006_v16  ;;  %1252 = vmatmul.bf16.gmra.mxu0 %v6098_v8  ;;  %v4598_v8 = vld [vmem:[%s8794_s1 + $0x218] sm:$0xf0] }
 0x125   :  { %v4601_v29 = vor.u32 %v5436_v23, %v4598_v8  ;;  %v5434_v23 = vld [vmem:[%s8794_s1 + $0x204] sm:$0xf] }
 0x126   :  { %1203 = vmatmul.bf16.gmra.mxu3 %v6085_v3  ;;  %1301 = vmatmul.bf16.gmra.mxu1 %v6654_v40  ;;  %v7077_v3 = vadd.f32 %v1103_v26, %v1055_v7  ;;  %v959_v30 = vpop.f32.mrf.mxu2  ;;  %v5452_v40 = vld [vmem:[%s8794_s1 + $0x294] sm:$0xf]  ;;  %v4662_v26 = vld [vmem:[%s8794_s1 + $0x298] sm:$0xf0] }
 0x127   :  { %v960_v2 = vadd.f32 %v959_v30, %v6682_v18  ;;  %1377 = vmatpush.bf16.msrb.mxu3 %v4601_v29  ;;  %v128_v18 = vld [vmem:[%s8795_s0 + $0x298] sm:$0xff]  ;;  %v4665_v48 = vor.u32 %v5452_v40, %v4662_v26  ;;  %v135_v40 = vld [vmem:[%s8795_s0 + $0x2d0] sm:$0xff] }
 0x129   :  { %v1008_v35 = vpop.f32.mrf.mxu3  ;;  %v1059_v10 = vpop.f32.mrf.mxu0  ;;  %1426 = vmatpush.bf16.msrb.mxu0 %v4665_v48 }
 0x12a   :  { %v1009_v28 = vadd.f32 %v1008_v35, %v960_v2 }
 0x12b   :  { %v1108_v61 = vpop.f32.mrf.mxu1 }
 0x12c   :  { %v1058_v46 = vadd.f32 %v1057_v14, %v1009_v28  ;;  %v7095_v14 = vpack.c.bf16 %v128_v18, %v121_v31 }
 0x12e   :  { %v7092_v9 = vadd.f32 %v1106_v4, %v1058_v46  ;;  %v961_v24 = vpop.f32.mrf.mxu2  ;;  %v5418_v4 = vld [vmem:[%s8794_s1 + $0x184] sm:$0xf] }
 0x12f   :  { %v962_v58 = vadd.f32 %v961_v24, %v6724_v15  ;;  %v4526_v15 = vld [vmem:[%s8794_s1 + $0x188] sm:$0xf0] }
 0x130   :  { %v4529_v47 = vor.u32 %v5418_v4, %v4526_v15 }
 0x131   :  { %v1010_v34 = vpop.f32.mrf.mxu3  ;;  %v1062_v16 = vpop.f32.mrf.mxu0 }
 0x132   :  { %v1011_v7 = vadd.f32 %v1010_v34, %v962_v58  ;;  %1329 = vmatpush.bf16.msrb.mxu2 %v4529_v47 }
 0x133   :  { %v1111_v52 = vpop.f32.mrf.mxu1  ;;  %4727 = vmatmul.msk.bf16.gmra.mxu2 %vm807_vm0, %v7095_v14 }
 0x134   :  { %v1060_v60 = vadd.f32 %v1059_v10, %v1011_v7  ;;  %1257 = vmatmul.bf16.gmra.mxu0 %v6230_v6  ;;  %v4590_v6 = vld [vmem:[%s8794_s1 + $0x208] sm:$0xf0] }
 0x135   :  { %v4593_v30 = vor.u32 %v5434_v23, %v4590_v6 }
 0x136   :  { %1208 = vmatmul.bf16.gmra.mxu3 %v6217_v63  ;;  %1306 = vmatmul.bf16.gmra.mxu1 %v6718_v59  ;;  %v7114_v63 = vadd.f32 %v1108_v61, %v1060_v60  ;;  %v964_v8 = vpop.f32.mrf.mxu2  ;;  %v5450_v59 = vld [vmem:[%s8794_s1 + $0x284] sm:$0xf]  ;;  %v4654_v61 = vld [vmem:[%s8794_s1 + $0x288] sm:$0xf0] }
 0x137   :  { %v965_v29 = vadd.f32 %v964_v8, %v6748_v54  ;;  %1378 = vmatpush.bf16.msrb.mxu3 %v4593_v30  ;;  %v142_v54 = vld [vmem:[%s8795_s0 + $0x308] sm:$0xff]  ;;  %v4657_v26 = vor.u32 %v5450_v59, %v4654_v61  ;;  %v149_v30 = vld [vmem:[%s8795_s0 + $0x340] sm:$0xff] }
 0x138   :  { %v7132_v58 = vpack.c.bf16 %v142_v54, %v135_v40 }
 0x139   :  { %v1013_v2 = vpop.f32.mrf.mxu3  ;;  %v1064_v35 = vpop.f32.mrf.mxu0  ;;  %1427 = vmatpush.bf16.msrb.mxu0 %v4657_v26 }
 0x13a   :  { %v1014_v10 = vadd.f32 %v1013_v2, %v965_v29 }
 0x13b   :  { %v1113_v28 = vpop.f32.mrf.mxu1 }
 0x13c   :  { %v1063_v46 = vadd.f32 %v1062_v16, %v1014_v10 }
 0x13e   :  { %v7129_v31 = vadd.f32 %v1111_v52, %v1063_v46  ;;  %v966_v18 = vpop.f32.mrf.mxu2 }
 0x13f   :  { %v967_v48 = vadd.f32 %v966_v18, %v6790_v17 }
 0x141   :  { %v1015_v24 = vpop.f32.mrf.mxu3  ;;  %v1067_v34 = vpop.f32.mrf.mxu0 }
 0x142   :  { %v1016_v16 = vadd.f32 %v1015_v24, %v967_v48  ;;  %v5475_v48 = vld [vmem:[%s8797_s3 + $0x38] sm:$0xff] }
 0x143   :  { %v1116_v7 = vpop.f32.mrf.mxu1  ;;  %4728 = vmatmul.msk.bf16.gmra.mxu2 %vm807_vm0, %v7132_v58 }
 0x144   :  { %v1065_v60 = vadd.f32 %v1064_v35, %v1016_v16  ;;  %1262 = vmatmul.bf16.gmra.mxu0 %v6320_v51  ;;  %1698 = vmatpush.bf16.msra.mxu2 %v5475_v48 }
 0x146   :  { %1213 = vmatmul.bf16.gmra.mxu3 %v6316_v49  ;;  %1311 = vmatmul.bf16.gmra.mxu1 %v6784_v56  ;;  %v7139_v52 = vadd.f32 %v1113_v28, %v1065_v60  ;;  %v969_v4 = vpop.f32.mrf.mxu2  ;;  %v156_v49 = vld [vmem:[%s8795_s0 + $0x378] sm:$0xff] }
 0x147   :  { %v970_v17 = vadd.f32 %v969_v4, %v6820_v5  ;;  %v7151_v5 = vpack.c.bf16 %v156_v49, %v149_v30 }
 0x149   :  { %v1018_v15 = vpop.f32.mrf.mxu3  ;;  %v1069_v23 = vpop.f32.mrf.mxu0 }
 0x14a   :  { %v1019_v47 = vadd.f32 %v1018_v15, %v970_v17  ;;  %v7174_v17 = vperm.slane %v6619_v19, 1 }
 0x14b   :  { %v1118_v6 = vpop.f32.mrf.mxu1 }
 0x14c   :  { %v1068_v8 = vadd.f32 %v1067_v34, %v1019_v47 }
 0x14e   :  { %v7148_v51 = vadd.f32 %v1116_v7, %v1068_v8  ;;  %v971_v56 = vpop.f32.mrf.mxu2 }
 0x14f   :  { %v972_v29 = vadd.f32 %v971_v56, %v6862_v62 }
 0x151   :  { %v1020_v2 = vpop.f32.mrf.mxu3  ;;  %v1072_v35 = vpop.f32.mrf.mxu0 }
 0x152   :  { %v1021_v10 = vadd.f32 %v1020_v2, %v972_v29 }
 0x153   :  { %v1121_v28 = vpop.f32.mrf.mxu1  ;;  %4729 = vmatmul.msk.bf16.gmra.mxu2 %vm807_vm0, %v7151_v5 }
 0x154   :  { %v1070_v46 = vadd.f32 %v1069_v23, %v1021_v10  ;;  %1267 = vmatmul.bf16.gmra.mxu0 %v6386_v22  ;;  %v5483_v22 = vld [vmem:[%s8797_s3 + $0x78] sm:$0xff] }
 0x155   :  { %1747 = vmatpush.bf16.msra.mxu3 %v5483_v22 }
 0x156   :  { %1218 = vmatmul.bf16.gmra.mxu3 %v6382_v20  ;;  %1316 = vmatmul.bf16.gmra.mxu1 %v6856_v45  ;;  %v7158_v59 = vadd.f32 %v1118_v6, %v1070_v46  ;;  %v974_v61 = vpop.f32.mrf.mxu2 }
 0x157   :  { %v975_v62 = vadd.f32 %v974_v61, %v6892_v33 }
 0x159   :  { %v1023_v40 = vpop.f32.mrf.mxu3  ;;  %v1074_v54 = vpop.f32.mrf.mxu0 }
 0x15a   :  { %v1024_v26 = vadd.f32 %v1023_v40, %v975_v62 }
 0x15b   :  { %v1123_v18 = vpop.f32.mrf.mxu1 }
 0x15c   :  { %v1073_v20 = vadd.f32 %v1072_v35, %v1024_v26 }
 0x15e   :  { %v7167_v45 = vadd.f32 %v1121_v28, %v1073_v20  ;;  %v976_v24 = vpop.f32.mrf.mxu2 }
 0x15f   :  { %v977_v33 = vadd.f32 %v976_v24, %v6912_v32 }
 0x161   :  { %v1025_v34 = vpop.f32.mrf.mxu3  ;;  %v1233_v16 = vpop.f32.mrf.mxu0 }
 0x162   :  { %v1026_v7 = vadd.f32 %v1025_v34, %v977_v33 }
 0x163   :  { %v1282_v60 = vpop.f32.mrf.mxu1  ;;  %1330 = vmatmul.bf16.vlgmr.msrb.gmra.mxu2 %v6440_v43 }
 0x164   :  { %v1075_v4 = vadd.f32 %v1074_v54, %v1026_v7  ;;  %1428 = vmatmul.bf16.vlgmr.msrb.gmra.mxu0 %v6442_v44  ;;  %v5482_v44 = vld [vmem:[%s8797_s3 + $0x70] sm:$0xff] }
 0x165   :  { %1748 = vmatpush.bf16.msra.mxu3 %v5482_v44 }
 0x166   :  { %1379 = vmatmul.bf16.vlgmr.msrb.gmra.mxu3 %v6438_v42  ;;  %4730 = vmatmul.msk.bf16.vlgmr.msrb.gmra.mxu1 %vm807_vm0, %v6910_v25  ;;  %v7178_v15 = vadd.f32 %v1123_v18, %v1075_v4  ;;  %v1135_v32 = vpop.f32.mrf.mxu2  ;;  %v5474_v42 = vld [vmem:[%s8797_s3 + $0x30] sm:$0xff]  ;;  %v8840_v4 = vld [vmem:[#allocation2_spill] sm:$0xff] }
 0x167   :  { %v1136_v23 = vadd.f32 %v1135_v32, %v6944_v53  ;;  %1699 = vmatpush.bf16.msra.mxu2 %v5474_v42 }
 0x169   :  { %v1184_v47 = vpop.f32.mrf.mxu3  ;;  %v1235_v8 = vpop.f32.mrf.mxu0  ;;  %v1518_v2 = vmax.f32 %v1136_v23, 0.0 }
 0x16a   :  { %v1185_v6 = vadd.f32 %v1184_v47, %v7174_v17 }
 0x16b   :  { %v1284_v30 = vpop.f32.mrf.mxu1 }
 0x16c   :  { %v1234_v43 = vadd.f32 %v1233_v16, %v1185_v6 }
 0x16e   :  { %v7188_v19 = vadd.f32 %v1282_v60, %v1234_v43  ;;  %v1137_v25 = vpop.f32.mrf.mxu2 }
 0x16f   :  { %v1138_v53 = vadd.f32 %v1137_v25, %v6966_v0 }
 0x171   :  { %v1186_v49 = vpop.f32.mrf.mxu3  ;;  %v1238_v29 = vpop.f32.mrf.mxu0  ;;  %v1520_v35 = vmax.f32 %v1138_v53, 0.0 }
 0x172   :  { %v1187_v56 = vadd.f32 %v1186_v49, %v7174_v17 }
 0x173   :  { %v1287_v28 = vpop.f32.mrf.mxu1  ;;  %v7192_v46 = vpack.c.bf16 %v1520_v35, %v1518_v2  ;;  %1335 = vmatmul.bf16.gmra.mxu2 %v6494_v12  ;;  %v5473_v12 = vld [vmem:[%s8797_s3 + $0x28] sm:$0xff]  ;;  %v8841_v35 = vld [vmem:[#allocation4_spill] sm:$0xff] }
 0x174   :  { %v1236_v10 = vadd.f32 %v1235_v8, %v1187_v56  ;;  %1433 = vmatmul.bf16.gmra.mxu0 %v6496_v13  ;;  %1700 = vmatpush.bf16.msra.mxu2 %v5473_v12 }
 0x176   :  { %1384 = vmatmul.bf16.gmra.mxu3 %v6492_v11  ;;  %v7197_v61 = vadd.f32 %v1284_v30, %v1236_v10  ;;  %4731 = vmatmul.msk.bf16.gmra.mxu1 %vm807_vm0, %v6947_v36  ;;  %v1140_v0 = vpop.f32.mrf.mxu2  ;;  %v5481_v11 = vld [vmem:[%s8797_s3 + $0x68] sm:$0xff]  ;;  %v5480_v30 = vld [vmem:[%s8797_s3 + $0x60] sm:$0xff]  ;;  %v8842_v10 = vld [vmem:[#allocation5_spill] sm:$0xff] }
 0x177   :  { %v1141_v62 = vadd.f32 %v1140_v0, %v6981_v1  ;;  %1749 = vmatpush.bf16.msra.mxu3 %v5481_v11  ;;  %v8843_v0 = vld [vmem:[#allocation3_spill] sm:$0xff]  ;;  %v5471_v11 = vld [vmem:[%s8797_s3 + $0x18] sm:$0xff] }
 0x179   :  { %v1189_v40 = vpop.f32.mrf.mxu3  ;;  %v1240_v26 = vpop.f32.mrf.mxu0  ;;  %v1522_v33 = vmax.f32 %v1141_v62, 0.0 }
 0x17a   :  { %v1190_v54 = vadd.f32 %v1189_v40, %v7174_v17 }
 0x17b   :  { %v1289_v48 = vpop.f32.mrf.mxu1  ;;  %1750 = vmatpush.bf16.msra.mxu3 %v5480_v30 }
 0x17c   :  { %v1239_v18 = vadd.f32 %v1238_v29, %v1190_v54 }
 0x17e   :  { %v7209_v13 = vadd.f32 %v1287_v28, %v1239_v18  ;;  %v1142_v36 = vpop.f32.mrf.mxu2 }
 0x17f   :  { %v1143_v1 = vadd.f32 %v1142_v36, %v7003_v50  ;;  %v5479_v36 = vld [vmem:[%s8797_s3 + $0x58] sm:$0xff] }
 0x180   :  { %1751 = vmatpush.bf16.msra.mxu3 %v5479_v36  ;;  %v5477_v36 = vld [vmem:[%s8797_s3 + $0x48] sm:$0xff] }
 0x181   :  { %v1191_v22 = vpop.f32.mrf.mxu3  ;;  %v1243_v24 = vpop.f32.mrf.mxu0  ;;  %v1524_v34 = vmax.f32 %v1143_v1, 0.0 }
 0x182   :  { %v1192_v20 = vadd.f32 %v1191_v22, %v7174_v17 }
 0x183   :  { %v1292_v7 = vpop.f32.mrf.mxu1  ;;  %1340 = vmatmul.bf16.gmra.mxu2 %v6548_v37  ;;  %v7215_v60 = vpack.c.bf16 %v1524_v34, %v1522_v33 }
 0x184   :  { %v1241_v16 = vadd.f32 %v1240_v26, %v1192_v20  ;;  %1438 = vmatmul.bf16.gmra.mxu0 %v6550_v38  ;;  %v5472_v38 = vld [vmem:[%s8797_s3 + $0x20] sm:$0xff] }
 0x185   :  { %1701 = vmatpush.bf16.msra.mxu2 %v5472_v38 }
 0x186   :  { %1389 = vmatmul.bf16.gmra.mxu3 %v8840_v4  ;;  %v7218_v32 = vadd.f32 %v1289_v48, %v1241_v16  ;;  %4732 = vmatmul.msk.bf16.gmra.mxu1 %vm807_vm0, %v6984_v55  ;;  %v1145_v50 = vpop.f32.mrf.mxu2  ;;  %v8844_v4 = vld [vmem:[#allocation7_spill] sm:$0xff] }
 0x187   :  { %v1146_v23 = vadd.f32 %v1145_v50, %v7018_v41  ;;  %v8845_v50 = vld [vmem:[#allocation8_spill] sm:$0xff] }
 0x189   :  { %v1194_v47 = vpop.f32.mrf.mxu3  ;;  %v1245_v8 = vpop.f32.mrf.mxu0  ;;  %v1526_v49 = vmax.f32 %v1146_v23, 0.0  ;;  %1702 = vmatpush.bf16.msra.mxu2 %v5471_v11  ;;  %v5469_v11 = vld [vmem:[%s8797_s3 + $0x8] sm:$0xff] }
 0x18a   :  { %v1195_v6 = vadd.f32 %v1194_v47, %v7174_v17  ;;  %v8846_v47 = vld [vmem:[#allocation6_spill] sm:$0xff] }
 0x18b   :  { %v1294_v37 = vpop.f32.mrf.mxu1 }
 0x18c   :  { %v1244_v43 = vadd.f32 %v1243_v24, %v1195_v6 }
 0x18e   :  { %v7230_v55 = vadd.f32 %v1292_v7, %v1244_v43  ;;  %v1147_v42 = vpop.f32.mrf.mxu2 }
 0x18f   :  { %v1148_v41 = vadd.f32 %v1147_v42, %v7040_v21 }
 0x191   :  { %v1196_v44 = vpop.f32.mrf.mxu3  ;;  %v1248_v53 = vpop.f32.mrf.mxu0  ;;  %v1528_v56 = vmax.f32 %v1148_v41, 0.0  ;;  %v5470_v41 = vld [vmem:[%s8797_s3 + $0x10] sm:$0xff] }
 0x192   :  { %v1197_v25 = vadd.f32 %v1196_v44, %v7174_v17  ;;  %v5478_v44 = vld [vmem:[%s8797_s3 + $0x50] sm:$0xff]  ;;  %1703 = vmatpush.bf16.msra.mxu2 %v5470_v41 }
 0x193   :  { %v1297_v2 = vpop.f32.mrf.mxu1  ;;  %1345 = vmatmul.bf16.gmra.mxu2 %v8841_v35  ;;  %v7236_v28 = vpack.c.bf16 %v1528_v56, %v1526_v49  ;;  %1752 = vmatpush.bf16.msra.mxu3 %v5478_v44  ;;  %v8847_v35 = vld [vmem:[#allocation10_spill] sm:$0xff] }
 0x194   :  { %v1246_v29 = vadd.f32 %v1245_v8, %v1197_v25  ;;  %1443 = vmatmul.bf16.gmra.mxu0 %v8842_v10  ;;  %v8848_v10 = vld [vmem:[#allocation11_spill] sm:$0xff] }
 0x196   :  { %1394 = vmatmul.bf16.gmra.mxu3 %v8843_v0  ;;  %v7239_v62 = vadd.f32 %v1294_v37, %v1246_v29  ;;  %4733 = vmatmul.msk.bf16.gmra.mxu1 %vm807_vm0, %v7021_v57  ;;  %v1150_v21 = vpop.f32.mrf.mxu2 }
 0x197   :  { %v1151_v40 = vadd.f32 %v1150_v21, %v7055_v39  ;;  %v8849_v21 = vld [vmem:[#allocation9_spill] sm:$0xff]  ;;  %1704 = vmatpush.bf16.msra.mxu2 %v5469_v11  ;;  %1753 = vmatpush.bf16.msra.mxu3 %v5477_v36 }
 0x199   :  { %v1199_v54 = vpop.f32.mrf.mxu3  ;;  %v1250_v18 = vpop.f32.mrf.mxu0  ;;  %v1530_v33 = vmax.f32 %v1151_v40, 0.0 }
 0x19a   :  { %v1200_v26 = vadd.f32 %v1199_v54, %v7174_v17 }
 0x19b   :  { %v1299_v12 = vpop.f32.mrf.mxu1 }
 0x19c   :  { %v1249_v48 = vadd.f32 %v1248_v53, %v1200_v26 }
 0x19e   :  { %v7251_v57 = vadd.f32 %v1297_v2, %v1249_v48  ;;  %v1152_v1 = vpop.f32.mrf.mxu2 }
 0x19f   :  { %v1153_v39 = vadd.f32 %v1152_v1, %v7077_v3 }
 0x1a1   :  { %v1201_v22 = vpop.f32.mrf.mxu3  ;;  %v1253_v24 = vpop.f32.mrf.mxu0  ;;  %v1532_v34 = vmax.f32 %v1153_v39, 0.0 }
 0x1a2   :  { %v1202_v20 = vadd.f32 %v1201_v22, %v7174_v17  ;;  %v5468_v22 = vld [vmem:[%s8797_s3] sm:$0xff] }
 0x1a3   :  { %v1302_v7 = vpop.f32.mrf.mxu1  ;;  %1350 = vmatmul.bf16.gmra.mxu2 %v8844_v4  ;;  %v7257_v23 = vpack.c.bf16 %v1532_v34, %v1530_v33 }
 0x1a4   :  { %v1251_v16 = vadd.f32 %v1250_v18, %v1202_v20  ;;  %1448 = vmatmul.bf16.gmra.mxu0 %v8845_v50  ;;  %1705 = vmatpush.bf16.msra.mxu2 %v5468_v22  ;;  %v8852_v50 = vld [vmem:[#allocation12_spill] sm:$0xff] }
 0x1a6   :  { %1399 = vmatmul.bf16.gmra.mxu3 %v8846_v47  ;;  %v7260_v6 = vadd.f32 %v1299_v12, %v1251_v16  ;;  %4734 = vmatmul.msk.bf16.gmra.mxu1 %vm807_vm0, %v7058_v27  ;;  %v1155_v3 = vpop.f32.mrf.mxu2  ;;  %v8850_v16 = vld [vmem:[#allocation13_spill] sm:$0xff] }
 0x1a7   :  { %v1156_v8 = vadd.f32 %v1155_v3, %v7092_v9 }
 0x1a9   :  { %v1204_v43 = vpop.f32.mrf.mxu3  ;;  %v7266_v38 = vpop.f32.mrf.mxu0  ;;  %v1534_v56 = vmax.f32 %v1156_v8, 0.0 }
 0x1aa   :  { %v1205_v37 = vadd.f32 %v1204_v43, %v7174_v17 }
 0x1ab   :  { %v7268_v42 = vpop.f32.mrf.mxu1 }
 0x1ac   :  { %v1254_v30 = vadd.f32 %v1253_v24, %v1205_v37 }
 0x1ae   :  { %v7276_v27 = vadd.f32 %v1302_v7, %v1254_v30  ;;  %v1157_v9 = vpop.f32.mrf.mxu2  ;;  %v8851_v7 = vld [vmem:[#allocation14_spill] sm:$0xff] }
 0x1af   :  { %v1158_v25 = vadd.f32 %v1157_v9, %v7114_v63 }
 0x1b1   :  { %v7279_v53 = vpop.f32.mrf.mxu3  ;;  %v1258_v49 = vpop.f32.mrf.mxu0  ;;  %v1536_v29 = vmax.f32 %v1158_v25, 0.0 }
 0x1b3   :  { %v1307_v2 = vpop.f32.mrf.mxu1  ;;  %1355 = vmatmul.bf16.gmra.mxu2 %v8847_v35  ;;  %v7283_v0 = vpack.c.bf16 %v1536_v29, %v1534_v56  ;;  %v8854_v35 = vld [vmem:[#allocation17_spill] sm:$0xff] }
 0x1b4   :  { %1453 = vmatmul.bf16.gmra.mxu0 %v8848_v10 }
 0x1b6   :  { %1404 = vmatmul.bf16.gmra.mxu3 %v8849_v21  ;;  %4735 = vmatmul.msk.bf16.gmra.mxu1 %vm807_vm0, %v7095_v14  ;;  %v1160_v40 = vpop.f32.mrf.mxu2  ;;  %v8855_v21 = vld [vmem:[#allocation15_spill] sm:$0xff] }
 0x1b7   :  { %v1161_v63 = vadd.f32 %v1160_v40, %v7129_v31 }
 0x1b9   :  { %v1209_v54 = vpop.f32.mrf.mxu3  ;;  %v7290_v18 = vpop.f32.mrf.mxu0  ;;  %v1538_v24 = vmax.f32 %v1161_v63, 0.0 }
 0x1ba   :  { %v1210_v26 = vadd.f32 %v1209_v54, %v7174_v17 }
 0x1bb   :  { %v7292_v12 = vpop.f32.mrf.mxu1 }
 0x1bc   :  { %v1259_v48 = vadd.f32 %v1258_v49, %v1210_v26 }
 0x1be   :  { %v7300_v14 = vadd.f32 %v1307_v2, %v1259_v48  ;;  %v1162_v31 = vpop.f32.mrf.mxu2  ;;  %v8853_v2 = vld [vmem:[#allocation16_spill] sm:$0xff] }
 0x1bf   :  { %v1163_v1 = vadd.f32 %v1162_v31, %v7139_v52 }
 0x1c1   :  { %v7303_v39 = vpop.f32.mrf.mxu3  ;;  %v1263_v20 = vpop.f32.mrf.mxu0  ;;  %v1540_v33 = vmax.f32 %v1163_v1, 0.0 }
 0x1c3   :  { %v1312_v34 = vpop.f32.mrf.mxu1  ;;  %1360 = vmatmul.bf16.gmra.mxu2 %v8850_v16  ;;  %v7310_v4 = vpack.c.bf16 %v1540_v33, %v1538_v24 }
 0x1c4   :  { %1458 = vmatmul.bf16.gmra.mxu0 %v8851_v7 }
 0x1c6   :  { %1409 = vmatmul.bf16.gmra.mxu3 %v8852_v50  ;;  %4736 = vmatmul.msk.bf16.gmra.mxu1 %vm807_vm0, %v7132_v58  ;;  %v1165_v52 = vpop.f32.mrf.mxu2  ;;  %v5476_v58 = vld [vmem:[%s8797_s3 + $0x40] sm:$0xff] }
 0x1c7   :  { %v1166_v47 = vadd.f32 %v1165_v52, %v7148_v51  ;;  %1754 = vmatpush.bf16.msra.mxu3 %v5476_v58 }
 0x1c9   :  { %v1214_v3 = vpop.f32.mrf.mxu3  ;;  %v7317_v43 = vpop.f32.mrf.mxu0  ;;  %v1542_v49 = vmax.f32 %v1166_v47, 0.0 }
 0x1ca   :  { %v1215_v8 = vadd.f32 %v1214_v3, %v7174_v17 }
 0x1cb   :  { %v7319_v30 = vpop.f32.mrf.mxu1 }
 0x1cc   :  { %v1264_v37 = vadd.f32 %v1263_v20, %v1215_v8 }
 0x1ce   :  { %v7321_v41 = vadd.f32 %v1312_v34, %v1264_v37  ;;  %v1167_v44 = vpop.f32.mrf.mxu2 }
 0x1cf   :  { %v1168_v9 = vadd.f32 %v1167_v44, %v7158_v59  ;;  %v5491_v44 = vld [vmem:[%s8799_s5 + $0x38] sm:$0xff] }
 0x1d0   :  { %1888 = vmatpush.bf16.msra.mxu0 %v5491_v44 }
 0x1d1   :  { %v7324_v25 = vpop.f32.mrf.mxu3  ;;  %v1268_v51 = vpop.f32.mrf.mxu0  ;;  %v1544_v56 = vmax.f32 %v1168_v9, 0.0 }
 0x1d3   :  { %v1317_v29 = vpop.f32.mrf.mxu1  ;;  %1365 = vmatmul.bf16.gmra.mxu2 %v8853_v2  ;;  %v7331_v10 = vpack.c.bf16 %v1544_v56, %v1542_v49 }
 0x1d4   :  { %1463 = vmatmul.bf16.gmra.mxu0 %v8854_v35 }
 0x1d6   :  { %1414 = vmatmul.bf16.gmra.mxu3 %v8855_v21  ;;  %4737 = vmatmul.msk.bf16.gmra.mxu1 %vm807_vm0, %v7151_v5  ;;  %v1170_v59 = vpop.f32.mrf.mxu2 }
 0x1d7   :  { %v1171_v40 = vadd.f32 %v1170_v59, %v7167_v45 }
 0x1d9   :  { %v1219_v63 = vpop.f32.mrf.mxu3  ;;  %v7338_v26 = vpop.f32.mrf.mxu0  ;;  %v1546_v5 = vmax.f32 %v1171_v40, 0.0 }
 0x1da   :  { %v1220_v54 = vadd.f32 %v1219_v63, %v7174_v17 }
 0x1db   :  { %v7340_v11 = vpop.f32.mrf.mxu1 }
 0x1dc   :  { %v1269_v48 = vadd.f32 %v1268_v51, %v1220_v54 }
 0x1de   :  { %v7342_v36 = vadd.f32 %v1317_v29, %v1269_v48  ;;  %v1172_v31 = vpop.f32.mrf.mxu2 }
 0x1df   :  { %v1173_v1 = vadd.f32 %v1172_v31, %v7178_v15 }
 0x1e1   :  { %v7345_v22 = vpop.f32.mrf.mxu3  ;;  %v1429_v20 = vpop.f32.mrf.mxu0  ;;  %v1548_v24 = vmax.f32 %v1173_v1, 0.0 }
 0x1e3   :  { %v1478_v33 = vpop.f32.mrf.mxu1  ;;  %1706 = vmatmul.bf16.vlgmr.msra.gmra.mxu2 %v7192_v46  ;;  %v7348_v45 = vpack.c.bf16 %v1548_v24, %v1546_v5 }
 0x1e6   :  { %v1331_v34 = vpop.f32.mrf.mxu2 }
 0x1e7   :  { %v1332_v16 = vadd.f32 %v1331_v34, %v7188_v19 }
 0x1e9   :  { %v1380_v7 = vpop.f32.mrf.mxu3  ;;  %v1431_v50 = vpop.f32.mrf.mxu0 }
 0x1ea   :  { %v1381_v47 = vadd.f32 %v1380_v7, %v1332_v16 }
 0x1eb   :  { %v1480_v52 = vpop.f32.mrf.mxu1 }
 0x1ec   :  { %v1430_v8 = vadd.f32 %v1429_v20, %v1381_v47 }
 0x1ee   :  { %v1333_v3 = vpop.f32.mrf.mxu2  ;;  %v1479_v51 = vadd.f32 %v1478_v33, %v1430_v8 }
 0x1ef   :  { %v1334_v15 = vadd.f32 %v1333_v3, %v7197_v61 }
 0x1f0   :  { %v1519_v29 = vmax.f32 %v1479_v51, 0.0 }
 0x1f1   :  { %v1382_v37 = vpop.f32.mrf.mxu3  ;;  %v1434_v9 = vpop.f32.mrf.mxu0 }
 0x1f2   :  { %v1383_v46 = vadd.f32 %v1382_v37, %v1334_v15 }
 0x1f3   :  { %v1483_v58 = vpop.f32.mrf.mxu1  ;;  %1711 = vmatmul.bf16.gmra.mxu2 %v7215_v60  ;;  %v5490_v60 = vld [vmem:[%s8799_s5 + $0x30] sm:$0xff] }
 0x1f4   :  { %v1432_v49 = vadd.f32 %v1431_v50, %v1383_v46  ;;  %1889 = vmatpush.bf16.msra.mxu0 %v5490_v60 }
 0x1f6   :  { %v1481_v19 = vadd.f32 %v1480_v52, %v1432_v49  ;;  %v1336_v56 = vpop.f32.mrf.mxu2 }
 0x1f7   :  { %v1337_v35 = vadd.f32 %v1336_v56, %v7209_v13 }
 0x1f8   :  { %v1521_v2 = vmax.f32 %v1481_v19, 0.0 }
 0x1f9   :  { %v1385_v61 = vpop.f32.mrf.mxu3  ;;  %v1436_v21 = vpop.f32.mrf.mxu0 }
 0x1fa   :  { %v1551_v59 = vpack.c.bf16 %v1521_v2, %v1519_v29  ;;  %v1386_v63 = vadd.f32 %v1385_v61, %v1337_v35 }
 0x1fb   :  { %v1485_v40 = vpop.f32.mrf.mxu1 }
 0x1fc   :  { %1755 = vmatmul.bf16.vlgmr.msra.gmra.mxu3 %v1551_v59  ;;  %v1435_v48 = vadd.f32 %v1434_v9, %v1386_v63 }
 0x1fe   :  { %v1338_v54 = vpop.f32.mrf.mxu2  ;;  %v1484_v13 = vadd.f32 %v1483_v58, %v1435_v48 }
 0x1ff   :  { %v1339_v31 = vadd.f32 %v1338_v54, %v7218_v32 }
 0x200   :  { %v1523_v7 = vmax.f32 %v1484_v13, 0.0  ;;  %v1207_v13 = vadd.f32 %v7279_v53, %v7174_v17 }
 0x201   :  { %v1387_v1 = vpop.f32.mrf.mxu3  ;;  %v1439_v20 = vpop.f32.mrf.mxu0 }
 0x202   :  { %v1388_v5 = vadd.f32 %v1387_v1, %v1339_v31 }
 0x203   :  { %v1488_v24 = vpop.f32.mrf.mxu1  ;;  %1716 = vmatmul.bf16.gmra.mxu2 %v7236_v28  ;;  %v5489_v28 = vld [vmem:[%s8799_s5 + $0x28] sm:$0xff] }
 0x204   :  { %v1437_v33 = vadd.f32 %v1436_v21, %v1388_v5  ;;  %1890 = vmatpush.bf16.msra.mxu0 %v5489_v28 }
 0x206   :  { %v1486_v34 = vadd.f32 %v1485_v40, %v1437_v33  ;;  %v1341_v16 = vpop.f32.mrf.mxu2 }
 0x207   :  { %v1342_v50 = vadd.f32 %v1341_v16, %v7230_v55 }
 0x208   :  { %v1525_v32 = vmax.f32 %v1486_v34, 0.0 }
 0x209   :  { %v1390_v52 = vpop.f32.mrf.mxu3  ;;  %v1441_v47 = vpop.f32.mrf.mxu0 }
 0x20a   :  { %v1553_v3 = vpack.c.bf16 %v1525_v32, %v1523_v7  ;;  %v1391_v15 = vadd.f32 %v1390_v52, %v1342_v50  ;;  %v1256_v32 = vadd.f32 %v7266_v38, %v1207_v13 }
 0x20b   :  { %v1490_v8 = vpop.f32.mrf.mxu1 }
 0x20c   :  { %1760 = vmatmul.bf16.gmra.mxu3 %v1553_v3  ;;  %v1440_v44 = vadd.f32 %v1439_v20, %v1391_v15  ;;  %v1305_v15 = vadd.f32 %v7268_v42, %v1256_v32 }
 0x20e   :  { %v1343_v37 = vpop.f32.mrf.mxu2  ;;  %v1489_v49 = vadd.f32 %v1488_v24, %v1440_v44 }
 0x20f   :  { %v1344_v9 = vadd.f32 %v1343_v37, %v7239_v62 }
 0x210   :  { %v1527_v2 = vmax.f32 %v1489_v49, 0.0 }
 0x211   :  { %v1392_v46 = vpop.f32.mrf.mxu3  ;;  %v1444_v58 = vpop.f32.mrf.mxu0 }
 0x212   :  { %v1393_v51 = vadd.f32 %v1392_v46, %v1344_v9  ;;  %v5487_v9 = vld [vmem:[%s8799_s5 + $0x18] sm:$0xff] }
 0x213   :  { %v1493_v55 = vpop.f32.mrf.mxu1  ;;  %1721 = vmatmul.bf16.gmra.mxu2 %v7257_v23  ;;  %v5488_v23 = vld [vmem:[%s8799_s5 + $0x20] sm:$0xff] }
 0x214   :  { %v1442_v19 = vadd.f32 %v1441_v47, %v1393_v51  ;;  %1891 = vmatpush.bf16.msra.mxu0 %v5488_v23  ;;  %v1212_v51 = vadd.f32 %v7303_v39, %v7174_v17 }
 0x216   :  { %v1491_v56 = vadd.f32 %v1490_v8, %v1442_v19  ;;  %v1346_v29 = vpop.f32.mrf.mxu2 }
 0x217   :  { %v1347_v35 = vadd.f32 %v1346_v29, %v7251_v57 }
 0x218   :  { %v1529_v62 = vmax.f32 %v1491_v56, 0.0  ;;  %1892 = vmatpush.bf16.msra.mxu0 %v5487_v9 }
 0x219   :  { %v1395_v61 = vpop.f32.mrf.mxu3  ;;  %v1446_v21 = vpop.f32.mrf.mxu0 }
 0x21a   :  { %v1555_v59 = vpack.c.bf16 %v1529_v62, %v1527_v2  ;;  %v1396_v63 = vadd.f32 %v1395_v61, %v1347_v35  ;;  %v1261_v2 = vadd.f32 %v7290_v18, %v1212_v51 }
 0x21b   :  { %v1495_v40 = vpop.f32.mrf.mxu1 }
 0x21c   :  { %1765 = vmatmul.bf16.gmra.mxu3 %v1555_v59  ;;  %v1445_v48 = vadd.f32 %v1444_v58, %v1396_v63  ;;  %v1310_v59 = vadd.f32 %v7292_v12, %v1261_v2 }
 0x21e   :  { %v1348_v54 = vpop.f32.mrf.mxu2  ;;  %v1494_v5 = vadd.f32 %v1493_v55, %v1445_v48 }
 0x21f   :  { %v1349_v31 = vadd.f32 %v1348_v54, %v7260_v6  ;;  %v5486_v54 = vld [vmem:[%s8799_s5 + $0x10] sm:$0xff] }
 0x220   :  { %v1531_v16 = vmax.f32 %v1494_v5, 0.0  ;;  %1893 = vmatpush.bf16.msra.mxu0 %v5486_v54 }
 0x221   :  { %v1397_v1 = vpop.f32.mrf.mxu3  ;;  %v1449_v60 = vpop.f32.mrf.mxu0 }
 0x222   :  { %v1398_v20 = vadd.f32 %v1397_v1, %v1349_v31  ;;  %v1217_v1 = vadd.f32 %v7324_v25, %v7174_v17 }
 0x223   :  { %v1498_v57 = vpop.f32.mrf.mxu1  ;;  %1726 = vmatmul.bf16.gmra.mxu2 %v7283_v0 }
 0x224   :  { %v1447_v24 = vadd.f32 %v1446_v21, %v1398_v20  ;;  %v1266_v13 = vadd.f32 %v7317_v43, %v1217_v1  ;;  %v1222_v43 = vadd.f32 %v7345_v22, %v7174_v17 }
 0x226   :  { %v1496_v33 = vadd.f32 %v1495_v40, %v1447_v24  ;;  %v1351_v34 = vpop.f32.mrf.mxu2 }
 0x227   :  { %v1352_v6 = vadd.f32 %v1351_v34, %v7276_v27 }
 0x228   :  { %v1533_v50 = vmax.f32 %v1496_v33, 0.0 }
 0x229   :  { %v1400_v7 = vpop.f32.mrf.mxu3  ;;  %v1451_v52 = vpop.f32.mrf.mxu0 }
 0x22a   :  { %v1557_v47 = vpack.c.bf16 %v1533_v50, %v1531_v16  ;;  %v1401_v8 = vadd.f32 %v1400_v7, %v1352_v6  ;;  %v1315_v16 = vadd.f32 %v7319_v30, %v1266_v13 }
 0x22b   :  { %v1500_v3 = vpop.f32.mrf.mxu1 }
 0x22c   :  { %1770 = vmatmul.bf16.gmra.mxu3 %v1557_v47  ;;  %v1450_v37 = vadd.f32 %v1449_v60, %v1401_v8 }
 0x22e   :  { %v1353_v0 = vpop.f32.mrf.mxu2  ;;  %v1499_v58 = vadd.f32 %v1498_v57, %v1450_v37 }
 0x22f   :  { %v1354_v44 = vadd.f32 %v1353_v0, %v1305_v15 }
 0x230   :  { %v1535_v49 = vmax.f32 %v1499_v58, 0.0 }
 0x231   :  { %v1402_v53 = vpop.f32.mrf.mxu3  ;;  %v1454_v27 = vpop.f32.mrf.mxu0 }
 0x232   :  { %v1403_v46 = vadd.f32 %v1402_v53, %v1354_v44  ;;  %v5484_v53 = vld [vmem:[%s8799_s5] sm:$0xff] }
 0x233   :  { %v1503_v28 = vpop.f32.mrf.mxu1  ;;  %1731 = vmatmul.bf16.gmra.mxu2 %v7310_v4 }
 0x234   :  { %v1452_v38 = vadd.f32 %v1451_v52, %v1403_v46 }
 0x236   :  { %v1501_v42 = vadd.f32 %v1500_v3, %v1452_v38  ;;  %v1356_v55 = vpop.f32.mrf.mxu2 }
 0x237   :  { %v1357_v19 = vadd.f32 %v1356_v55, %v7300_v14 }
 0x238   :  { %v1537_v29 = vmax.f32 %v1501_v42, 0.0 }
 0x239   :  { %v1405_v56 = vpop.f32.mrf.mxu3  ;;  %v1456_v61 = vpop.f32.mrf.mxu0 }
 0x23a   :  { %v1559_v35 = vpack.c.bf16 %v1537_v29, %v1535_v49  ;;  %v1406_v62 = vadd.f32 %v1405_v56, %v1357_v19 }
 0x23b   :  { %v1505_v21 = vpop.f32.mrf.mxu1 }
 0x23c   :  { %1775 = vmatmul.bf16.gmra.mxu3 %v1559_v35  ;;  %v1455_v40 = vadd.f32 %v1454_v27, %v1406_v62  ;;  %v1271_v27 = vadd.f32 %v7338_v26, %v1222_v43 }
 0x23e   :  { %v1358_v4 = vpop.f32.mrf.mxu2  ;;  %v1504_v48 = vadd.f32 %v1503_v28, %v1455_v40  ;;  %v1320_v17 = vadd.f32 %v7340_v11, %v1271_v27  ;;  %v5495_v11 = vld [vmem:[%s8800_s7 + $0x18] sm:$0xff] }
 0x23f   :  { %v1359_v63 = vadd.f32 %v1358_v4, %v1310_v59  ;;  %2026 = vmatpush.bf16.msra.mxu1 %v5495_v11  ;;  %v7415_v4 = vld [vmem:[%s8798_s4] ss:$0 sm:$0xff] }
 0x240   :  { %v1539_v20 = vmax.f32 %v1504_v48, 0.0 }
 0x241   :  { %v1407_v39 = vpop.f32.mrf.mxu3  ;;  %v1459_v18 = vpop.f32.mrf.mxu0 }
 0x242   :  { %v1408_v14 = vadd.f32 %v1407_v39, %v1359_v63 }
 0x243   :  { %1736 = vmatmul.bf16.gmra.mxu2 %v7331_v10  ;;  %v1508_v12 = vpop.f32.mrf.mxu1  ;;  %v5485_v10 = vld [vmem:[%s8799_s5 + $0x8] sm:$0xff] }
 0x244   :  { %v1457_v31 = vadd.f32 %v1456_v61, %v1408_v14  ;;  %1894 = vmatpush.bf16.msra.mxu0 %v5485_v10  ;;  %v5494_v10 = vld [vmem:[%s8800_s7 + $0x10] sm:$0xff] }
 0x245   :  { %2027 = vmatpush.bf16.msra.mxu1 %v5494_v10 }
 0x246   :  { %v1506_v23 = vadd.f32 %v1505_v21, %v1457_v31  ;;  %v1361_v60 = vpop.f32.mrf.mxu2 }
 0x247   :  { %v1362_v57 = vadd.f32 %v1361_v60, %v7321_v41 }
 0x248   :  { %v1541_v24 = vmax.f32 %v1506_v23, 0.0  ;;  %1895 = vmatpush.bf16.msra.mxu0 %v5484_v53 }
 0x249   :  { %v1410_v5 = vpop.f32.mrf.mxu3  ;;  %v1461_v25 = vpop.f32.mrf.mxu0 }
 0x24a   :  { %v1561_v33 = vpack.c.bf16 %v1541_v24, %v1539_v20  ;;  %v1411_v34 = vadd.f32 %v1410_v5, %v1362_v57 }
 0x24b   :  { %v1510_v41 = vpop.f32.mrf.mxu1 }
 0x24c   :  { %1780 = vmatmul.bf16.gmra.mxu3 %v1561_v33  ;;  %v1460_v7 = vadd.f32 %v1459_v18, %v1411_v34 }
 0x24e   :  { %v1363_v6 = vpop.f32.mrf.mxu2  ;;  %v1509_v47 = vadd.f32 %v1508_v12, %v1460_v7 }
 0x24f   :  { %v1364_v50 = vadd.f32 %v1363_v6, %v1315_v16 }
 0x250   :  { %v1543_v0 = vmax.f32 %v1509_v47, 0.0 }
 0x251   :  { %v1412_v52 = vpop.f32.mrf.mxu3  ;;  %v1464_v9 = vpop.f32.mrf.mxu0 }
 0x252   :  { %v1413_v32 = vadd.f32 %v1412_v52, %v1364_v50 }
 0x253   :  { %1741 = vmatmul.bf16.gmra.mxu2 %v7348_v45  ;;  %v1513_v45 = vpop.f32.mrf.mxu1 }
 0x254   :  { %v1462_v3 = vadd.f32 %v1461_v25, %v1413_v32 }
 0x256   :  { %v1511_v8 = vadd.f32 %v1510_v41, %v1462_v3  ;;  %v1366_v15 = vpop.f32.mrf.mxu2 }
 0x257   :  { %v1367_v30 = vadd.f32 %v1366_v15, %v7342_v36 }
 0x258   :  { %v1545_v44 = vmax.f32 %v1511_v8, 0.0 }
 0x259   :  { %v1415_v37 = vpop.f32.mrf.mxu3  ;;  %v1466_v42 = vpop.f32.mrf.mxu0 }
 0x25a   :  { %v1563_v46 = vpack.c.bf16 %v1545_v44, %v1543_v0  ;;  %v1416_v28 = vadd.f32 %v1415_v37, %v1367_v30 }
 0x25b   :  { %v1515_v19 = vpop.f32.mrf.mxu1 }
 0x25c   :  { %1785 = vmatmul.bf16.gmra.mxu3 %v1563_v46  ;;  %v1465_v58 = vadd.f32 %v1464_v9, %v1416_v28 }
 0x25e   :  { %v1368_v22 = vpop.f32.mrf.mxu2  ;;  %v1514_v55 = vadd.f32 %v1513_v45, %v1465_v58  ;;  %v5493_v45 = vld [vmem:[%s8800_s7 + $0x8] sm:$0xff] }
 0x25f   :  { %v1369_v38 = vadd.f32 %v1368_v22, %v1320_v17  ;;  %2028 = vmatpush.bf16.msra.mxu1 %v5493_v45 }
 0x260   :  { %v1547_v2 = vmax.f32 %v1514_v55, 0.0 }
 0x261   :  { %v1417_v36 = vpop.f32.mrf.mxu3 }
 0x262   :  { %v1418_v51 = vadd.f32 %v1417_v36, %v1369_v38 }
 0x264   :  { %v1467_v49 = vadd.f32 %v1466_v42, %v1418_v51 }
 0x266   :  { %v1516_v56 = vadd.f32 %v1515_v19, %v1467_v49  ;;  %v1707_v29 = vpop.f32.mrf.mxu2 }
 0x267   :  { %v1708_v40 = vadd.f32 %v7415_v4, %v1707_v29 }
 0x268   :  { %v1549_v26 = vmax.f32 %v1516_v56, 0.0 }
 0x26a   :  { %v1565_v35 = vpack.c.bf16 %v1549_v26, %v1547_v2 }
 0x26c   :  { %1790 = vmatmul.bf16.gmra.mxu3 %v1565_v35 }
 0x26e   :  { %v1709_v61 = vpop.f32.mrf.mxu2 }
 0x26f   :  { %v1710_v63 = vadd.f32 %v7415_v4, %v1709_v61 }
 0x276   :  { %v1712_v62 = vpop.f32.mrf.mxu2 }
 0x277   :  { %v1713_v60 = vadd.f32 %v7415_v4, %v1712_v62 }
 0x27e   :  { %v1714_v21 = vpop.f32.mrf.mxu2 }
 0x27f   :  { %v1756_v59 = vpop.f32.mrf.mxu3  ;;  %v1715_v20 = vadd.f32 %v7415_v4, %v1714_v21 }
 0x280   :  { %v1757_v39 = vadd.f32 %v1756_v59, %v1708_v40  ;;  %v5492_v40 = vld [vmem:[%s8800_s7] sm:$0xff] }
 0x281   :  { %2029 = vmatpush.bf16.msra.mxu1 %v5492_v40  ;;  %v5505_v40 = vld [vmem:[%s8802_s9 + $0x44] sm:$0xf0] }
 0x282   :  { %v1796_v31 = vmax.f32 %v1757_v39, 0.0 }
 0x286   :  { %v1717_v54 = vpop.f32.mrf.mxu2 }
 0x287   :  { %v1758_v14 = vpop.f32.mrf.mxu3  ;;  %v1718_v7 = vadd.f32 %v7415_v4, %v1717_v54 }
 0x288   :  { %v1759_v48 = vadd.f32 %v1758_v14, %v1710_v63 }
 0x28a   :  { %v1797_v18 = vmax.f32 %v1759_v48, 0.0 }
 0x28c   :  { %v1812_v1 = vpack.c.bf16 %v1797_v18, %v1796_v31 }
 0x28e   :  { %1896 = vmatmul.bf16.vlgmr.msra.gmra.mxu0 %v1812_v1  ;;  %v1719_v23 = vpop.f32.mrf.mxu2 }
 0x28f   :  { %v1761_v12 = vpop.f32.mrf.mxu3  ;;  %v1720_v50 = vadd.f32 %v7415_v4, %v1719_v23 }
 0x290   :  { %v1762_v57 = vadd.f32 %v1761_v12, %v1713_v60 }
 0x292   :  { %v1798_v33 = vmax.f32 %v1762_v57, 0.0 }
 0x296   :  { %v1722_v13 = vpop.f32.mrf.mxu2 }
 0x297   :  { %v1763_v5 = vpop.f32.mrf.mxu3  ;;  %v1723_v0 = vadd.f32 %v7415_v4, %v1722_v13 }
 0x298   :  { %v1764_v24 = vadd.f32 %v1763_v5, %v1715_v20 }
 0x29a   :  { %v1799_v34 = vmax.f32 %v1764_v24, 0.0 }
 0x29c   :  { %v1813_v16 = vpack.c.bf16 %v1799_v34, %v1798_v33 }
 0x29e   :  { %1901 = vmatmul.bf16.gmra.mxu0 %v1813_v16  ;;  %v1724_v6 = vpop.f32.mrf.mxu2 }
 0x29f   :  { %v1766_v25 = vpop.f32.mrf.mxu3  ;;  %v1725_v30 = vadd.f32 %v7415_v4, %v1724_v6 }
 0x2a0   :  { %v1767_v52 = vadd.f32 %v1766_v25, %v1718_v7  ;;  %v4916_v7 = vld [vmem:[%s8802_s9 + $0x70] sm:$0xf] }
 0x2a2   :  { %v1800_v47 = vmax.f32 %v1767_v52, 0.0  ;;  %v5510_v52 = vld [vmem:[%s8802_s9 + $0x74] sm:$0xf] }
 0x2a6   :  { %v1727_v8 = vpop.f32.mrf.mxu2 }
 0x2a7   :  { %v1768_v41 = vpop.f32.mrf.mxu3  ;;  %v1728_v58 = vadd.f32 %v7415_v4, %v1727_v8 }
 0x2a8   :  { %v1769_v32 = vadd.f32 %v1768_v41, %v1720_v50  ;;  %v5511_v50 = vld [vmem:[%s8802_s9 + $0x74] sm:$0xf0]  ;;  %v4918_v41 = vld [vmem:[%s8802_s9 + $0x78] sm:$0xf0] }
 0x2aa   :  { %v1801_v3 = vmax.f32 %v1769_v32, 0.0  ;;  %v4921_v32 = vor.u32 %v5510_v52, %v4918_v41  ;;  %v4876_v52 = vld [vmem:[%s8802_s9 + $0x20] sm:$0xf]  ;;  %v5500_v41 = vld [vmem:[%s8802_s9 + $0x24] sm:$0xf] }
 0x2ac   :  { %v1814_v43 = vpack.c.bf16 %v1801_v3, %v1800_v47  ;;  %2246 = vmatpush.bf16.msrb.mxu3 %v4921_v32  ;;  %v7457_v3 = vld [vmem:[%s8801_s6] ss:$0 sm:$0xff] }
 0x2ae   :  { %1906 = vmatmul.bf16.gmra.mxu0 %v1814_v43  ;;  %v1729_v44 = vpop.f32.mrf.mxu2 }
 0x2af   :  { %v1771_v15 = vpop.f32.mrf.mxu3  ;;  %v1730_v38 = vadd.f32 %v7415_v4, %v1729_v44  ;;  %v4908_v44 = vld [vmem:[%s8802_s9 + $0x60] sm:$0xf] }
 0x2b0   :  { %v1772_v37 = vadd.f32 %v1771_v15, %v1723_v0 }
 0x2b2   :  { %v1802_v27 = vmax.f32 %v1772_v37, 0.0 }
 0x2b6   :  { %v1732_v22 = vpop.f32.mrf.mxu2 }
 0x2b7   :  { %v1773_v53 = vpop.f32.mrf.mxu3  ;;  %v1733_v2 = vadd.f32 %v7415_v4, %v1732_v22 }
 0x2b8   :  { %v1774_v9 = vadd.f32 %v1773_v53, %v1725_v30  ;;  %v5509_v53 = vld [vmem:[%s8802_s9 + $0x64] sm:$0xf0] }
 0x2ba   :  { %v1803_v46 = vmax.f32 %v1774_v9, 0.0  ;;  %v5508_v9 = vld [vmem:[%s8802_s9 + $0x64] sm:$0xf] }
 0x2bc   :  { %v1815_v28 = vpack.c.bf16 %v1803_v46, %v1802_v27  ;;  %v4909_v27 = vor.u32 %v5509_v53, %v4908_v44  ;;  %v4910_v46 = vld [vmem:[%s8802_s9 + $0x68] sm:$0xf0] }
 0x2bd   :  { %v4913_v45 = vor.u32 %v5508_v9, %v4910_v46  ;;  %v4868_v9 = vld [vmem:[%s8802_s9 + $0x10] sm:$0xf]  ;;  %v5498_v46 = vld [vmem:[%s8802_s9 + $0x14] sm:$0xf] }
 0x2be   :  { %1911 = vmatmul.bf16.gmra.mxu0 %v1815_v28  ;;  %v1734_v19 = vpop.f32.mrf.mxu2 }
 0x2bf   :  { %v1776_v17 = vpop.f32.mrf.mxu3  ;;  %v1735_v35 = vadd.f32 %v7415_v4, %v1734_v19  ;;  %2247 = vmatpush.bf16.msrb.mxu3 %v4913_v45 }
 0x2c0   :  { %v1777_v36 = vadd.f32 %v1776_v17, %v1728_v58 }
 0x2c2   :  { %v1804_v55 = vmax.f32 %v1777_v36, 0.0 }
 0x2c6   :  { %v1737_v26 = vpop.f32.mrf.mxu2 }
 0x2c7   :  { %v1778_v51 = vpop.f32.mrf.mxu3  ;;  %v1738_v14 = vadd.f32 %v7415_v4, %v1737_v26 }
 0x2c8   :  { %v1779_v42 = vadd.f32 %v1778_v51, %v1730_v38 }
 0x2ca   :  { %v1805_v49 = vmax.f32 %v1779_v42, 0.0  ;;  %v4900_v42 = vld [vmem:[%s8802_s9 + $0x50] sm:$0xf] }
 0x2cc   :  { %v1816_v56 = vpack.c.bf16 %v1805_v49, %v1804_v55  ;;  %v5507_v55 = vld [vmem:[%s8802_s9 + $0x54] sm:$0xf0]  ;;  %v5506_v49 = vld [vmem:[%s8802_s9 + $0x54] sm:$0xf] }
 0x2cd   :  { %v4901_v19 = vor.u32 %v5507_v55, %v4900_v42 }
 0x2ce   :  { %1916 = vmatmul.bf16.gmra.mxu0 %v1816_v56  ;;  %v1739_v39 = vpop.f32.mrf.mxu2  ;;  %v4902_v56 = vld [vmem:[%s8802_s9 + $0x58] sm:$0xf0] }
 0x2cf   :  { %v1781_v29 = vpop.f32.mrf.mxu3  ;;  %v1740_v48 = vadd.f32 %v7415_v4, %v1739_v39 }
 0x2d0   :  { %v1782_v61 = vadd.f32 %v1781_v29, %v1733_v2  ;;  %v4905_v29 = vor.u32 %v5506_v49, %v4902_v56 }
 0x2d2   :  { %v1806_v21 = vmax.f32 %v1782_v61, 0.0  ;;  %2248 = vmatpush.bf16.msrb.mxu3 %v4905_v29  ;;  %v5496_v29 = vld [vmem:[%s8802_s9 + $0x4] sm:$0xf] }
 0x2d6   :  { %v1742_v23 = vpop.f32.mrf.mxu2 }
 0x2d7   :  { %v1783_v62 = vpop.f32.mrf.mxu3  ;;  %v1743_v24 = vadd.f32 %v7415_v4, %v1742_v23 }
 0x2d8   :  { %v1784_v11 = vadd.f32 %v1783_v62, %v1735_v35 }
 0x2da   :  { %v1807_v59 = vmax.f32 %v1784_v11, 0.0 }
 0x2dc   :  { %v1817_v63 = vpack.c.bf16 %v1807_v59, %v1806_v21  ;;  %v4892_v59 = vld [vmem:[%s8802_s9 + $0x40] sm:$0xf] }
 0x2dd   :  { %v4893_v39 = vor.u32 %v5505_v40, %v4892_v59 }
 0x2de   :  { %1921 = vmatmul.bf16.gmra.mxu0 %v1817_v63  ;;  %v1744_v5 = vpop.f32.mrf.mxu2  ;;  %v5504_v63 = vld [vmem:[%s8802_s9 + $0x44] sm:$0xf] }
 0x2df   :  { %v1786_v54 = vpop.f32.mrf.mxu3  ;;  %v1745_v13 = vadd.f32 %v7415_v4, %v1744_v5  ;;  %v4917_v4 = vor.u32 %v5511_v50, %v4916_v7  ;;  %v5502_v5 = vld [vmem:[%s8802_s9 + $0x34] sm:$0xf] }
 0x2e0   :  { %v1787_v31 = vadd.f32 %v1786_v54, %v1738_v14  ;;  %v4894_v54 = vld [vmem:[%s8802_s9 + $0x48] sm:$0xf0] }
 0x2e1   :  { %2197 = vmatpush.bf16.msrb.mxu2 %v4917_v4  ;;  %v4897_v14 = vor.u32 %v5504_v63, %v4894_v54  ;;  %v5501_v4 = vld [vmem:[%s8802_s9 + $0x24] sm:$0xf0] }
 0x2e2   :  { %v1808_v12 = vmax.f32 %v1787_v31, 0.0  ;;  %v4877_v32 = vor.u32 %v5501_v4, %v4876_v52  ;;  %v5120_v54 = vld [vmem:[%s8804_s11 + $0x188] sm:$0xf] }
 0x2e3   :  { %2249 = vmatpush.bf16.msrb.mxu3 %v4897_v14  ;;  %v5564_v14 = vld [vmem:[%s8804_s11 + $0x1a0] sm:$0xf0] }
 0x2e5   :  { %2198 = vmatpush.bf16.msrb.mxu2 %v4909_v27  ;;  %v5499_v27 = vld [vmem:[%s8802_s9 + $0x14] sm:$0xf0] }
 0x2e6   :  { %v4869_v45 = vor.u32 %v5499_v27, %v4868_v9 }
 0x2e7   :  { %v1788_v18 = vpop.f32.mrf.mxu3 }
 0x2e8   :  { %v1789_v1 = vadd.f32 %v1788_v18, %v1740_v48 }
 0x2e9   :  { %2199 = vmatpush.bf16.msrb.mxu2 %v4901_v19 }
 0x2ea   :  { %v1809_v60 = vmax.f32 %v1789_v1, 0.0 }
 0x2ec   :  { %v1818_v20 = vpack.c.bf16 %v1809_v60, %v1808_v12 }
 0x2ed   :  { %2200 = vmatpush.bf16.msrb.mxu2 %v4893_v39  ;;  %v7570_v39 = vld [vmem:[%s8803_s8] ss:$0 sm:$0xff] }
 0x2ee   :  { %1926 = vmatmul.bf16.gmra.mxu0 %v1818_v20  ;;  %v4884_v20 = vld [vmem:[%s8802_s9 + $0x30] sm:$0xf] }
 0x2ef   :  { %v1791_v57 = vpop.f32.mrf.mxu3 }
 0x2f0   :  { %v1792_v33 = vadd.f32 %v1791_v57, %v1743_v24  ;;  %v5503_v57 = vld [vmem:[%s8802_s9 + $0x34] sm:$0xf0] }
 0x2f1   :  { %v4885_v24 = vor.u32 %v5503_v57, %v4884_v20 }
 0x2f2   :  { %v1810_v16 = vmax.f32 %v1792_v33, 0.0 }
 0x2f3   :  { %2201 = vmatpush.bf16.msrb.mxu2 %v4885_v24  ;;  %v5092_v24 = vld [vmem:[%s8804_s11 + $0x150] sm:$0xf] }
 0x2f7   :  { %v1793_v34 = vpop.f32.mrf.mxu3  ;;  %2202 = vmatpush.bf16.msrb.mxu2 %v4877_v32  ;;  %v5064_v32 = vld [vmem:[%s8804_s11 + $0x118] sm:$0xf] }
 0x2f8   :  { %v1794_v10 = vadd.f32 %v1793_v34, %v1745_v13  ;;  %v4886_v13 = vld [vmem:[%s8802_s9 + $0x38] sm:$0xf0] }
 0x2f9   :  { %v4889_v33 = vor.u32 %v5502_v5, %v4886_v13  ;;  %v5557_v13 = vld [vmem:[%s8804_s11 + $0x168] sm:$0xf0] }
 0x2fa   :  { %v1811_v25 = vmax.f32 %v1794_v10, 0.0 }
 0x2fb   :  { %2250 = vmatpush.bf16.msrb.mxu3 %v4889_v33  ;;  %2203 = vmatpush.bf16.msrb.mxu2 %v4869_v45  ;;  %v5093_v33 = vor.u32 %v5557_v13, %v5092_v24  ;;  %v5036_v45 = vld [vmem:[%s8804_s11 + $0xe0] sm:$0xf]  ;;  %v4952_v13 = vld [vmem:[%s8804_s11 + $0x38] sm:$0xf] }
 0x2fc   :  { %v1819_v6 = vpack.c.bf16 %v1811_v25, %v1810_v16 }
 0x2fe   :  { %1931 = vmatmul.bf16.gmra.mxu0 %v1819_v6 }
 0x30b   :  { %v1897_v47 = vpop.f32.mrf.mxu0 }
 0x30c   :  { %v1898_v43 = vadd.f32 %v7457_v3, %v1897_v47  ;;  %v4878_v47 = vld [vmem:[%s8802_s9 + $0x28] sm:$0xf0] }
 0x30e   :  { %v1937_v0 = vmax.f32 %v1898_v43, 0.0  ;;  %v4881_v43 = vor.u32 %v5500_v41, %v4878_v47  ;;  %v5550_v47 = vld [vmem:[%s8804_s11 + $0x130] sm:$0xf0] }
 0x310   :  { %2251 = vmatpush.bf16.msrb.mxu3 %v4881_v43  ;;  %v5065_v43 = vor.u32 %v5550_v47, %v5064_v32  ;;  %v5554_v32 = vld [vmem:[%s8804_s11 + $0x154] sm:$0xf] }
 0x313   :  { %v1899_v8 = vpop.f32.mrf.mxu0 }
 0x314   :  { %v1900_v15 = vadd.f32 %v7457_v3, %v1899_v8 }
 0x316   :  { %v1938_v30 = vmax.f32 %v1900_v15, 0.0 }
 0x318   :  { %v1953_v37 = vpack.c.bf16 %v1938_v30, %v1937_v0 }
 0x31a   :  { %4850 = vmatmul.msk.bf16.vlgmr.msra.gmra.mxu1 %vm1997_vm1, %v1953_v37 }
 0x31b   :  { %v1902_v28 = vpop.f32.mrf.mxu0 }
 0x31c   :  { %v1903_v17 = vadd.f32 %v7457_v3, %v1902_v28  ;;  %v4870_v28 = vld [vmem:[%s8802_s9 + $0x18] sm:$0xf0] }
 0x31e   :  { %v1939_v38 = vmax.f32 %v1903_v17, 0.0  ;;  %v4873_v17 = vor.u32 %v5498_v46, %v4870_v28  ;;  %v5543_v28 = vld [vmem:[%s8804_s11 + $0xf8] sm:$0xf0] }
 0x320   :  { %2252 = vmatpush.bf16.msrb.mxu3 %v4873_v17  ;;  %v5037_v17 = vor.u32 %v5543_v28, %v5036_v45  ;;  %v5515_v45 = vld [vmem:[%s8804_s11 + $0x18] sm:$0xf0] }
 0x323   :  { %v1904_v22 = vpop.f32.mrf.mxu0 }
 0x324   :  { %v1905_v58 = vadd.f32 %v7457_v3, %v1904_v22  ;;  %v4860_v22 = vld [vmem:[%s8802_s9] sm:$0xf] }
 0x326   :  { %v1940_v36 = vmax.f32 %v1905_v58, 0.0  ;;  %v5497_v58 = vld [vmem:[%s8802_s9 + $0x4] sm:$0xf0] }
 0x328   :  { %v1954_v51 = vpack.c.bf16 %v1940_v36, %v1939_v38  ;;  %v4861_v36 = vor.u32 %v5497_v58, %v4860_v22  ;;  %v5260_v22 = vld [vmem:[%s8804_s11 + $0x2a0] sm:$0xf]  ;;  %v5599_v58 = vld [vmem:[%s8804_s11 + $0x2b8] sm:$0xf0] }
 0x32a   :  { %4851 = vmatmul.msk.bf16.gmra.mxu1 %vm1997_vm1, %v1954_v51  ;;  %2204 = vmatpush.bf16.msrb.mxu2 %v4861_v36 }
 0x32b   :  { %v1907_v2 = vpop.f32.mrf.mxu0 }
 0x32c   :  { %v1908_v26 = vadd.f32 %v7457_v3, %v1907_v2  ;;  %v4862_v2 = vld [vmem:[%s8802_s9 + $0x8] sm:$0xf0] }
 0x32e   :  { %v1941_v62 = vmax.f32 %v1908_v26, 0.0 }
 0x333   :  { %v1909_v35 = vpop.f32.mrf.mxu0 }
 0x334   :  { %v1910_v61 = vadd.f32 %v7457_v3, %v1909_v35  ;;  %v4865_v35 = vor.u32 %v5496_v29, %v4862_v2  ;;  %v5008_v29 = vld [vmem:[%s8804_s11 + $0xa8] sm:$0xf]  ;;  %v5536_v2 = vld [vmem:[%s8804_s11 + $0xc0] sm:$0xf0] }
 0x336   :  { %v1942_v11 = vmax.f32 %v1910_v61, 0.0  ;;  %2253 = vmatpush.bf16.msrb.mxu3 %v4865_v35  ;;  %v5232_v35 = vld [vmem:[%s8804_s11 + $0x268] sm:$0xf] }
 0x338   :  { %v1955_v21 = vpack.c.bf16 %v1942_v11, %v1941_v62 }
 0x33a   :  { %4852 = vmatmul.msk.bf16.gmra.mxu1 %vm1997_vm1, %v1955_v21 }
 0x33b   :  { %v1912_v48 = vpop.f32.mrf.mxu0 }
 0x33c   :  { %v1913_v31 = vadd.f32 %v7457_v3, %v1912_v48  ;;  %v5344_v48 = vld [vmem:[%s8804_s11 + $0x348] sm:$0xf] }
 0x33e   :  { %v1943_v23 = vmax.f32 %v1913_v31, 0.0  ;;  %v5620_v31 = vld [vmem:[%s8804_s11 + $0x360] sm:$0xf0] }
 0x343   :  { %v1914_v18 = vpop.f32.mrf.mxu0 }
 0x344   :  { %v1915_v1 = vadd.f32 %v7457_v3, %v1914_v18  ;;  %v5345_v18 = vor.u32 %v5620_v31, %v5344_v48  ;;  %v5529_v48 = vld [vmem:[%s8804_s11 + $0x88] sm:$0xf0] }
 0x346   :  { %v1944_v12 = vmax.f32 %v1915_v1, 0.0  ;;  %3112 = vmatpush.bf16.msrb.mxu1 %v5345_v18  ;;  %v5204_v18 = vld [vmem:[%s8804_s11 + $0x230] sm:$0xf] }
 0x348   :  { %v1956_v60 = vpack.c.bf16 %v1944_v12, %v1943_v23 }
 0x34a   :  { %4853 = vmatmul.msk.bf16.gmra.mxu1 %vm1997_vm1, %v1956_v60 }
 0x34b   :  { %v1917_v34 = vpop.f32.mrf.mxu0 }
 0x34c   :  { %v1918_v10 = vadd.f32 %v7457_v3, %v1917_v34  ;;  %v5316_v34 = vld [vmem:[%s8804_s11 + $0x310] sm:$0xf] }
 0x34e   :  { %v1945_v6 = vmax.f32 %v1918_v10, 0.0  ;;  %v5613_v10 = vld [vmem:[%s8804_s11 + $0x328] sm:$0xf0] }
 0x353   :  { %v1919_v16 = vpop.f32.mrf.mxu0 }
 0x354   :  { %v1920_v25 = vadd.f32 %v7457_v3, %v1919_v16  ;;  %v5317_v16 = vor.u32 %v5613_v10, %v5316_v34  ;;  %v5561_v34 = vld [vmem:[%s8804_s11 + $0x18c] sm:$0xf] }
 0x356   :  { %v1946_v7 = vmax.f32 %v1920_v25, 0.0  ;;  %3113 = vmatpush.bf16.msrb.mxu1 %v5317_v16 }
 0x358   :  { %v1957_v50 = vpack.c.bf16 %v1946_v7, %v1945_v6 }
 0x35a   :  { %4854 = vmatmul.msk.bf16.gmra.mxu1 %vm1997_vm1, %v1957_v50 }
 0x35b   :  { %v1922_v8 = vpop.f32.mrf.mxu0 }
 0x35c   :  { %v1923_v15 = vadd.f32 %v7457_v3, %v1922_v8  ;;  %v5288_v8 = vld [vmem:[%s8804_s11 + $0x2d8] sm:$0xf] }
 0x35e   :  { %v1947_v37 = vmax.f32 %v1923_v15, 0.0  ;;  %v5606_v15 = vld [vmem:[%s8804_s11 + $0x2f0] sm:$0xf0] }
 0x363   :  { %v1924_v0 = vpop.f32.mrf.mxu0 }
 0x364   :  { %v1925_v30 = vadd.f32 %v7457_v3, %v1924_v0  ;;  %v5289_v0 = vor.u32 %v5606_v15, %v5288_v8  ;;  %v5610_v8 = vld [vmem:[%s8804_s11 + $0x314] sm:$0xf]  ;;  %v5318_v15 = vld [vmem:[%s8804_s11 + $0x32c] sm:$0xf0] }
 0x366   :  { %v1948_v44 = vmax.f32 %v1925_v30, 0.0  ;;  %3114 = vmatpush.bf16.msrb.mxu1 %v5289_v0 }
 0x368   :  { %v1958_v53 = vpack.c.bf16 %v1948_v44, %v1947_v37 }
 0x36a   :  { %4855 = vmatmul.msk.bf16.gmra.mxu1 %vm1997_vm1, %v1958_v53 }
 0x36b   :  { %v1927_v38 = vpop.f32.mrf.mxu0 }
 0x36c   :  { %v1928_v51 = vadd.f32 %v7457_v3, %v1927_v38  ;;  %v5261_v38 = vor.u32 %v5599_v58, %v5260_v22 }
 0x36e   :  { %v1949_v49 = vmax.f32 %v1928_v51, 0.0  ;;  %3115 = vmatpush.bf16.msrb.mxu1 %v5261_v38  ;;  %v5540_v38 = vld [vmem:[%s8804_s11 + $0xe4] sm:$0xf] }
 0x373   :  { %v1929_v42 = vpop.f32.mrf.mxu0 }
 0x374   :  { %v1930_v55 = vadd.f32 %v7457_v3, %v1929_v42 }
 0x376   :  { %v1950_v19 = vmax.f32 %v1930_v55, 0.0 }
 0x378   :  { %v1959_v56 = vpack.c.bf16 %v1950_v19, %v1949_v49 }
 0x37a   :  { %4856 = vmatmul.msk.bf16.gmra.mxu1 %vm1997_vm1, %v1959_v56 }
 0x37b   :  { %v1932_v26 = vpop.f32.mrf.mxu0 }
 0x37c   :  { %v1933_v61 = vadd.f32 %v7457_v3, %v1932_v26  ;;  %v5009_v26 = vor.u32 %v5536_v2, %v5008_v29 }
 0x37e   :  { %v1951_v21 = vmax.f32 %v1933_v61, 0.0  ;;  %v5592_v61 = vld [vmem:[%s8804_s11 + $0x280] sm:$0xf0] }
 0x383   :  { %v1934_v62 = vpop.f32.mrf.mxu0 }
 0x384   :  { %v1935_v11 = vadd.f32 %v7457_v3, %v1934_v62  ;;  %v5121_v3 = vor.u32 %v5564_v14, %v5120_v54  ;;  %v5233_v62 = vor.u32 %v5592_v61, %v5232_v35  ;;  %v5533_v35 = vld [vmem:[%s8804_s11 + $0xac] sm:$0xf]  ;;  %v5010_v61 = vld [vmem:[%s8804_s11 + $0xc4] sm:$0xf0] }
 0x386   :  { %v1952_v59 = vmax.f32 %v1935_v11, 0.0  ;;  %3063 = vmatpush.bf16.msrb.mxu0 %v5121_v3  ;;  %3116 = vmatpush.bf16.msrb.mxu1 %v5233_v62  ;;  %v4980_v3 = vld [vmem:[%s8804_s11 + $0x70] sm:$0xf]  ;;  %v5589_v62 = vld [vmem:[%s8804_s11 + $0x26c] sm:$0xf] }
 0x387   :  { %v4981_v31 = vor.u32 %v5529_v48, %v4980_v3  ;;  %v5571_v3 = vld [vmem:[%s8804_s11 + $0x1d8] sm:$0xf0] }
 0x388   :  { %v1960_v40 = vpack.c.bf16 %v1952_v59, %v1951_v21 }
 0x38a   :  { %4857 = vmatmul.msk.bf16.gmra.mxu1 %vm1997_vm1, %v1960_v40  ;;  %3064 = vmatpush.bf16.msrb.mxu0 %v5093_v33  ;;  %v5522_v33 = vld [vmem:[%s8804_s11 + $0x50] sm:$0xf0] }
 0x38b   :  { %v4953_v16 = vor.u32 %v5522_v33, %v4952_v13  ;;  %v5178_v13 = vld [vmem:[%s8804_s11 + $0x214] sm:$0xf0] }
 0x38e   :  { %3065 = vmatpush.bf16.msrb.mxu0 %v5065_v43  ;;  %v5094_v43 = vld [vmem:[%s8804_s11 + $0x16c] sm:$0xf0] }
 0x38f   :  { %v5097_v0 = vor.u32 %v5554_v32, %v5094_v43  ;;  %v5621_v43 = vld [vmem:[%s8804_s11 + $0x368] sm:$0xf0] }
 0x392   :  { %3066 = vmatpush.bf16.msrb.mxu0 %v5037_v17 }
 0x396   :  { %3067 = vmatpush.bf16.msrb.mxu0 %v5009_v26 }
 0x397   :  { %v2031_v63 = vpop.f32.mrf.mxu1 }
 0x398   :  { %v2032_v1 = vadd.f32 %v7570_v39, %v2031_v63 }
 0x39a   :  { %v2071_v60 = vmax.f32 %v2032_v1, 0.0  ;;  %v5585_v1 = vld [vmem:[%s8804_s11 + $0x248] sm:$0xf0]  ;;  %3068 = vmatpush.bf16.msrb.mxu0 %v4981_v31  ;;  %v5206_v31 = vld [vmem:[%s8804_s11 + $0x24c] sm:$0xf0] }
 0x39e   :  { %3069 = vmatpush.bf16.msrb.mxu0 %v4953_v16  ;;  %v5512_v16 = vld [vmem:[%s8804_s11 + $0x4] sm:$0xf] }
 0x39f   :  { %v2033_v23 = vpop.f32.mrf.mxu1 }
 0x3a0   :  { %v2034_v12 = vadd.f32 %v7570_v39, %v2033_v23  ;;  %v5205_v23 = vor.u32 %v5585_v1, %v5204_v18 }
 0x3a2   :  { %v2072_v20 = vmax.f32 %v2034_v12, 0.0  ;;  %3117 = vmatpush.bf16.msrb.mxu1 %v5205_v23 }
 0x3a4   :  { %v2087_v57 = vpack.c.bf16 %v2072_v20, %v2071_v60 }
 0x3a6   :  { %2205 = vmatmul.bf16.vlgmr.msrb.gmra.mxu2 %v2087_v57  ;;  %2254 = vmatmul.bf16.vlgmr.msrb.gmra.mxu3 %v2087_v57 }
 0x3a7   :  { %v2036_v5 = vpop.f32.mrf.mxu1 }
 0x3a8   :  { %v2037_v25 = vadd.f32 %v7570_v39, %v2036_v5 }
 0x3aa   :  { %v2073_v50 = vmax.f32 %v2037_v25, 0.0  ;;  %v5122_v25 = vld [vmem:[%s8804_s11 + $0x1a4] sm:$0xf0] }
 0x3af   :  { %v2038_v6 = vpop.f32.mrf.mxu1 }
 0x3b0   :  { %v2039_v7 = vadd.f32 %v7570_v39, %v2038_v6  ;;  %v5617_v6 = vld [vmem:[%s8804_s11 + $0x34c] sm:$0xf] }
 0x3b2   :  { %v2074_v52 = vmax.f32 %v2039_v7, 0.0  ;;  %v5346_v7 = vld [vmem:[%s8804_s11 + $0x364] sm:$0xf0] }
 0x3b4   :  { %v2088_v4 = vpack.c.bf16 %v2074_v52, %v2073_v50  ;;  %v5125_v50 = vor.u32 %v5561_v34, %v5122_v25  ;;  %v5349_v52 = vor.u32 %v5617_v6, %v5346_v7  ;;  %v4926_v25 = vld [vmem:[%s8804_s11 + $0x1c] sm:$0xf0] }
 0x3b5   :  { %v4929_v7 = vor.u32 %v5512_v16, %v4926_v25 }
 0x3b6   :  { %2210 = vmatmul.bf16.gmra.mxu2 %v2088_v4  ;;  %2259 = vmatmul.bf16.gmra.mxu3 %v2088_v4  ;;  %v5176_v4 = vld [vmem:[%s8804_s11 + $0x1f8] sm:$0xf] }
 0x3b7   :  { %v2041_v41 = vpop.f32.mrf.mxu1  ;;  %3161 = vmatpush.bf16.msra.mxu2 %v5125_v50  ;;  %3210 = vmatpush.bf16.msra.mxu3 %v5349_v52  ;;  %v5150_v50 = vld [vmem:[%s8804_s11 + $0x1dc] sm:$0xf0] }
 0x3b8   :  { %v2042_v30 = vadd.f32 %v7570_v39, %v2041_v41  ;;  %v5578_v41 = vld [vmem:[%s8804_s11 + $0x210] sm:$0xf0] }
 0x3b9   :  { %v5177_v47 = vor.u32 %v5578_v41, %v5176_v4  ;;  %v5128_v4 = vld [vmem:[%s8804_s11 + $0x190] sm:$0xf]  ;;  %v5565_v41 = vld [vmem:[%s8804_s11 + $0x1a8] sm:$0xf0] }
 0x3ba   :  { %v2075_v53 = vmax.f32 %v2042_v30, 0.0  ;;  %v5321_v30 = vor.u32 %v5610_v8, %v5318_v15  ;;  %v5129_v32 = vor.u32 %v5565_v41, %v5128_v4  ;;  %v2111_v15 = vld [vmem:[%s8805_s10] sm:$0x3] }
 0x3bb   :  { %3118 = vmatpush.bf16.msrb.mxu1 %v5177_v47  ;;  %3162 = vmatpush.bf16.msra.mxu2 %v5097_v0  ;;  %v5352_v47 = vld [vmem:[%s8804_s11 + $0x350] sm:$0xf] }
 0x3bc   :  { %3211 = vmatpush.bf16.msra.mxu3 %v5321_v30  ;;  %v5353_v8 = vor.u32 %v5621_v43, %v5352_v47 }
 0x3bf   :  { %v2043_v37 = vpop.f32.mrf.mxu1 }
 0x3c0   :  { %v2044_v44 = vadd.f32 %v7570_v39, %v2043_v37  ;;  %v5547_v37 = vld [vmem:[%s8804_s11 + $0x11c] sm:$0xf] }
 0x3c2   :  { %v2076_v9 = vmax.f32 %v2044_v44, 0.0  ;;  %v5066_v44 = vld [vmem:[%s8804_s11 + $0x134] sm:$0xf0] }
 0x3c3   :  { %v5069_v28 = vor.u32 %v5547_v37, %v5066_v44  ;;  %v5100_v37 = vld [vmem:[%s8804_s11 + $0x158] sm:$0xf]  ;;  %v5558_v44 = vld [vmem:[%s8804_s11 + $0x170] sm:$0xf0] }
 0x3c4   :  { %v2089_v27 = vpack.c.bf16 %v2076_v9, %v2075_v53  ;;  %v5603_v53 = vld [vmem:[%s8804_s11 + $0x2dc] sm:$0xf]  ;;  %v5290_v9 = vld [vmem:[%s8804_s11 + $0x2f4] sm:$0xf0] }
 0x3c5   :  { %v5293_v17 = vor.u32 %v5603_v53, %v5290_v9  ;;  %3163 = vmatpush.bf16.msra.mxu2 %v5069_v28  ;;  %v5101_v53 = vor.u32 %v5558_v44, %v5100_v37  ;;  %v7801_v9 = vperm.slane %v2111_v15, 0  ;;  %v5240_v44 = vld [vmem:[%s8804_s11 + $0x270] sm:$0xf] }
 0x3c6   :  { %2215 = vmatmul.bf16.gmra.mxu2 %v2089_v27  ;;  %2264 = vmatmul.bf16.gmra.mxu3 %v2089_v27 }
 0x3c7   :  { %v2046_v46 = vpop.f32.mrf.mxu1  ;;  %3212 = vmatpush.bf16.msra.mxu3 %v5293_v17 }
 0x3c8   :  { %v2047_v36 = vadd.f32 %v7570_v39, %v2046_v46  ;;  %v4924_v46 = vld [vmem:[%s8804_s11] sm:$0xf] }
 0x3c9   :  { %v4925_v22 = vor.u32 %v5515_v45, %v4924_v46  ;;  %v5324_v46 = vld [vmem:[%s8804_s11 + $0x318] sm:$0xf]  ;;  %v5614_v45 = vld [vmem:[%s8804_s11 + $0x330] sm:$0xf0] }
 0x3ca   :  { %v2077_v55 = vmax.f32 %v2047_v36, 0.0  ;;  %v5325_v28 = vor.u32 %v5614_v45, %v5324_v46 }
 0x3cb   :  { %3070 = vmatpush.bf16.msrb.mxu0 %v4925_v22 }
 0x3cf   :  { %v2048_v51 = vpop.f32.mrf.mxu1  ;;  %3259 = vmatpush.bf16.msra.mxu0 %v5129_v32 }
 0x3d0   :  { %v2049_v42 = vadd.f32 %v7570_v39, %v2048_v51  ;;  %v5038_v51 = vld [vmem:[%s8804_s11 + $0xfc] sm:$0xf0] }
 0x3d2   :  { %v2078_v49 = vmax.f32 %v2049_v42, 0.0  ;;  %v5596_v42 = vld [vmem:[%s8804_s11 + $0x2a4] sm:$0xf] }
 0x3d3   :  { %3260 = vmatpush.bf16.msra.mxu0 %v5101_v53  ;;  %v5593_v53 = vld [vmem:[%s8804_s11 + $0x288] sm:$0xf0] }
 0x3d4   :  { %v2090_v19 = vpack.c.bf16 %v2078_v49, %v2077_v55  ;;  %v5262_v55 = vld [vmem:[%s8804_s11 + $0x2bc] sm:$0xf0]  ;;  %v5241_v46 = vor.u32 %v5593_v53, %v5240_v44  ;;  %v5548_v44 = vld [vmem:[%s8804_s11 + $0x124] sm:$0xf] }
 0x3d5   :  { %v5265_v29 = vor.u32 %v5596_v42, %v5262_v55  ;;  %v5074_v53 = vld [vmem:[%s8804_s11 + $0x13c] sm:$0xf0] }
 0x3d6   :  { %2220 = vmatmul.bf16.gmra.mxu2 %v2090_v19  ;;  %2269 = vmatmul.bf16.gmra.mxu3 %v2090_v19 }
 0x3d7   :  { %v2051_v56 = vpop.f32.mrf.mxu1  ;;  %3213 = vmatpush.bf16.msra.mxu3 %v5265_v29 }
 0x3d8   :  { %v2052_v11 = vadd.f32 %v7570_v39, %v2051_v56  ;;  %v5041_v56 = vor.u32 %v5540_v38, %v5038_v51 }
 0x3da   :  { %v2079_v40 = vmax.f32 %v2052_v11, 0.0  ;;  %3164 = vmatpush.bf16.msra.mxu2 %v5041_v56  ;;  %v5013_v11 = vor.u32 %v5533_v35, %v5010_v61  ;;  %v5072_v35 = vld [vmem:[%s8804_s11 + $0x120] sm:$0xf]  ;;  %v5551_v61 = vld [vmem:[%s8804_s11 + $0x138] sm:$0xf0] }
 0x3de   :  { %3165 = vmatpush.bf16.msra.mxu2 %v5013_v11  ;;  %v5296_v11 = vld [vmem:[%s8804_s11 + $0x2e0] sm:$0xf] }
 0x3df   :  { %v2053_v21 = vpop.f32.mrf.mxu1 }
 0x3e0   :  { %v2054_v59 = vadd.f32 %v7570_v39, %v2053_v21  ;;  %v5234_v21 = vld [vmem:[%s8804_s11 + $0x284] sm:$0xf0] }
 0x3e2   :  { %v2080_v63 = vmax.f32 %v2054_v59, 0.0  ;;  %v5237_v59 = vor.u32 %v5589_v62, %v5234_v21  ;;  %v5073_v62 = vor.u32 %v5551_v61, %v5072_v35  ;;  %v5607_v21 = vld [vmem:[%s8804_s11 + $0x2f8] sm:$0xf0]  ;;  %v4988_v35 = vld [vmem:[%s8804_s11 + $0x78] sm:$0xf] }
 0x3e3   :  { %v5530_v61 = vld [vmem:[%s8804_s11 + $0x90] sm:$0xf0] }
 0x3e4   :  { %v2091_v54 = vpack.c.bf16 %v2080_v63, %v2079_v40  ;;  %3214 = vmatpush.bf16.msra.mxu3 %v5237_v59  ;;  %v5526_v40 = vld [vmem:[%s8804_s11 + $0x74] sm:$0xf]  ;;  %v4982_v63 = vld [vmem:[%s8804_s11 + $0x8c] sm:$0xf0]  ;;  %3261 = vmatpush.bf16.msra.mxu0 %v5073_v62  ;;  %v5297_v59 = vor.u32 %v5607_v21, %v5296_v11  ;;  %v4989_v62 = vor.u32 %v5530_v61, %v4988_v35  ;;  %v5212_v11 = vld [vmem:[%s8804_s11 + $0x238] sm:$0xf] }
 0x3e5   :  { %v4985_v48 = vor.u32 %v5526_v40, %v4982_v63  ;;  %v5586_v21 = vld [vmem:[%s8804_s11 + $0x250] sm:$0xf0] }
 0x3e6   :  { %2225 = vmatmul.bf16.gmra.mxu2 %v2091_v54  ;;  %2274 = vmatmul.bf16.gmra.mxu3 %v2091_v54  ;;  %v5582_v54 = vld [vmem:[%s8804_s11 + $0x234] sm:$0xf] }
 0x3e7   :  { %v2056_v14 = vpop.f32.mrf.mxu1  ;;  %v5209_v1 = vor.u32 %v5582_v54, %v5206_v31  ;;  %3166 = vmatpush.bf16.msra.mxu2 %v4985_v48 }
 0x3e8   :  { %v2057_v12 = vadd.f32 %v7570_v39, %v2056_v14  ;;  %v5148_v14 = vld [vmem:[%s8804_s11 + $0x1c0] sm:$0xf] }
 0x3e9   :  { %v5149_v18 = vor.u32 %v5571_v3, %v5148_v14  ;;  %3215 = vmatpush.bf16.msra.mxu3 %v5209_v1 }
 0x3ea   :  { %v2081_v57 = vmax.f32 %v2057_v12, 0.0 }
 0x3eb   :  { %3119 = vmatpush.bf16.msrb.mxu1 %v5149_v18 }
 0x3ef   :  { %v2058_v60 = vpop.f32.mrf.mxu1  ;;  %3308 = vmatpush.bf16.msra.mxu1 %v5353_v8 }
 0x3f0   :  { %v2059_v20 = vadd.f32 %v7570_v39, %v2058_v60  ;;  %v5519_v60 = vld [vmem:[%s8804_s11 + $0x3c] sm:$0xf] }
 0x3f2   :  { %v2082_v5 = vmax.f32 %v2059_v20, 0.0  ;;  %v4954_v20 = vld [vmem:[%s8804_s11 + $0x54] sm:$0xf0] }
 0x3f3   :  { %3309 = vmatpush.bf16.msra.mxu1 %v5325_v28 }
 0x3f4   :  { %v2092_v24 = vpack.c.bf16 %v2082_v5, %v2081_v57  ;;  %v5575_v57 = vld [vmem:[%s8804_s11 + $0x1fc] sm:$0xf] }
 0x3f5   :  { %v5181_v33 = vor.u32 %v5575_v57, %v5178_v13 }
 0x3f6   :  { %2230 = vmatmul.bf16.gmra.mxu2 %v2092_v24  ;;  %2279 = vmatmul.bf16.gmra.mxu3 %v2092_v24  ;;  %v4957_v24 = vor.u32 %v5519_v60, %v4954_v20 }
 0x3f7   :  { %v2061_v10 = vpop.f32.mrf.mxu1  ;;  %3216 = vmatpush.bf16.msra.mxu3 %v5181_v33  ;;  %3310 = vmatpush.bf16.msra.mxu1 %v5297_v59  ;;  %v5268_v33 = vld [vmem:[%s8804_s11 + $0x2a8] sm:$0xf]  ;;  %v5213_v59 = vor.u32 %v5586_v21, %v5212_v11 }
 0x3f8   :  { %v2062_v27 = vadd.f32 %v7570_v39, %v2061_v10  ;;  %3167 = vmatpush.bf16.msra.mxu2 %v4957_v24  ;;  %v5544_v24 = vld [vmem:[%s8804_s11 + $0x100] sm:$0xf0]  ;;  %v5270_v21 = vld [vmem:[%s8804_s11 + $0x2c4] sm:$0xf0] }
 0x3fa   :  { %v2083_v49 = vmax.f32 %v2062_v27, 0.0  ;;  %v7803_v27 = vperm.slane %v2111_v15, 1 }
 0x3fc   :  { %3168 = vmatpush.bf16.msra.mxu2 %v4929_v7 }
 0x3ff   :  { %v2063_v58 = vpop.f32.mrf.mxu1 }
 0x400   :  { %v2064_v36 = vadd.f32 %v7570_v39, %v2063_v58 }
 0x402   :  { %v2084_v19 = vmax.f32 %v2064_v36, 0.0 }
 0x404   :  { %v2093_v2 = vpack.c.bf16 %v2084_v19, %v2083_v49 }
 0x406   :  { %2235 = vmatmul.bf16.gmra.mxu2 %v2093_v2  ;;  %2284 = vmatmul.bf16.gmra.mxu3 %v2093_v2 }
 0x407   :  { %v2066_v26 = vpop.f32.mrf.mxu1 }
 0x408   :  { %v2067_v23 = vadd.f32 %v7570_v39, %v2066_v26 }
 0x40a   :  { %v2085_v34 = vmax.f32 %v2067_v23, 0.0 }
 0x40f   :  { %v2068_v12 = vpop.f32.mrf.mxu1 }
 0x410   :  { %v2069_v5 = vadd.f32 %v7570_v39, %v2068_v12  ;;  %v5568_v39 = vld [vmem:[%s8804_s11 + $0x1c4] sm:$0xf] }
 0x411   :  { %v5153_v52 = vor.u32 %v5568_v39, %v5150_v50 }
 0x412   :  { %v2086_v10 = vmax.f32 %v2069_v5, 0.0  ;;  %v5044_v5 = vld [vmem:[%s8804_s11 + $0xe8] sm:$0xf] }
 0x413   :  { %3217 = vmatpush.bf16.msra.mxu3 %v5153_v52  ;;  %v5045_v13 = vor.u32 %v5544_v24, %v5044_v5  ;;  %v5562_v5 = vld [vmem:[%s8804_s11 + $0x194] sm:$0xf]  ;;  %v5130_v24 = vld [vmem:[%s8804_s11 + $0x1ac] sm:$0xf0] }
 0x414   :  { %v2094_v6 = vpack.c.bf16 %v2086_v10, %v2085_v34  ;;  %v5600_v34 = vld [vmem:[%s8804_s11 + $0x2c0] sm:$0xf0] }
 0x415   :  { %3262 = vmatpush.bf16.msra.mxu0 %v5045_v13  ;;  %v5269_v10 = vor.u32 %v5600_v34, %v5268_v33  ;;  %v5618_v13 = vld [vmem:[%s8804_s11 + $0x354] sm:$0xf]  ;;  %v5133_v33 = vor.u32 %v5562_v5, %v5130_v24  ;;  %v5354_v34 = vld [vmem:[%s8804_s11 + $0x36c] sm:$0xf0]  ;;  %v5516_v5 = vld [vmem:[%s8804_s11 + $0x20] sm:$0xf0] }
 0x416   :  { %2240 = vmatmul.bf16.gmra.mxu2 %v2094_v6  ;;  %2289 = vmatmul.bf16.gmra.mxu3 %v2094_v6  ;;  %v5156_v24 = vld [vmem:[%s8804_s11 + $0x1c8] sm:$0xf] }
 0x417   :  { %3311 = vmatpush.bf16.msra.mxu1 %v5269_v10  ;;  %3357 = vmatpush.bf16.msrb.mxu2 %v5133_v33 }
 0x41b   :  { %3312 = vmatpush.bf16.msra.mxu1 %v5241_v46  ;;  %v5604_v46 = vld [vmem:[%s8804_s11 + $0x2e4] sm:$0xf] }
 0x41f   :  { %3313 = vmatpush.bf16.msra.mxu1 %v5213_v59 }
 0x429   :  { %v2206_v0 = vpop.f32.mrf.mxu2  ;;  %v2255_v30 = vpop.f32.mrf.mxu3 }
 0x42a   :  { %v2207_v17 = vadd.f32 %v2206_v0, %v7801_v9  ;;  %v2256_v22 = vadd.f32 %v2255_v30, %v7803_v27  ;;  %v5016_v0 = vld [vmem:[%s8804_s11 + $0xb0] sm:$0xf]  ;;  %v5537_v30 = vld [vmem:[%s8804_s11 + $0xc8] sm:$0xf0] }
 0x42b   :  { %v5017_v37 = vor.u32 %v5537_v30, %v5016_v0  ;;  %v5326_v0 = vld [vmem:[%s8804_s11 + $0x334] sm:$0xf0] }
 0x42c   :  { %v2295_v42 = vmax.f32 %v2207_v17, 0.0  ;;  %v2296_v55 = vmax.f32 %v2256_v22, 0.0 }
 0x42d   :  { %3263 = vmatpush.bf16.msra.mxu0 %v5017_v37 }
 0x431   :  { %v2208_v58 = vpop.f32.mrf.mxu2  ;;  %v2257_v38 = vpop.f32.mrf.mxu3  ;;  %3264 = vmatpush.bf16.msra.mxu0 %v4989_v62 }
 0x432   :  { %v2209_v36 = vadd.f32 %v2208_v58, %v7801_v9  ;;  %v2258_v51 = vadd.f32 %v2257_v38, %v7803_v27 }
 0x434   :  { %v2297_v49 = vmax.f32 %v2209_v36, 0.0  ;;  %v2298_v19 = vmax.f32 %v2258_v51, 0.0 }
 0x436   :  { %v7815_v56 = vpack.c.bf16 %v2297_v49, %v2295_v42  ;;  %v7817_v29 = vpack.c.bf16 %v2298_v19, %v2296_v55 }
 0x438   :  { %3071 = vmatmul.bf16.vlgmr.msrb.gmra.mxu0 %v7815_v56  ;;  %3120 = vmatmul.bf16.vlgmr.msrb.gmra.mxu1 %v7817_v29 }
 0x439   :  { %3169 = vmatmul.bf16.vlgmr.msra.gmra.mxu2 %v7815_v56  ;;  %3218 = vmatmul.bf16.vlgmr.msra.gmra.mxu3 %v7817_v29  ;;  %v2211_v2 = vpop.f32.mrf.mxu2  ;;  %v2260_v26 = vpop.f32.mrf.mxu3 }
 0x43a   :  { %v2212_v40 = vadd.f32 %v2211_v2, %v7801_v9  ;;  %v2261_v63 = vadd.f32 %v2260_v26, %v7803_v27 }
 0x43c   :  { %v2299_v31 = vmax.f32 %v2212_v40, 0.0  ;;  %v2300_v18 = vmax.f32 %v2261_v63, 0.0 }
 0x441   :  { %v2213_v54 = vpop.f32.mrf.mxu2  ;;  %v2262_v14 = vpop.f32.mrf.mxu3 }
 0x442   :  { %v2214_v3 = vadd.f32 %v2213_v54, %v7801_v9  ;;  %v2263_v48 = vadd.f32 %v2262_v14, %v7803_v27 }
 0x444   :  { %v2301_v1 = vmax.f32 %v2214_v3, 0.0  ;;  %v2302_v23 = vmax.f32 %v2263_v48, 0.0 }
 0x446   :  { %v7839_v12 = vpack.c.bf16 %v2301_v1, %v2299_v31  ;;  %v7841_v60 = vpack.c.bf16 %v2302_v23, %v2300_v18 }
 0x448   :  { %3076 = vmatmul.bf16.gmra.mxu0 %v7839_v12  ;;  %3125 = vmatmul.bf16.gmra.mxu1 %v7841_v60 }
 0x449   :  { %3174 = vmatmul.bf16.gmra.mxu2 %v7839_v12  ;;  %3223 = vmatmul.bf16.gmra.mxu3 %v7841_v60  ;;  %v2216_v20 = vpop.f32.mrf.mxu2  ;;  %v2265_v57 = vpop.f32.mrf.mxu3 }
 0x44a   :  { %v2217_v16 = vadd.f32 %v2216_v20, %v7801_v9  ;;  %v2266_v25 = vadd.f32 %v2265_v57, %v7803_v27 }
 0x44c   :  { %v2303_v52 = vmax.f32 %v2217_v16, 0.0  ;;  %v2304_v4 = vmax.f32 %v2266_v25, 0.0  ;;  %v4960_v25 = vld [vmem:[%s8804_s11 + $0x40] sm:$0xf] }
 0x451   :  { %v2218_v39 = vpop.f32.mrf.mxu2  ;;  %v2267_v6 = vpop.f32.mrf.mxu3 }
 0x452   :  { %v2219_v7 = vadd.f32 %v2218_v39, %v7801_v9  ;;  %v2268_v50 = vadd.f32 %v2267_v6, %v7803_v27  ;;  %v5523_v39 = vld [vmem:[%s8804_s11 + $0x58] sm:$0xf0]  ;;  %v5357_v6 = vor.u32 %v5618_v13, %v5354_v34  ;;  %v5572_v34 = vld [vmem:[%s8804_s11 + $0x1e0] sm:$0xf0] }
 0x454   :  { %v2305_v41 = vmax.f32 %v2219_v7, 0.0  ;;  %v2306_v32 = vmax.f32 %v2268_v50, 0.0  ;;  %v4961_v7 = vor.u32 %v5523_v39, %v4960_v25  ;;  %3406 = vmatpush.bf16.msrb.mxu3 %v5357_v6  ;;  %v5555_v50 = vld [vmem:[%s8804_s11 + $0x15c] sm:$0xf]  ;;  %v5157_v25 = vor.u32 %v5572_v34, %v5156_v24  ;;  %v8090_v34 = vld [vmem:[%s8806_s12] sm:$0x7f] }
 0x455   :  { %v5583_v6 = vld [vmem:[%s8804_s11 + $0x23c] sm:$0xf] }
 0x456   :  { %v7863_v47 = vpack.c.bf16 %v2305_v41, %v2303_v52  ;;  %v7865_v43 = vpack.c.bf16 %v2306_v32, %v2304_v4  ;;  %v5102_v52 = vld [vmem:[%s8804_s11 + $0x174] sm:$0xf0]  ;;  %v5611_v4 = vld [vmem:[%s8804_s11 + $0x31c] sm:$0xf]  ;;  %3265 = vmatpush.bf16.msra.mxu0 %v4961_v7  ;;  %v5184_v41 = vld [vmem:[%s8804_s11 + $0x200] sm:$0xf] }
 0x457   :  { %v5579_v32 = vld [vmem:[%s8804_s11 + $0x218] sm:$0xf0]  ;;  %v5329_v37 = vor.u32 %v5611_v4, %v5326_v0  ;;  %v5214_v7 = vld [vmem:[%s8804_s11 + $0x254] sm:$0xf0] }
 0x458   :  { %3081 = vmatmul.bf16.gmra.mxu0 %v7863_v47  ;;  %3130 = vmatmul.bf16.gmra.mxu1 %v7865_v43 }
 0x459   :  { %3179 = vmatmul.bf16.gmra.mxu2 %v7863_v47  ;;  %3228 = vmatmul.bf16.gmra.mxu3 %v7865_v43  ;;  %v2221_v8 = vpop.f32.mrf.mxu2  ;;  %v2270_v15 = vpop.f32.mrf.mxu3 }
 0x45a   :  { %v2222_v45 = vadd.f32 %v2221_v8, %v7801_v9  ;;  %v2271_v28 = vadd.f32 %v2270_v15, %v7803_v27  ;;  %v5105_v8 = vor.u32 %v5555_v50, %v5102_v52  ;;  %v5185_v15 = vor.u32 %v5579_v32, %v5184_v41  ;;  %3407 = vmatpush.bf16.msrb.mxu3 %v5329_v37  ;;  %v5520_v50 = vld [vmem:[%s8804_s11 + $0x44] sm:$0xf]  ;;  %v4962_v52 = vld [vmem:[%s8804_s11 + $0x5c] sm:$0xf0] }
 0x45b   :  { %v5217_v41 = vor.u32 %v5583_v6, %v5214_v7  ;;  %v4965_v32 = vor.u32 %v5520_v50, %v4962_v52  ;;  %v5108_v7 = vld [vmem:[%s8804_s11 + $0x160] sm:$0xf]  ;;  %v5559_v50 = vld [vmem:[%s8804_s11 + $0x178] sm:$0xf0] }
 0x45c   :  { %v2307_v36 = vmax.f32 %v2222_v45, 0.0  ;;  %v2308_v51 = vmax.f32 %v2271_v28, 0.0  ;;  %3358 = vmatpush.bf16.msrb.mxu2 %v5105_v8  ;;  %3314 = vmatpush.bf16.msra.mxu1 %v5185_v15  ;;  %v5077_v28 = vor.u32 %v5548_v44, %v5074_v53  ;;  %v5576_v8 = vld [vmem:[%s8804_s11 + $0x204] sm:$0xf]  ;;  %v5186_v15 = vld [vmem:[%s8804_s11 + $0x21c] sm:$0xf0] }
 0x45d   :  { %v5332_v52 = vld [vmem:[%s8804_s11 + $0x320] sm:$0xf] }
 0x460   :  { %3359 = vmatpush.bf16.msrb.mxu2 %v5077_v28  ;;  %3315 = vmatpush.bf16.msra.mxu1 %v5157_v25  ;;  %v5513_v28 = vld [vmem:[%s8804_s11 + $0xc] sm:$0xf] }
 0x461   :  { %v2223_v17 = vpop.f32.mrf.mxu2  ;;  %v2272_v22 = vpop.f32.mrf.mxu3 }
 0x462   :  { %v2224_v58 = vadd.f32 %v2223_v17, %v7801_v9  ;;  %v2273_v38 = vadd.f32 %v2272_v22, %v7803_v27  ;;  %v5298_v17 = vld [vmem:[%s8804_s11 + $0x2fc] sm:$0xf0] }
 0x464   :  { %v2309_v42 = vmax.f32 %v2224_v58, 0.0  ;;  %v2310_v55 = vmax.f32 %v2273_v38, 0.0  ;;  %v5301_v38 = vor.u32 %v5604_v46, %v5298_v17  ;;  %v4934_v17 = vld [vmem:[%s8804_s11 + $0x24] sm:$0xf0] }
 0x466   :  { %v7887_v49 = vpack.c.bf16 %v2309_v42, %v2307_v36  ;;  %v7889_v19 = vpack.c.bf16 %v2310_v55, %v2308_v51  ;;  %v5541_v55 = vld [vmem:[%s8804_s11 + $0xec] sm:$0xf]  ;;  %3408 = vmatpush.bf16.msrb.mxu3 %v5301_v38 }
 0x468   :  { %3086 = vmatmul.bf16.gmra.mxu0 %v7887_v49  ;;  %3135 = vmatmul.bf16.gmra.mxu1 %v7889_v19 }
 0x469   :  { %3184 = vmatmul.bf16.gmra.mxu2 %v7887_v49  ;;  %3233 = vmatmul.bf16.gmra.mxu3 %v7889_v19  ;;  %v2226_v2 = vpop.f32.mrf.mxu2  ;;  %v2275_v26 = vpop.f32.mrf.mxu3 }
 0x46a   :  { %v2227_v40 = vadd.f32 %v2226_v2, %v7801_v9  ;;  %v2276_v63 = vadd.f32 %v2275_v26, %v7803_v27  ;;  %v5046_v2 = vld [vmem:[%s8804_s11 + $0x104] sm:$0xf0]  ;;  %v5597_v26 = vld [vmem:[%s8804_s11 + $0x2ac] sm:$0xf] }
 0x46b   :  { %v5049_v11 = vor.u32 %v5541_v55, %v5046_v2 }
 0x46c   :  { %v2311_v31 = vmax.f32 %v2227_v40, 0.0  ;;  %v2312_v18 = vmax.f32 %v2276_v63, 0.0  ;;  %v5273_v63 = vor.u32 %v5597_v26, %v5270_v21 }
 0x46d   :  { %3360 = vmatpush.bf16.msrb.mxu2 %v5049_v11 }
 0x46e   :  { %3409 = vmatpush.bf16.msrb.mxu3 %v5273_v63 }
 0x471   :  { %v2228_v54 = vpop.f32.mrf.mxu2  ;;  %v2277_v14 = vpop.f32.mrf.mxu3 }
 0x472   :  { %v2229_v3 = vadd.f32 %v2228_v54, %v7801_v9  ;;  %v2278_v48 = vadd.f32 %v2277_v14, %v7803_v27  ;;  %v5534_v54 = vld [vmem:[%s8804_s11 + $0xb4] sm:$0xf]  ;;  %v5018_v14 = vld [vmem:[%s8804_s11 + $0xcc] sm:$0xf0] }
 0x474   :  { %v2313_v1 = vmax.f32 %v2229_v3, 0.0  ;;  %v2314_v23 = vmax.f32 %v2278_v48, 0.0  ;;  %v5590_v3 = vld [vmem:[%s8804_s11 + $0x274] sm:$0xf]  ;;  %v5021_v48 = vor.u32 %v5534_v54, %v5018_v14 }
 0x476   :  { %v7911_v20 = vpack.c.bf16 %v2313_v1, %v2311_v31  ;;  %v7913_v57 = vpack.c.bf16 %v2314_v23, %v2312_v18  ;;  %v5242_v31 = vld [vmem:[%s8804_s11 + $0x28c] sm:$0xf0]  ;;  %v4932_v23 = vld [vmem:[%s8804_s11 + $0x8] sm:$0xf]  ;;  %3361 = vmatpush.bf16.msrb.mxu2 %v5021_v48 }
 0x477   :  { %v4933_v13 = vor.u32 %v5516_v5, %v4932_v23  ;;  %v5245_v33 = vor.u32 %v5590_v3, %v5242_v31  ;;  %v5566_v23 = vld [vmem:[%s8804_s11 + $0x1b0] sm:$0xf0]  ;;  %v5360_v5 = vld [vmem:[%s8804_s11 + $0x358] sm:$0xf] }
 0x478   :  { %3091 = vmatmul.bf16.gmra.mxu0 %v7911_v20  ;;  %3140 = vmatmul.bf16.gmra.mxu1 %v7913_v57 }
 0x479   :  { %3189 = vmatmul.bf16.gmra.mxu2 %v7911_v20  ;;  %3238 = vmatmul.bf16.gmra.mxu3 %v7913_v57  ;;  %v2231_v10 = vpop.f32.mrf.mxu2  ;;  %v2280_v16 = vpop.f32.mrf.mxu3 }
 0x47a   :  { %v2232_v30 = vadd.f32 %v2231_v10, %v7801_v9  ;;  %v2281_v45 = vadd.f32 %v2280_v16, %v7803_v27  ;;  %v5527_v10 = vld [vmem:[%s8804_s11 + $0x7c] sm:$0xf]  ;;  %v4990_v16 = vld [vmem:[%s8804_s11 + $0x94] sm:$0xf0]  ;;  %3266 = vmatpush.bf16.msra.mxu0 %v4933_v13  ;;  %3410 = vmatpush.bf16.msrb.mxu3 %v5245_v33  ;;  %v5622_v13 = vld [vmem:[%s8804_s11 + $0x370] sm:$0xf0] }
 0x47b   :  { %v4993_v39 = vor.u32 %v5527_v10, %v4990_v16  ;;  %v5361_v33 = vor.u32 %v5622_v13, %v5360_v5  ;;  %v8093_v10 = vperm.slane %v8090_v34, 0 }
 0x47c   :  { %v2315_v36 = vmax.f32 %v2232_v30, 0.0  ;;  %v2316_v35 = vmax.f32 %v2281_v45, 0.0  ;;  %v5189_v45 = vor.u32 %v5576_v8, %v5186_v15 }
 0x47d   :  { %3362 = vmatpush.bf16.msrb.mxu2 %v4993_v39  ;;  %3504 = vmatpush.bf16.msrb.mxu1 %v5361_v33 }
 0x47e   :  { %3411 = vmatpush.bf16.msrb.mxu3 %v5217_v41  ;;  %v5109_v41 = vor.u32 %v5559_v50, %v5108_v7 }
 0x481   :  { %v2233_v22 = vpop.f32.mrf.mxu2  ;;  %v2282_v58 = vpop.f32.mrf.mxu3  ;;  %3363 = vmatpush.bf16.msrb.mxu2 %v4965_v32  ;;  %v5615_v32 = vld [vmem:[%s8804_s11 + $0x338] sm:$0xf0] }
 0x482   :  { %v2234_v51 = vadd.f32 %v2233_v22, %v7801_v9  ;;  %v2283_v42 = vadd.f32 %v2282_v58, %v7803_v27  ;;  %v5569_v22 = vld [vmem:[%s8804_s11 + $0x1cc] sm:$0xf]  ;;  %3412 = vmatpush.bf16.msrb.mxu3 %v5189_v45  ;;  %v5333_v15 = vor.u32 %v5615_v32, %v5332_v52 }
 0x484   :  { %v2317_v61 = vmax.f32 %v2234_v51, 0.0  ;;  %v2318_v62 = vmax.f32 %v2283_v42, 0.0  ;;  %v4937_v51 = vor.u32 %v5513_v28, %v4934_v17  ;;  %v5158_v42 = vld [vmem:[%s8804_s11 + $0x1e4] sm:$0xf0]  ;;  %3505 = vmatpush.bf16.msrb.mxu1 %v5333_v15 }
 0x485   :  { %v5161_v26 = vor.u32 %v5569_v22, %v5158_v42 }
 0x486   :  { %v7983_v59 = vpack.c.bf16 %v2317_v61, %v2315_v36  ;;  %v7985_v40 = vpack.c.bf16 %v2318_v62, %v2316_v35  ;;  %3364 = vmatpush.bf16.msrb.mxu2 %v4937_v51 }
 0x487   :  { %3413 = vmatpush.bf16.msrb.mxu3 %v5161_v26 }
 0x488   :  { %3096 = vmatmul.bf16.gmra.mxu0 %v7983_v59  ;;  %3145 = vmatmul.bf16.gmra.mxu1 %v7985_v40 }
 0x489   :  { %3194 = vmatmul.bf16.gmra.mxu2 %v7983_v59  ;;  %3243 = vmatmul.bf16.gmra.mxu3 %v7985_v40  ;;  %v2236_v18 = vpop.f32.mrf.mxu2  ;;  %v2285_v1 = vpop.f32.mrf.mxu3 }
 0x48a   :  { %v2237_v4 = vadd.f32 %v2236_v18, %v7801_v9  ;;  %v2286_v0 = vadd.f32 %v2285_v1, %v7803_v27  ;;  %v5136_v1 = vld [vmem:[%s8804_s11 + $0x198] sm:$0xf] }
 0x48c   :  { %v2319_v44 = vmax.f32 %v2237_v4, 0.0  ;;  %v2320_v58 = vmax.f32 %v2286_v0, 0.0  ;;  %v8110_v4 = vperm.slane %v8090_v34, 1 }
 0x491   :  { %v2238_v30 = vpop.f32.mrf.mxu2  ;;  %v2287_v37 = vpop.f32.mrf.mxu3 }
 0x492   :  { %v2239_v53 = vadd.f32 %v2238_v30, %v7801_v9  ;;  %v2288_v46 = vadd.f32 %v2287_v37, %v7803_v27 }
 0x494   :  { %v2321_v38 = vmax.f32 %v2239_v53, 0.0  ;;  %v2322_v36 = vmax.f32 %v2288_v46, 0.0 }
 0x496   :  { %v8055_v55 = vpack.c.bf16 %v2321_v38, %v2319_v44  ;;  %v8057_v2 = vpack.c.bf16 %v2322_v36, %v2320_v58 }
 0x498   :  { %3101 = vmatmul.bf16.gmra.mxu0 %v8055_v55  ;;  %3150 = vmatmul.bf16.gmra.mxu1 %v8057_v2 }
 0x499   :  { %3199 = vmatmul.bf16.gmra.mxu2 %v8055_v55  ;;  %3248 = vmatmul.bf16.gmra.mxu3 %v8057_v2  ;;  %v2241_v35 = vpop.f32.mrf.mxu2  ;;  %v2290_v61 = vpop.f32.mrf.mxu3 }
 0x49a   :  { %v2242_v62 = vadd.f32 %v2241_v35, %v7801_v9  ;;  %v2291_v11 = vadd.f32 %v2290_v61, %v7803_v27 }
 0x49c   :  { %v2323_v3 = vmax.f32 %v2242_v62, 0.0  ;;  %v2324_v48 = vmax.f32 %v2291_v11, 0.0 }
 0x4a1   :  { %v2243_v21 = vpop.f32.mrf.mxu2  ;;  %v2292_v63 = vpop.f32.mrf.mxu3 }
 0x4a2   :  { %v2244_v54 = vadd.f32 %v2243_v21, %v7801_v9  ;;  %v2293_v14 = vadd.f32 %v2292_v63, %v7803_v27  ;;  %v5137_v27 = vor.u32 %v5566_v23, %v5136_v1  ;;  %v5080_v21 = vld [vmem:[%s8804_s11 + $0x128] sm:$0xf]  ;;  %v5552_v63 = vld [vmem:[%s8804_s11 + $0x140] sm:$0xf0] }
 0x4a4   :  { %v2325_v31 = vmax.f32 %v2244_v54, 0.0  ;;  %v2326_v18 = vmax.f32 %v2293_v14, 0.0  ;;  %3455 = vmatpush.bf16.msrb.mxu0 %v5137_v27  ;;  %v5304_v54 = vld [vmem:[%s8804_s11 + $0x2e8] sm:$0xf] }
 0x4a6   :  { %v8076_v24 = vpack.c.bf16 %v2325_v31, %v2323_v3  ;;  %v8078_v9 = vpack.c.bf16 %v2326_v18, %v2324_v48  ;;  %v5081_v48 = vor.u32 %v5552_v63, %v5080_v21  ;;  %v5608_v31 = vld [vmem:[%s8804_s11 + $0x300] sm:$0xf0]  ;;  %v5276_v21 = vld [vmem:[%s8804_s11 + $0x2b0] sm:$0xf]  ;;  %v5601_v63 = vld [vmem:[%s8804_s11 + $0x2c8] sm:$0xf0] }
 0x4a7   :  { %v5305_v1 = vor.u32 %v5608_v31, %v5304_v54 }
 0x4a8   :  { %3106 = vmatmul.bf16.gmra.mxu0 %v8076_v24  ;;  %3155 = vmatmul.bf16.gmra.mxu1 %v8078_v9 }
 0x4a9   :  { %3204 = vmatmul.bf16.gmra.mxu2 %v8076_v24  ;;  %3253 = vmatmul.bf16.gmra.mxu3 %v8078_v9 }
 0x4aa   :  { %3456 = vmatpush.bf16.msrb.mxu0 %v5109_v41  ;;  %3506 = vmatpush.bf16.msrb.mxu1 %v5305_v1 }
 0x4ae   :  { %3457 = vmatpush.bf16.msrb.mxu0 %v5081_v48 }
 0x4b5   :  { %v3072_v16 = vpop.f32.mrf.mxu0  ;;  %v3121_v25 = vpop.f32.mrf.mxu1 }
 0x4b6   :  { %v3073_v39 = vadd.f32 %v3072_v16, %v8093_v10 }
 0x4b8   :  { %v3122_v6 = vadd.f32 %v3121_v25, %v3073_v39  ;;  %3267 = vmatmul.bf16.vlgmr.msra.gmra.mxu0 %v7815_v56  ;;  %3316 = vmatmul.bf16.vlgmr.msra.gmra.mxu1 %v7817_v29 }
 0x4b9   :  { %3365 = vmatmul.bf16.vlgmr.msrb.gmra.mxu2 %v7815_v56  ;;  %3414 = vmatmul.bf16.vlgmr.msrb.gmra.mxu3 %v7817_v29 }
 0x4ba   :  { %v3749_v8 = vmul.f32 0.5, %v3122_v6 }
 0x4bc   :  { %v3170_v0 = vpop.f32.mrf.mxu2  ;;  %v3219_v30 = vpop.f32.mrf.mxu3  ;;  %5643 = vtanh.f32 %v3749_v8 }
 0x4bd   :  { %v3171_v37 = vadd.f32 %v3170_v0, %v8110_v4  ;;  %v3074_v44 = vpop.f32.mrf.mxu0  ;;  %v3123_v53 = vpop.f32.mrf.mxu1 }
 0x4be   :  { %v3075_v46 = vadd.f32 %v3074_v44, %v8093_v10 }
 0x4bf   :  { %v3220_v45 = vadd.f32 %v3219_v30, %v3171_v37 }
 0x4c0   :  { %v3124_v28 = vadd.f32 %v3123_v53, %v3075_v46 }
 0x4c1   :  { %v3750_v17 = vmul.f32 0.5, %v3220_v45 }
 0x4c2   :  { %v3756_v22 = vmul.f32 0.5, %v3124_v28  ;;  %v5644_v58 = vpop.eup %5643 }
 0x4c3   :  { %5645 = vtanh.f32 %v3750_v17  ;;  %v3973_v61 = vadd.f32 1.0, %v5644_v58 }
 0x4c4   :  { %v3172_v38 = vpop.f32.mrf.mxu2  ;;  %v3221_v36 = vpop.f32.mrf.mxu3  ;;  %5647 = vtanh.f32 %v3756_v22 }
 0x4c5   :  { %v3173_v51 = vadd.f32 %v3172_v38, %v8110_v4  ;;  %v3077_v42 = vpop.f32.mrf.mxu0  ;;  %v3126_v26 = vpop.f32.mrf.mxu1  ;;  %v4085_v5 = vmul.f32 0.5, %v3973_v61 }
 0x4c6   :  { %v3078_v35 = vadd.f32 %v3077_v42, %v8093_v10 }
 0x4c7   :  { %v3222_v62 = vadd.f32 %v3221_v36, %v3173_v51 }
 0x4c8   :  { %v3127_v11 = vadd.f32 %v3126_v26, %v3078_v35  ;;  %3272 = vmatmul.bf16.gmra.mxu0 %v7839_v12  ;;  %3321 = vmatmul.bf16.gmra.mxu1 %v7841_v60  ;;  %v5052_v26 = vld [vmem:[%s8804_s11 + $0xf0] sm:$0xf]  ;;  %v5545_v35 = vld [vmem:[%s8804_s11 + $0x108] sm:$0xf0] }
 0x4c9   :  { %v5646_v14 = vpop.eup %5645  ;;  %v3757_v3 = vmul.f32 0.5, %v3222_v62  ;;  %3370 = vmatmul.bf16.gmra.mxu2 %v7839_v12  ;;  %3419 = vmatmul.bf16.gmra.mxu3 %v7841_v60 }
 0x4ca   :  { %v3974_v18 = vadd.f32 1.0, %v5646_v14  ;;  %v3763_v23 = vmul.f32 0.5, %v3127_v11  ;;  %v5648_v16 = vpop.eup %5647  ;;  %v5053_v11 = vor.u32 %v5545_v35, %v5052_v26  ;;  %v5277_v14 = vor.u32 %v5601_v63, %v5276_v21  ;;  %v5248_v26 = vld [vmem:[%s8804_s11 + $0x278] sm:$0xf]  ;;  %v5594_v35 = vld [vmem:[%s8804_s11 + $0x290] sm:$0xf0] }
 0x4cb   :  { %5649 = vtanh.f32 %v3757_v3  ;;  %v3980_v41 = vadd.f32 1.0, %v5648_v16 }
 0x4cc   :  { %v4086_v27 = vmul.f32 0.5, %v3974_v18  ;;  %v3175_v13 = vpop.f32.mrf.mxu2  ;;  %v3224_v33 = vpop.f32.mrf.mxu3  ;;  %5651 = vtanh.f32 %v3763_v23  ;;  %3458 = vmatpush.bf16.msrb.mxu0 %v5053_v11  ;;  %3507 = vmatpush.bf16.msrb.mxu1 %v5277_v14 }
 0x4cd   :  { %v3176_v25 = vadd.f32 %v3175_v13, %v8110_v4  ;;  %v3079_v39 = vpop.f32.mrf.mxu0  ;;  %v3128_v6 = vpop.f32.mrf.mxu1  ;;  %v4092_v37 = vmul.f32 0.5, %v3980_v41 }
 0x4ce   :  { %v4197_v7 = vpack.c.bf16 %v4086_v27, %v4085_v5  ;;  %v3080_v50 = vadd.f32 %v3079_v39, %v8093_v10 }
 0x4cf   :  { %v3225_v52 = vadd.f32 %v3224_v33, %v3176_v25 }
 0x4d0   :  { %4261 = vst [vmem:[%s8807_s13] sm:$0xff] %v4197_v7  ;;  %v3129_v32 = vadd.f32 %v3128_v6, %v3080_v50 }
 0x4d1   :  { %v5650_v8 = vpop.eup %5649  ;;  %v3764_v15 = vmul.f32 0.5, %v3225_v52 }
 0x4d2   :  { %v3981_v0 = vadd.f32 1.0, %v5650_v8  ;;  %v3770_v30 = vmul.f32 0.5, %v3129_v32  ;;  %v5652_v45 = vpop.eup %5651 }
 0x4d3   :  { %5653 = vtanh.f32 %v3764_v15  ;;  %v3987_v51 = vadd.f32 1.0, %v5652_v45 }
 0x4d4   :  { %v4093_v44 = vmul.f32 0.5, %v3981_v0  ;;  %v3177_v53 = vpop.f32.mrf.mxu2  ;;  %v3226_v46 = vpop.f32.mrf.mxu3  ;;  %5655 = vtanh.f32 %v3770_v30 }
 0x4d5   :  { %v3178_v28 = vadd.f32 %v3177_v53, %v8110_v4  ;;  %v3082_v17 = vpop.f32.mrf.mxu0  ;;  %v3131_v22 = vpop.f32.mrf.mxu1  ;;  %v4099_v48 = vmul.f32 0.5, %v3987_v51 }
 0x4d6   :  { %v4201_v58 = vpack.c.bf16 %v4093_v44, %v4092_v37  ;;  %v3083_v38 = vadd.f32 %v3082_v17, %v8093_v10 }
 0x4d7   :  { %v3227_v36 = vadd.f32 %v3226_v46, %v3178_v28 }
 0x4d8   :  { %4266 = vst [vmem:[%s8807_s13 + $0x1c] sm:$0xff] %v4201_v58  ;;  %v3132_v42 = vadd.f32 %v3131_v22, %v3083_v38  ;;  %3277 = vmatmul.bf16.gmra.mxu0 %v7863_v47  ;;  %3326 = vmatmul.bf16.gmra.mxu1 %v7865_v43  ;;  %v5024_v58 = vld [vmem:[%s8804_s11 + $0xb8] sm:$0xf]  ;;  %v5538_v38 = vld [vmem:[%s8804_s11 + $0xd0] sm:$0xf0] }
 0x4d9   :  { %v5654_v61 = vpop.eup %5653  ;;  %v3771_v62 = vmul.f32 0.5, %v3227_v36  ;;  %3375 = vmatmul.bf16.gmra.mxu2 %v7863_v47  ;;  %3424 = vmatmul.bf16.gmra.mxu3 %v7865_v43 }
 0x4da   :  { %v3988_v54 = vadd.f32 1.0, %v5654_v61  ;;  %v3777_v3 = vmul.f32 0.5, %v3132_v42  ;;  %v5656_v23 = vpop.eup %5655  ;;  %v5025_v42 = vor.u32 %v5538_v38, %v5024_v58 }
 0x4db   :  { %5657 = vtanh.f32 %v3771_v62  ;;  %v3994_v39 = vadd.f32 1.0, %v5656_v23  ;;  %v5249_v62 = vor.u32 %v5594_v35, %v5248_v26  ;;  %v5587_v26 = vld [vmem:[%s8804_s11 + $0x258] sm:$0xf0] }
 0x4dc   :  { %v4100_v31 = vmul.f32 0.5, %v3988_v54  ;;  %v3180_v18 = vpop.f32.mrf.mxu2  ;;  %v3229_v1 = vpop.f32.mrf.mxu3  ;;  %5659 = vtanh.f32 %v3777_v3  ;;  %3459 = vmatpush.bf16.msrb.mxu0 %v5025_v42  ;;  %v5220_v42 = vld [vmem:[%s8804_s11 + $0x240] sm:$0xf] }
 0x4dd   :  { %v3181_v5 = vadd.f32 %v3180_v18, %v8110_v4  ;;  %v3084_v27 = vpop.f32.mrf.mxu0  ;;  %v3133_v13 = vpop.f32.mrf.mxu1  ;;  %v4106_v32 = vmul.f32 0.5, %v3994_v39  ;;  %3508 = vmatpush.bf16.msrb.mxu1 %v5249_v62  ;;  %v5362_v62 = vld [vmem:[%s8804_s11 + $0x374] sm:$0xf0] }
 0x4de   :  { %v4205_v33 = vpack.c.bf16 %v4100_v31, %v4099_v48  ;;  %v3085_v16 = vadd.f32 %v3084_v27, %v8093_v10 }
 0x4df   :  { %v3230_v25 = vadd.f32 %v3229_v1, %v3181_v5 }
 0x4e0   :  { %4270 = vst [vmem:[%s8807_s13 + $0x38] sm:$0xff] %v4205_v33  ;;  %v3134_v6 = vadd.f32 %v3133_v13, %v3085_v16 }
 0x4e1   :  { %v5658_v7 = vpop.eup %5657  ;;  %v3778_v50 = vmul.f32 0.5, %v3230_v25 }
 0x4e2   :  { %v3995_v52 = vadd.f32 1.0, %v5658_v7  ;;  %v3784_v41 = vmul.f32 0.5, %v3134_v6  ;;  %v5660_v30 = vpop.eup %5659 }
 0x4e3   :  { %5661 = vtanh.f32 %v3778_v50  ;;  %v4001_v17 = vadd.f32 1.0, %v5660_v30 }
 0x4e4   :  { %v4107_v8 = vmul.f32 0.5, %v3995_v52  ;;  %v3182_v15 = vpop.f32.mrf.mxu2  ;;  %v3231_v0 = vpop.f32.mrf.mxu3  ;;  %5663 = vtanh.f32 %v3784_v41 }
 0x4e5   :  { %v3183_v37 = vadd.f32 %v3182_v15, %v8110_v4  ;;  %v3087_v44 = vpop.f32.mrf.mxu0  ;;  %v3136_v53 = vpop.f32.mrf.mxu1  ;;  %v4113_v21 = vmul.f32 0.5, %v4001_v17  ;;  %v4996_v17 = vld [vmem:[%s8804_s11 + $0x80] sm:$0xf] }
 0x4e6   :  { %v4209_v46 = vpack.c.bf16 %v4107_v8, %v4106_v32  ;;  %v3088_v45 = vadd.f32 %v3087_v44, %v8093_v10  ;;  %v5563_v44 = vld [vmem:[%s8804_s11 + $0x19c] sm:$0xf] }
 0x4e7   :  { %v3232_v28 = vadd.f32 %v3231_v0, %v3183_v37 }
 0x4e8   :  { %4274 = vst [vmem:[%s8807_s13 + $0x54] sm:$0xff] %v4209_v46  ;;  %v3137_v22 = vadd.f32 %v3136_v53, %v3088_v45  ;;  %3282 = vmatmul.bf16.gmra.mxu0 %v7887_v49  ;;  %3331 = vmatmul.bf16.gmra.mxu1 %v7889_v19  ;;  %v5138_v53 = vld [vmem:[%s8804_s11 + $0x1b4] sm:$0xf0]  ;;  %v5619_v46 = vld [vmem:[%s8804_s11 + $0x35c] sm:$0xf] }
 0x4e9   :  { %v5662_v36 = vpop.eup %5661  ;;  %v3785_v51 = vmul.f32 0.5, %v3232_v28  ;;  %3380 = vmatmul.bf16.gmra.mxu2 %v7887_v49  ;;  %3429 = vmatmul.bf16.gmra.mxu3 %v7889_v19  ;;  %v5141_v58 = vor.u32 %v5563_v44, %v5138_v53 }
 0x4ea   :  { %v4002_v61 = vadd.f32 1.0, %v5662_v36  ;;  %v3791_v11 = vmul.f32 0.5, %v3137_v22  ;;  %v5664_v3 = vpop.eup %5663  ;;  %v5531_v22 = vld [vmem:[%s8804_s11 + $0x98] sm:$0xf0] }
 0x4eb   :  { %5665 = vtanh.f32 %v3785_v51  ;;  %v4008_v27 = vadd.f32 1.0, %v5664_v3  ;;  %v4997_v51 = vor.u32 %v5531_v22, %v4996_v17  ;;  %3553 = vmatpush.bf16.msra.mxu2 %v5141_v58 }
 0x4ec   :  { %v4114_v63 = vmul.f32 0.5, %v4002_v61  ;;  %v3185_v54 = vpop.f32.mrf.mxu2  ;;  %v3234_v14 = vpop.f32.mrf.mxu3  ;;  %5667 = vtanh.f32 %v3791_v11  ;;  %v5221_v61 = vor.u32 %v5587_v26, %v5220_v42 }
 0x4ed   :  { %v3186_v48 = vadd.f32 %v3185_v54, %v8110_v4  ;;  %v3089_v31 = vpop.f32.mrf.mxu0  ;;  %v3138_v18 = vpop.f32.mrf.mxu1  ;;  %v4120_v6 = vmul.f32 0.5, %v4008_v27  ;;  %3460 = vmatpush.bf16.msrb.mxu0 %v4997_v51  ;;  %v5110_v54 = vld [vmem:[%s8804_s11 + $0x17c] sm:$0xf0]  ;;  %v5278_v51 = vld [vmem:[%s8804_s11 + $0x2cc] sm:$0xf0] }
 0x4ee   :  { %v4213_v1 = vpack.c.bf16 %v4114_v63, %v4113_v21  ;;  %v3090_v23 = vadd.f32 %v3089_v31, %v8093_v10  ;;  %v5365_v21 = vor.u32 %v5619_v46, %v5362_v62  ;;  %v5556_v63 = vld [vmem:[%s8804_s11 + $0x164] sm:$0xf]  ;;  %3509 = vmatpush.bf16.msrb.mxu1 %v5221_v61  ;;  %v5542_v46 = vld [vmem:[%s8804_s11 + $0xf4] sm:$0xf] }
 0x4ef   :  { %v3235_v5 = vadd.f32 %v3234_v14, %v3186_v48 }
 0x4f0   :  { %4278 = vst [vmem:[%s8807_s13 + $0x70] sm:$0xff] %v4213_v1  ;;  %v3139_v13 = vadd.f32 %v3138_v18, %v3090_v23  ;;  %v5113_v18 = vor.u32 %v5556_v63, %v5110_v54  ;;  %v5612_v1 = vld [vmem:[%s8804_s11 + $0x324] sm:$0xf]  ;;  %v5334_v23 = vld [vmem:[%s8804_s11 + $0x33c] sm:$0xf0]  ;;  %3602 = vmatpush.bf16.msra.mxu3 %v5365_v21 }
 0x4f1   :  { %v5666_v33 = vpop.eup %5665  ;;  %v3792_v16 = vmul.f32 0.5, %v3235_v5  ;;  %v5535_v54 = vld [vmem:[%s8804_s11 + $0xbc] sm:$0xf] }
 0x4f2   :  { %v4009_v25 = vadd.f32 1.0, %v5666_v33  ;;  %v3798_v39 = vmul.f32 0.5, %v3139_v13  ;;  %v5668_v41 = vpop.eup %5667  ;;  %3554 = vmatpush.bf16.msra.mxu2 %v5113_v18  ;;  %v4968_v18 = vld [vmem:[%s8804_s11 + $0x48] sm:$0xf] }
 0x4f3   :  { %5669 = vtanh.f32 %v3792_v16  ;;  %v4015_v45 = vadd.f32 1.0, %v5668_v41  ;;  %v5337_v16 = vor.u32 %v5612_v1, %v5334_v23  ;;  %v5524_v1 = vld [vmem:[%s8804_s11 + $0x60] sm:$0xf0] }
 0x4f4   :  { %v4121_v7 = vmul.f32 0.5, %v4009_v25  ;;  %v3187_v50 = vpop.f32.mrf.mxu2  ;;  %v3236_v52 = vpop.f32.mrf.mxu3  ;;  %5671 = vtanh.f32 %v3798_v39 }
 0x4f5   :  { %v3188_v32 = vadd.f32 %v3187_v50, %v8110_v4  ;;  %v3092_v8 = vpop.f32.mrf.mxu0  ;;  %v3141_v15 = vpop.f32.mrf.mxu1  ;;  %v4127_v14 = vmul.f32 0.5, %v4015_v45  ;;  %v5082_v50 = vld [vmem:[%s8804_s11 + $0x144] sm:$0xf0]  ;;  %3603 = vmatpush.bf16.msra.mxu3 %v5337_v16  ;;  %v5054_v45 = vld [vmem:[%s8804_s11 + $0x10c] sm:$0xf0] }
 0x4f6   :  { %v4217_v0 = vpack.c.bf16 %v4121_v7, %v4120_v6  ;;  %v3093_v30 = vadd.f32 %v3092_v8, %v8093_v10  ;;  %v5549_v7 = vld [vmem:[%s8804_s11 + $0x12c] sm:$0xf]  ;;  %v5580_v16 = vld [vmem:[%s8804_s11 + $0x220] sm:$0xf0] }
 0x4f7   :  { %v3237_v37 = vadd.f32 %v3236_v52, %v3188_v32  ;;  %v5605_v52 = vld [vmem:[%s8804_s11 + $0x2ec] sm:$0xf]  ;;  %v5085_v8 = vor.u32 %v5549_v7, %v5082_v50 }
 0x4f8   :  { %4282 = vst [vmem:[%s8807_s13 + $0x8c] sm:$0xff] %v4217_v0  ;;  %v3142_v28 = vadd.f32 %v3141_v15, %v3093_v30  ;;  %3287 = vmatmul.bf16.gmra.mxu0 %v7911_v20  ;;  %3336 = vmatmul.bf16.gmra.mxu1 %v7913_v57  ;;  %v5306_v15 = vld [vmem:[%s8804_s11 + $0x304] sm:$0xf0] }
 0x4f9   :  { %v5670_v38 = vpop.eup %5669  ;;  %v3799_v36 = vmul.f32 0.5, %v3237_v37  ;;  %3385 = vmatmul.bf16.gmra.mxu2 %v7911_v20  ;;  %3434 = vmatmul.bf16.gmra.mxu3 %v7913_v57  ;;  %v5309_v37 = vor.u32 %v5605_v52, %v5306_v15  ;;  %v5528_v52 = vld [vmem:[%s8804_s11 + $0x84] sm:$0xf] }
 0x4fa   :  { %v4016_v35 = vadd.f32 1.0, %v5670_v38  ;;  %v3805_v11 = vmul.f32 0.5, %v3142_v28  ;;  %v5672_v5 = vpop.eup %5671  ;;  %3555 = vmatpush.bf16.msra.mxu2 %v5085_v8  ;;  %v5057_v38 = vor.u32 %v5542_v46, %v5054_v45 }
 0x4fb   :  { %5673 = vtanh.f32 %v3799_v36  ;;  %v4022_v41 = vadd.f32 1.0, %v5672_v5  ;;  %v5598_v36 = vld [vmem:[%s8804_s11 + $0x2b4] sm:$0xf]  ;;  %3604 = vmatpush.bf16.msra.mxu3 %v5309_v37  ;;  %v5584_v37 = vld [vmem:[%s8804_s11 + $0x244] sm:$0xf] }
 0x4fc   :  { %v4128_v3 = vmul.f32 0.5, %v4016_v35  ;;  %v3190_v48 = vpop.f32.mrf.mxu2  ;;  %v3239_v31 = vpop.f32.mrf.mxu3  ;;  %5675 = vtanh.f32 %v3805_v11  ;;  %v5281_v21 = vor.u32 %v5598_v36, %v5278_v51  ;;  %v5521_v36 = vld [vmem:[%s8804_s11 + $0x4c] sm:$0xf]  ;;  %v4970_v51 = vld [vmem:[%s8804_s11 + $0x64] sm:$0xf0] }
 0x4fd   :  { %v3191_v27 = vadd.f32 %v3190_v48, %v8110_v4  ;;  %v3094_v13 = vpop.f32.mrf.mxu0  ;;  %v3143_v33 = vpop.f32.mrf.mxu1  ;;  %v4134_v28 = vmul.f32 0.5, %v4022_v41  ;;  %v4998_v41 = vld [vmem:[%s8804_s11 + $0x9c] sm:$0xf0] }
 0x4fe   :  { %v4221_v25 = vpack.c.bf16 %v4128_v3, %v4127_v14  ;;  %v3095_v39 = vadd.f32 %v3094_v13, %v8093_v10  ;;  %3556 = vmatpush.bf16.msra.mxu2 %v5057_v38  ;;  %v5026_v14 = vld [vmem:[%s8804_s11 + $0xd4] sm:$0xf0]  ;;  %v5591_v3 = vld [vmem:[%s8804_s11 + $0x27c] sm:$0xf]  ;;  %v4969_v13 = vor.u32 %v5524_v1, %v4968_v18 }
 0x4ff   :  { %v3240_v6 = vadd.f32 %v3239_v31, %v3191_v27  ;;  %v5029_v23 = vor.u32 %v5535_v54, %v5026_v14  ;;  %3605 = vmatpush.bf16.msra.mxu3 %v5281_v21 }
 0x500   :  { %4286 = vst [vmem:[%s8807_s13 + $0xa8] sm:$0xff] %v4221_v25  ;;  %v3144_v32 = vadd.f32 %v3143_v33, %v3095_v39  ;;  %v5192_v33 = vld [vmem:[%s8804_s11 + $0x208] sm:$0xf]  ;;  %3461 = vmatpush.bf16.msrb.mxu0 %v4969_v13  ;;  %v5573_v13 = vld [vmem:[%s8804_s11 + $0x1e8] sm:$0xf0] }
 0x501   :  { %v5674_v0 = vpop.eup %5673  ;;  %v3806_v30 = vmul.f32 0.5, %v3240_v6  ;;  %v5193_v39 = vor.u32 %v5580_v16, %v5192_v33  ;;  %v5250_v6 = vld [vmem:[%s8804_s11 + $0x294] sm:$0xf0] }
 0x502   :  { %v4023_v44 = vadd.f32 1.0, %v5674_v0  ;;  %v3812_v53 = vmul.f32 0.5, %v3144_v32  ;;  %v5676_v42 = vpop.eup %5675  ;;  %3557 = vmatpush.bf16.msra.mxu2 %v5029_v23  ;;  %v5253_v50 = vor.u32 %v5591_v3, %v5250_v6  ;;  %v4940_v3 = vld [vmem:[%s8804_s11 + $0x10] sm:$0xf] }
 0x503   :  { %5677 = vtanh.f32 %v3806_v30  ;;  %v4029_v48 = vadd.f32 1.0, %v5676_v42  ;;  %3510 = vmatpush.bf16.msrb.mxu1 %v5193_v39  ;;  %v5001_v30 = vor.u32 %v5528_v52, %v4998_v41  ;;  %v5577_v42 = vld [vmem:[%s8804_s11 + $0x20c] sm:$0xf] }
 0x504   :  { %v4135_v17 = vmul.f32 0.5, %v4023_v44  ;;  %v3192_v22 = vpop.f32.mrf.mxu2  ;;  %v3241_v58 = vpop.f32.mrf.mxu3  ;;  %5679 = vtanh.f32 %v3812_v53  ;;  %v5222_v44 = vld [vmem:[%s8804_s11 + $0x25c] sm:$0xf0]  ;;  %3606 = vmatpush.bf16.msra.mxu3 %v5253_v50  ;;  %v4942_v50 = vld [vmem:[%s8804_s11 + $0x2c] sm:$0xf0] }
 0x505   :  { %v3193_v26 = vadd.f32 %v3192_v22, %v8110_v4  ;;  %v3097_v35 = vpop.f32.mrf.mxu0  ;;  %v3146_v61 = vpop.f32.mrf.mxu1  ;;  %v4141_v32 = vmul.f32 0.5, %v4029_v48  ;;  %v5517_v48 = vld [vmem:[%s8804_s11 + $0x28] sm:$0xf0] }
 0x506   :  { %v4225_v62 = vpack.c.bf16 %v4135_v17, %v4134_v28  ;;  %v3098_v11 = vadd.f32 %v3097_v35, %v8093_v10  ;;  %3558 = vmatpush.bf16.msra.mxu2 %v5001_v30 }
 0x507   :  { %v3242_v63 = vadd.f32 %v3241_v58, %v3193_v26  ;;  %v5225_v58 = vor.u32 %v5584_v37, %v5222_v44 }
 0x508   :  { %4290 = vst [vmem:[%s8807_s13 + $0xc4] sm:$0xff] %v4225_v62  ;;  %v3147_v31 = vadd.f32 %v3146_v61, %v3098_v11  ;;  %3292 = vmatmul.bf16.gmra.mxu0 %v7983_v59  ;;  %3341 = vmatmul.bf16.gmra.mxu1 %v7985_v40  ;;  %v4973_v61 = vor.u32 %v5521_v36, %v4970_v51  ;;  %v5194_v62 = vld [vmem:[%s8804_s11 + $0x224] sm:$0xf0] }
 0x509   :  { %v5678_v5 = vpop.eup %5677  ;;  %v3813_v27 = vmul.f32 0.5, %v3242_v63  ;;  %3390 = vmatmul.bf16.gmra.mxu2 %v7983_v59  ;;  %3439 = vmatmul.bf16.gmra.mxu3 %v7985_v40  ;;  %v5197_v54 = vor.u32 %v5577_v42, %v5194_v62 }
 0x50a   :  { %v4030_v25 = vadd.f32 1.0, %v5678_v5  ;;  %v3819_v7 = vmul.f32 0.5, %v3147_v31  ;;  %v5680_v53 = vpop.eup %5679  ;;  %3607 = vmatpush.bf16.msra.mxu3 %v5225_v58  ;;  %3559 = vmatpush.bf16.msra.mxu2 %v4973_v61  ;;  %v4941_v5 = vor.u32 %v5517_v48, %v4940_v3 }
 0x50b   :  { %5681 = vtanh.f32 %v3813_v27  ;;  %v4036_v26 = vadd.f32 1.0, %v5680_v53  ;;  %v5164_v27 = vld [vmem:[%s8804_s11 + $0x1d0] sm:$0xf] }
 0x50c   :  { %v4142_v8 = vmul.f32 0.5, %v4030_v25  ;;  %v3195_v15 = vpop.f32.mrf.mxu2  ;;  %v3244_v0 = vpop.f32.mrf.mxu3  ;;  %5683 = vtanh.f32 %v3819_v7  ;;  %v5165_v6 = vor.u32 %v5573_v13, %v5164_v27  ;;  %v5514_v7 = vld [vmem:[%s8804_s11 + $0x14] sm:$0xf]  ;;  %3462 = vmatpush.bf16.msrb.mxu0 %v4941_v5 }
 0x50d   :  { %v3196_v46 = vadd.f32 %v3195_v15, %v8110_v4  ;;  %v3099_v45 = vpop.f32.mrf.mxu0  ;;  %v3148_v28 = vpop.f32.mrf.mxu1  ;;  %v4148_v31 = vmul.f32 0.5, %v4036_v26  ;;  %v5166_v15 = vld [vmem:[%s8804_s11 + $0x1ec] sm:$0xf0] }
 0x50e   :  { %v4229_v17 = vpack.c.bf16 %v4142_v8, %v4141_v32  ;;  %v3100_v22 = vadd.f32 %v3099_v45, %v8093_v10  ;;  %3608 = vmatpush.bf16.msra.mxu3 %v5197_v54  ;;  %v4945_v32 = vor.u32 %v5514_v7, %v4942_v50  ;;  %v5570_v8 = vld [vmem:[%s8804_s11 + $0x1d4] sm:$0xf]  ;;  %3511 = vmatpush.bf16.msrb.mxu1 %v5165_v6  ;;  %v5144_v7 = vld [vmem:[%s8804_s11 + $0x1a0] sm:$0xf]  ;;  %v5567_v50 = vld [vmem:[%s8804_s11 + $0x1b8] sm:$0xf0] }
 0x50f   :  { %v3245_v38 = vadd.f32 %v3244_v0, %v3196_v46  ;;  %v5169_v30 = vor.u32 %v5570_v8, %v5166_v15  ;;  %v5368_v8 = vld [vmem:[%s8804_s11 + $0x360] sm:$0xf]  ;;  %v5623_v15 = vld [vmem:[%s8804_s11 + $0x378] sm:$0xf0] }
 0x510   :  { %4294 = vst [vmem:[%s8807_s13 + $0xe0] sm:$0xff] %v4229_v17  ;;  %v3149_v35 = vadd.f32 %v3148_v28, %v3100_v22  ;;  %3560 = vmatpush.bf16.msra.mxu2 %v4945_v32  ;;  %v5145_v32 = vor.u32 %v5567_v50, %v5144_v7  ;;  %v5340_v7 = vld [vmem:[%s8804_s11 + $0x328] sm:$0xf]  ;;  %v5616_v50 = vld [vmem:[%s8804_s11 + $0x340] sm:$0xf0] }
 0x511   :  { %v5682_v11 = vpop.eup %5681  ;;  %v3820_v21 = vmul.f32 0.5, %v3245_v38 }
 0x512   :  { %v4037_v63 = vadd.f32 1.0, %v5682_v11  ;;  %v3826_v14 = vmul.f32 0.5, %v3149_v35  ;;  %v5684_v33 = vpop.eup %5683  ;;  %3609 = vmatpush.bf16.msra.mxu3 %v5169_v30  ;;  %v5369_v30 = vor.u32 %v5623_v15, %v5368_v8  ;;  %3651 = vmatpush.bf16.msra.mxu0 %v5145_v32 }
 0x513   :  { %5685 = vtanh.f32 %v3820_v21  ;;  %v4043_v37 = vadd.f32 1.0, %v5684_v33 }
 0x514   :  { %v4149_v18 = vmul.f32 0.5, %v4037_v63  ;;  %v3197_v1 = vpop.f32.mrf.mxu2  ;;  %v3246_v23 = vpop.f32.mrf.mxu3  ;;  %5687 = vtanh.f32 %v3826_v14  ;;  %3700 = vmatpush.bf16.msra.mxu1 %v5369_v30 }
 0x515   :  { %v3198_v16 = vadd.f32 %v3197_v1, %v8110_v4  ;;  %v3102_v25 = vpop.f32.mrf.mxu0  ;;  %v3151_v39 = vpop.f32.mrf.mxu1  ;;  %v4155_v17 = vmul.f32 0.5, %v4043_v37 }
 0x516   :  { %v4233_v52 = vpack.c.bf16 %v4149_v18, %v4148_v31  ;;  %v3103_v41 = vadd.f32 %v3102_v25, %v8093_v10 }
 0x517   :  { %v3247_v0 = vadd.f32 %v3246_v23, %v3198_v16 }
 0x518   :  { %4298 = vst [vmem:[%s8807_s13 + $0xfc] sm:$0xff] %v4233_v52  ;;  %v3152_v44 = vadd.f32 %v3151_v39, %v3103_v41  ;;  %3297 = vmatmul.bf16.gmra.mxu0 %v8055_v55  ;;  %3346 = vmatmul.bf16.gmra.mxu1 %v8057_v2 }
 0x519   :  { %v5686_v53 = vpop.eup %5685  ;;  %v3827_v46 = vmul.f32 0.5, %v3247_v0  ;;  %3395 = vmatmul.bf16.gmra.mxu2 %v8055_v55  ;;  %3444 = vmatmul.bf16.gmra.mxu3 %v8057_v2 }
 0x51a   :  { %v4044_v45 = vadd.f32 1.0, %v5686_v53  ;;  %v3833_v28 = vmul.f32 0.5, %v3152_v44  ;;  %v5688_v36 = vpop.eup %5687 }
 0x51b   :  { %5689 = vtanh.f32 %v3827_v46  ;;  %v4050_v11 = vadd.f32 1.0, %v5688_v36 }
 0x51c   :  { %v4156_v22 = vmul.f32 0.5, %v4044_v45  ;;  %v3200_v58 = vpop.f32.mrf.mxu2  ;;  %v3249_v38 = vpop.f32.mrf.mxu3  ;;  %5691 = vtanh.f32 %v3833_v28 }
 0x51d   :  { %v3201_v51 = vadd.f32 %v3200_v58, %v8110_v4  ;;  %v3104_v42 = vpop.f32.mrf.mxu0  ;;  %v3153_v26 = vpop.f32.mrf.mxu1  ;;  %v4162_v48 = vmul.f32 0.5, %v4050_v11  ;;  %v8393_v11 = vperm.slane %v8090_v34, 2 }
 0x51e   :  { %v4237_v35 = vpack.c.bf16 %v4156_v22, %v4155_v17  ;;  %v3105_v61 = vadd.f32 %v3104_v42, %v8093_v10 }
 0x51f   :  { %v3250_v62 = vadd.f32 %v3249_v38, %v3201_v51 }
 0x520   :  { %4302 = vst [vmem:[%s8807_s13 + $0x118] sm:$0xff] %v4237_v35  ;;  %v3154_v21 = vadd.f32 %v3153_v26, %v3105_v61 }
 0x521   :  { %v5690_v63 = vpop.eup %5689  ;;  %v3834_v54 = vmul.f32 0.5, %v3250_v62 }
 0x522   :  { %v4051_v14 = vadd.f32 1.0, %v5690_v63  ;;  %v3840_v3 = vmul.f32 0.5, %v3154_v21  ;;  %v5692_v23 = vpop.eup %5691 }
 0x523   :  { %5693 = vtanh.f32 %v3834_v54  ;;  %v4057_v39 = vadd.f32 1.0, %v5692_v23 }
 0x524   :  { %v4163_v31 = vmul.f32 0.5, %v4051_v14  ;;  %v3202_v18 = vpop.f32.mrf.mxu2  ;;  %v3251_v1 = vpop.f32.mrf.mxu3  ;;  %5695 = vtanh.f32 %v3840_v3 }
 0x525   :  { %v3203_v5 = vadd.f32 %v3202_v18, %v8110_v4  ;;  %v3107_v27 = vpop.f32.mrf.mxu0  ;;  %v3156_v13 = vpop.f32.mrf.mxu1  ;;  %v4169_v44 = vmul.f32 0.5, %v4057_v39  ;;  %v8411_v39 = vperm.slane %v8090_v34, 3 }
 0x526   :  { %v4241_v33 = vpack.c.bf16 %v4163_v31, %v4162_v48  ;;  %v3108_v16 = vadd.f32 %v3107_v27, %v8093_v10 }
 0x527   :  { %v3252_v25 = vadd.f32 %v3251_v1, %v3203_v5 }
 0x528   :  { %4306 = vst [vmem:[%s8807_s13 + $0x134] sm:$0xff] %v4241_v33  ;;  %v3157_v6 = vadd.f32 %v3156_v13, %v3108_v16  ;;  %3302 = vmatmul.bf16.gmra.mxu0 %v8076_v24  ;;  %3351 = vmatmul.bf16.gmra.mxu1 %v8078_v9  ;;  %v5560_v33 = vld [vmem:[%s8804_s11 + $0x180] sm:$0xf0] }
 0x529   :  { %v5694_v52 = vpop.eup %5693  ;;  %v3841_v41 = vmul.f32 0.5, %v3252_v25  ;;  %3400 = vmatmul.bf16.gmra.mxu2 %v8076_v24  ;;  %3449 = vmatmul.bf16.gmra.mxu3 %v8078_v9 }
 0x52a   :  { %v4058_v0 = vadd.f32 1.0, %v5694_v52  ;;  %v3847_v37 = vmul.f32 0.5, %v3157_v6  ;;  %v5696_v28 = vpop.eup %5695 }
 0x52b   :  { %5697 = vtanh.f32 %v3841_v41  ;;  %v4064_v42 = vadd.f32 1.0, %v5696_v28  ;;  %v5341_v41 = vor.u32 %v5616_v50, %v5340_v7 }
 0x52c   :  { %v4170_v53 = vmul.f32 0.5, %v4058_v0  ;;  %v3205_v46 = vpop.f32.mrf.mxu2  ;;  %v3254_v45 = vpop.f32.mrf.mxu3  ;;  %5699 = vtanh.f32 %v3847_v37 }
 0x52d   :  { %v3206_v17 = vadd.f32 %v3205_v46, %v8110_v4  ;;  %v3109_v22 = vpop.f32.mrf.mxu0  ;;  %v3158_v58 = vpop.f32.mrf.mxu1  ;;  %v4176_v63 = vmul.f32 0.5, %v4064_v42  ;;  %3701 = vmatpush.bf16.msra.mxu1 %v5341_v41 }
 0x52e   :  { %v4245_v38 = vpack.c.bf16 %v4170_v53, %v4169_v44  ;;  %v3110_v36 = vadd.f32 %v3109_v22, %v8093_v10 }
 0x52f   :  { %v3255_v51 = vadd.f32 %v3254_v45, %v3206_v17 }
 0x530   :  { %4310 = vst [vmem:[%s8807_s13 + $0x150] sm:$0xff] %v4245_v38  ;;  %v3159_v26 = vadd.f32 %v3158_v58, %v3110_v36 }
 0x531   :  { %v5698_v35 = vpop.eup %5697  ;;  %v3848_v61 = vmul.f32 0.5, %v3255_v51 }
 0x532   :  { %v4065_v62 = vadd.f32 1.0, %v5698_v35  ;;  %v3854_v21 = vmul.f32 0.5, %v3159_v26  ;;  %v5700_v3 = vpop.eup %5699 }
 0x533   :  { %5701 = vtanh.f32 %v3848_v61  ;;  %v4071_v27 = vadd.f32 1.0, %v5700_v3 }
 0x534   :  { %v4177_v54 = vmul.f32 0.5, %v4065_v62  ;;  %v3207_v14 = vpop.f32.mrf.mxu2  ;;  %v3256_v10 = vpop.f32.mrf.mxu3  ;;  %5703 = vtanh.f32 %v3854_v21 }
 0x535   :  { %v3208_v48 = vadd.f32 %v3207_v14, %v8110_v4  ;;  %v3268_v31 = vpop.f32.mrf.mxu0  ;;  %v3317_v18 = vpop.f32.mrf.mxu1  ;;  %v5116_v4 = vld [vmem:[%s8804_s11 + $0x168] sm:$0xf]  ;;  %v4183_v8 = vmul.f32 0.5, %v4071_v27 }
 0x536   :  { %v4249_v1 = vpack.c.bf16 %v4177_v54, %v4176_v63  ;;  %v3269_v23 = vadd.f32 %v3268_v31, %v8393_v11  ;;  %v5117_v6 = vor.u32 %v5560_v33, %v5116_v4  ;;  %v5609_v4 = vld [vmem:[%s8804_s11 + $0x308] sm:$0xf0] }
 0x537   :  { %v3257_v5 = vadd.f32 %v3256_v10, %v3208_v48 }
 0x538   :  { %4314 = vst [vmem:[%s8807_s13 + $0x16c] sm:$0xff] %v4249_v1  ;;  %v3318_v13 = vadd.f32 %v3317_v18, %v3269_v23  ;;  %3463 = vmatmul.bf16.vlgmr.msrb.gmra.mxu0 %v7815_v56  ;;  %3512 = vmatmul.bf16.vlgmr.msrb.gmra.mxu1 %v7817_v29  ;;  %v5088_v18 = vld [vmem:[%s8804_s11 + $0x130] sm:$0xf]  ;;  %v5553_v1 = vld [vmem:[%s8804_s11 + $0x148] sm:$0xf0] }
 0x539   :  { %v5702_v16 = vpop.eup %5701  ;;  %v3855_v25 = vmul.f32 0.5, %v3257_v5  ;;  %3561 = vmatmul.bf16.vlgmr.msra.gmra.mxu2 %v7815_v56  ;;  %3610 = vmatmul.bf16.vlgmr.msra.gmra.mxu3 %v7817_v29  ;;  %v5089_v27 = vor.u32 %v5553_v1, %v5088_v18  ;;  %v5602_v18 = vld [vmem:[%s8804_s11 + $0x2d0] sm:$0xf0] }
 0x53a   :  { %v4072_v52 = vadd.f32 1.0, %v5702_v16  ;;  %v3751_v32 = vmul.f32 0.5, %v3318_v13  ;;  %3652 = vmatpush.bf16.msra.mxu0 %v5117_v6  ;;  %v5704_v34 = vpop.eup %5703  ;;  %v5312_v13 = vld [vmem:[%s8804_s11 + $0x2f0] sm:$0xf] }
 0x53b   :  { %5705 = vtanh.f32 %v3855_v25  ;;  %v4078_v17 = vadd.f32 1.0, %v5704_v34  ;;  %v5313_v16 = vor.u32 %v5609_v4, %v5312_v13 }
 0x53c   :  { %v4184_v15 = vmul.f32 0.5, %v4072_v52  ;;  %v3366_v0 = vpop.f32.mrf.mxu2  ;;  %v3415_v30 = vpop.f32.mrf.mxu3  ;;  %5707 = vtanh.f32 %v3751_v32 }
 0x53d   :  { %v3367_v37 = vadd.f32 %v3366_v0, %v8411_v39  ;;  %v3270_v44 = vpop.f32.mrf.mxu0  ;;  %v3319_v53 = vpop.f32.mrf.mxu1  ;;  %v4190_v42 = vmul.f32 0.5, %v4078_v17  ;;  %3702 = vmatpush.bf16.msra.mxu1 %v5313_v16 }
 0x53e   :  { %v4253_v46 = vpack.c.bf16 %v4184_v15, %v4183_v8  ;;  %v3271_v45 = vadd.f32 %v3270_v44, %v8393_v11  ;;  %3653 = vmatpush.bf16.msra.mxu0 %v5089_v27 }
 0x53f   :  { %v3416_v28 = vadd.f32 %v3415_v30, %v3367_v37 }
 0x540   :  { %4318 = vst [vmem:[%s8807_s13 + $0x188] sm:$0xff] %v4253_v46  ;;  %v3320_v22 = vadd.f32 %v3319_v53, %v3271_v45 }
 0x541   :  { %v5706_v58 = vpop.eup %5705  ;;  %v3752_v38 = vmul.f32 0.5, %v3416_v28 }
 0x542   :  { %v4079_v36 = vadd.f32 1.0, %v5706_v58  ;;  %v3758_v51 = vmul.f32 0.5, %v3320_v22  ;;  %v5708_v62 = vpop.eup %5707 }
 0x543   :  { %5709 = vtanh.f32 %v3752_v38  ;;  %v3975_v48 = vadd.f32 1.0, %v5708_v62 }
 0x544   :  { %v4191_v26 = vmul.f32 0.5, %v4079_v36  ;;  %v3368_v35 = vpop.f32.mrf.mxu2  ;;  %v3417_v61 = vpop.f32.mrf.mxu3  ;;  %5711 = vtanh.f32 %v3758_v51 }
 0x545   :  { %v3369_v21 = vadd.f32 %v3368_v35, %v8411_v39  ;;  %v3273_v63 = vpop.f32.mrf.mxu0  ;;  %v3322_v54 = vpop.f32.mrf.mxu1  ;;  %v4087_v6 = vmul.f32 0.5, %v3975_v48 }
 0x546   :  { %v4257_v14 = vpack.c.bf16 %v4191_v26, %v4190_v42  ;;  %v3274_v10 = vadd.f32 %v3273_v63, %v8393_v11 }
 0x547   :  { %v3418_v3 = vadd.f32 %v3417_v61, %v3369_v21 }
 0x548   :  { %4322 = vst [vmem:[%s8807_s13 + $0x1a4] sm:$0xff] %v4257_v14  ;;  %v3323_v31 = vadd.f32 %v3322_v54, %v3274_v10  ;;  %3468 = vmatmul.bf16.gmra.mxu0 %v7839_v12  ;;  %3517 = vmatmul.bf16.gmra.mxu1 %v7841_v60  ;;  %v5060_v54 = vld [vmem:[%s8804_s11 + $0xf8] sm:$0xf]  ;;  %v5546_v14 = vld [vmem:[%s8804_s11 + $0x110] sm:$0xf0] }
 0x549   :  { %v5710_v23 = vpop.eup %5709  ;;  %v3759_v5 = vmul.f32 0.5, %v3418_v3  ;;  %3566 = vmatmul.bf16.gmra.mxu2 %v7839_v12  ;;  %3615 = vmatmul.bf16.gmra.mxu3 %v7841_v60  ;;  %v5061_v48 = vor.u32 %v5546_v14, %v5060_v54  ;;  %v5595_v54 = vld [vmem:[%s8804_s11 + $0x298] sm:$0xf0] }
 0x54a   :  { %v3976_v33 = vadd.f32 1.0, %v5710_v23  ;;  %v3765_v25 = vmul.f32 0.5, %v3323_v31  ;;  %v5712_v41 = vpop.eup %5711  ;;  %v5284_v31 = vld [vmem:[%s8804_s11 + $0x2b8] sm:$0xf] }
 0x54b   :  { %5713 = vtanh.f32 %v3759_v5  ;;  %v3982_v37 = vadd.f32 1.0, %v5712_v41  ;;  %v5285_v23 = vor.u32 %v5602_v18, %v5284_v31  ;;  %3654 = vmatpush.bf16.msra.mxu0 %v5061_v48 }
 0x54c   :  { %v4088_v7 = vmul.f32 0.5, %v3976_v33  ;;  %v3371_v50 = vpop.f32.mrf.mxu2  ;;  %v3420_v52 = vpop.f32.mrf.mxu3  ;;  %5715 = vtanh.f32 %v3765_v25 }
 0x54d   :  { %v3372_v32 = vadd.f32 %v3371_v50, %v8411_v39  ;;  %v3275_v8 = vpop.f32.mrf.mxu0  ;;  %v3324_v15 = vpop.f32.mrf.mxu1  ;;  %v4094_v17 = vmul.f32 0.5, %v3982_v37  ;;  %3703 = vmatpush.bf16.msra.mxu1 %v5285_v23 }
 0x54e   :  { %v4198_v0 = vpack.c.bf16 %v4088_v7, %v4087_v6  ;;  %v3276_v30 = vadd.f32 %v3275_v8, %v8393_v11 }
 0x54f   :  { %v3421_v34 = vadd.f32 %v3420_v52, %v3372_v32 }
 0x550   :  { %4262 = vst [vmem:[%s8807_s13 + $0x8] sm:$0xff] %v4198_v0  ;;  %v3325_v44 = vadd.f32 %v3324_v15, %v3276_v30 }
 0x551   :  { %v5714_v53 = vpop.eup %5713  ;;  %v3766_v46 = vmul.f32 0.5, %v3421_v34 }
 0x552   :  { %v3983_v45 = vadd.f32 1.0, %v5714_v53  ;;  %v3772_v28 = vmul.f32 0.5, %v3325_v44  ;;  %v5716_v36 = vpop.eup %5715 }
 0x553   :  { %5717 = vtanh.f32 %v3766_v46  ;;  %v3989_v21 = vadd.f32 1.0, %v5716_v36 }
 0x554   :  { %v4095_v22 = vmul.f32 0.5, %v3983_v45  ;;  %v3373_v58 = vpop.f32.mrf.mxu2  ;;  %v3422_v38 = vpop.f32.mrf.mxu3  ;;  %5719 = vtanh.f32 %v3772_v28 }
 0x555   :  { %v3374_v51 = vadd.f32 %v3373_v58, %v8411_v39  ;;  %v3278_v42 = vpop.f32.mrf.mxu0  ;;  %v3327_v26 = vpop.f32.mrf.mxu1  ;;  %v4101_v27 = vmul.f32 0.5, %v3989_v21 }
 0x556   :  { %v4202_v35 = vpack.c.bf16 %v4095_v22, %v4094_v17  ;;  %v3279_v61 = vadd.f32 %v3278_v42, %v8393_v11 }
 0x557   :  { %v3423_v62 = vadd.f32 %v3422_v38, %v3374_v51 }
 0x558   :  { %4267 = vst [vmem:[%s8807_s13 + $0x24] sm:$0xff] %v4202_v35  ;;  %v3328_v63 = vadd.f32 %v3327_v26, %v3279_v61  ;;  %3473 = vmatmul.bf16.gmra.mxu0 %v7863_v47  ;;  %3522 = vmatmul.bf16.gmra.mxu1 %v7865_v43  ;;  %v5032_v26 = vld [vmem:[%s8804_s11 + $0xc0] sm:$0xf]  ;;  %v5539_v35 = vld [vmem:[%s8804_s11 + $0xd8] sm:$0xf0] }
 0x559   :  { %v5718_v10 = vpop.eup %5717  ;;  %v3773_v3 = vmul.f32 0.5, %v3423_v62  ;;  %3571 = vmatmul.bf16.gmra.mxu2 %v7863_v47  ;;  %3620 = vmatmul.bf16.gmra.mxu3 %v7865_v43  ;;  %v5033_v21 = vor.u32 %v5539_v35, %v5032_v26  ;;  %v5588_v26 = vld [vmem:[%s8804_s11 + $0x260] sm:$0xf0] }
 0x55a   :  { %v3990_v1 = vadd.f32 1.0, %v5718_v10  ;;  %v3779_v5 = vmul.f32 0.5, %v3328_v63  ;;  %v5720_v16 = vpop.eup %5719  ;;  %v5256_v63 = vld [vmem:[%s8804_s11 + $0x280] sm:$0xf] }
 0x55b   :  { %5721 = vtanh.f32 %v3773_v3  ;;  %v3996_v32 = vadd.f32 1.0, %v5720_v16  ;;  %v5257_v10 = vor.u32 %v5595_v54, %v5256_v63  ;;  %3655 = vmatpush.bf16.msra.mxu0 %v5033_v21 }
 0x55c   :  { %v4102_v13 = vmul.f32 0.5, %v3990_v1  ;;  %v3376_v4 = vpop.f32.mrf.mxu2  ;;  %v3425_v33 = vpop.f32.mrf.mxu3  ;;  %5723 = vtanh.f32 %v3779_v5 }
 0x55d   :  { %v3377_v25 = vadd.f32 %v3376_v4, %v8411_v39  ;;  %v3280_v6 = vpop.f32.mrf.mxu0  ;;  %v3329_v7 = vpop.f32.mrf.mxu1  ;;  %v4108_v37 = vmul.f32 0.5, %v3996_v32  ;;  %3704 = vmatpush.bf16.msra.mxu1 %v5257_v10 }
 0x55e   :  { %v4206_v50 = vpack.c.bf16 %v4102_v13, %v4101_v27  ;;  %v3281_v52 = vadd.f32 %v3280_v6, %v8393_v11 }
 0x55f   :  { %v3426_v41 = vadd.f32 %v3425_v33, %v3377_v25 }
 0x560   :  { %4271 = vst [vmem:[%s8807_s13 + $0x40] sm:$0xff] %v4206_v50  ;;  %v3330_v8 = vadd.f32 %v3329_v7, %v3281_v52 }
 0x561   :  { %v5722_v15 = vpop.eup %5721  ;;  %v3780_v0 = vmul.f32 0.5, %v3426_v41 }
 0x562   :  { %v3997_v30 = vadd.f32 1.0, %v5722_v15  ;;  %v3786_v34 = vmul.f32 0.5, %v3330_v8  ;;  %v5724_v45 = vpop.eup %5723 }
 0x563   :  { %5725 = vtanh.f32 %v3780_v0  ;;  %v4003_v51 = vadd.f32 1.0, %v5724_v45 }
 0x564   :  { %v4109_v44 = vmul.f32 0.5, %v3997_v30  ;;  %v3378_v53 = vpop.f32.mrf.mxu2  ;;  %v3427_v46 = vpop.f32.mrf.mxu3  ;;  %5727 = vtanh.f32 %v3786_v34 }
 0x565   :  { %v3379_v28 = vadd.f32 %v3378_v53, %v8411_v39  ;;  %v3283_v17 = vpop.f32.mrf.mxu0  ;;  %v3332_v22 = vpop.f32.mrf.mxu1  ;;  %v4115_v48 = vmul.f32 0.5, %v4003_v51 }
 0x566   :  { %v4210_v58 = vpack.c.bf16 %v4109_v44, %v4108_v37  ;;  %v3284_v38 = vadd.f32 %v3283_v17, %v8393_v11 }
 0x567   :  { %v3428_v36 = vadd.f32 %v3427_v46, %v3379_v28 }
 0x568   :  { %4275 = vst [vmem:[%s8807_s13 + $0x5c] sm:$0xff] %v4210_v58  ;;  %v3333_v42 = vadd.f32 %v3332_v22, %v3284_v38  ;;  %3478 = vmatmul.bf16.gmra.mxu0 %v7887_v49  ;;  %3527 = vmatmul.bf16.gmra.mxu1 %v7889_v19  ;;  %v5004_v22 = vld [vmem:[%s8804_s11 + $0x88] sm:$0xf]  ;;  %v5532_v58 = vld [vmem:[%s8804_s11 + $0xa0] sm:$0xf0] }
 0x569   :  { %v5726_v61 = vpop.eup %5725  ;;  %v3787_v62 = vmul.f32 0.5, %v3428_v36  ;;  %3576 = vmatmul.bf16.gmra.mxu2 %v7887_v49  ;;  %3625 = vmatmul.bf16.gmra.mxu3 %v7889_v19  ;;  %v5005_v51 = vor.u32 %v5532_v58, %v5004_v22  ;;  %v5581_v22 = vld [vmem:[%s8804_s11 + $0x228] sm:$0xf0] }
 0x56a   :  { %v4004_v14 = vadd.f32 1.0, %v5726_v61  ;;  %v3793_v3 = vmul.f32 0.5, %v3333_v42  ;;  %v5728_v23 = vpop.eup %5727  ;;  %v5228_v42 = vld [vmem:[%s8804_s11 + $0x248] sm:$0xf] }
 0x56b   :  { %5729 = vtanh.f32 %v3787_v62  ;;  %v4010_v25 = vadd.f32 1.0, %v5728_v23  ;;  %v5229_v61 = vor.u32 %v5588_v26, %v5228_v42  ;;  %3656 = vmatpush.bf16.msra.mxu0 %v5005_v51 }
 0x56c   :  { %v4116_v31 = vmul.f32 0.5, %v4004_v14  ;;  %v3381_v18 = vpop.f32.mrf.mxu2  ;;  %v3430_v1 = vpop.f32.mrf.mxu3  ;;  %5731 = vtanh.f32 %v3793_v3 }
 0x56d   :  { %v3382_v5 = vadd.f32 %v3381_v18, %v8411_v39  ;;  %v3285_v27 = vpop.f32.mrf.mxu0  ;;  %v3334_v13 = vpop.f32.mrf.mxu1  ;;  %v4122_v32 = vmul.f32 0.5, %v4010_v25  ;;  %3705 = vmatpush.bf16.msra.mxu1 %v5229_v61 }
 0x56e   :  { %v4214_v4 = vpack.c.bf16 %v4116_v31, %v4115_v48  ;;  %v3286_v33 = vadd.f32 %v3285_v27, %v8393_v11 }
 0x56f   :  { %v3431_v16 = vadd.f32 %v3430_v1, %v3382_v5 }
 0x570   :  { %4279 = vst [vmem:[%s8807_s13 + $0x78] sm:$0xff] %v4214_v4  ;;  %v3335_v6 = vadd.f32 %v3334_v13, %v3286_v33 }
 0x571   :  { %v5730_v7 = vpop.eup %5729  ;;  %v3794_v50 = vmul.f32 0.5, %v3431_v16 }
 0x572   :  { %v4011_v52 = vadd.f32 1.0, %v5730_v7  ;;  %v3800_v41 = vmul.f32 0.5, %v3335_v6  ;;  %v5732_v30 = vpop.eup %5731 }
 0x573   :  { %5733 = vtanh.f32 %v3794_v50  ;;  %v4017_v28 = vadd.f32 1.0, %v5732_v30 }
 0x574   :  { %v4123_v8 = vmul.f32 0.5, %v4011_v52  ;;  %v3383_v15 = vpop.f32.mrf.mxu2  ;;  %v3432_v0 = vpop.f32.mrf.mxu3  ;;  %5735 = vtanh.f32 %v3800_v41 }
 0x575   :  { %v3384_v34 = vadd.f32 %v3383_v15, %v8411_v39  ;;  %v3288_v37 = vpop.f32.mrf.mxu0  ;;  %v3337_v44 = vpop.f32.mrf.mxu1  ;;  %v4129_v21 = vmul.f32 0.5, %v4017_v28 }
 0x576   :  { %v4218_v53 = vpack.c.bf16 %v4123_v8, %v4122_v32  ;;  %v3289_v46 = vadd.f32 %v3288_v37, %v8393_v11 }
 0x577   :  { %v3433_v45 = vadd.f32 %v3432_v0, %v3384_v34 }
 0x578   :  { %4283 = vst [vmem:[%s8807_s13 + $0x94] sm:$0xff] %v4218_v53  ;;  %v3338_v17 = vadd.f32 %v3337_v44, %v3289_v46  ;;  %3483 = vmatmul.bf16.gmra.mxu0 %v7911_v20  ;;  %3532 = vmatmul.bf16.gmra.mxu1 %v7913_v57  ;;  %v4976_v44 = vld [vmem:[%s8804_s11 + $0x50] sm:$0xf]  ;;  %v5525_v53 = vld [vmem:[%s8804_s11 + $0x68] sm:$0xf0] }
 0x579   :  { %v5734_v38 = vpop.eup %5733  ;;  %v3801_v36 = vmul.f32 0.5, %v3433_v45  ;;  %3581 = vmatmul.bf16.gmra.mxu2 %v7911_v20  ;;  %3630 = vmatmul.bf16.gmra.mxu3 %v7913_v57  ;;  %v4977_v28 = vor.u32 %v5525_v53, %v4976_v44 }
 0x57a   :  { %v4018_v35 = vadd.f32 1.0, %v5734_v38  ;;  %v3807_v62 = vmul.f32 0.5, %v3338_v17  ;;  %v5736_v10 = vpop.eup %5735  ;;  %v5200_v17 = vld [vmem:[%s8804_s11 + $0x210] sm:$0xf] }
 0x57b   :  { %5737 = vtanh.f32 %v3801_v36  ;;  %v4024_v5 = vadd.f32 1.0, %v5736_v10  ;;  %v5201_v38 = vor.u32 %v5581_v22, %v5200_v17  ;;  %3657 = vmatpush.bf16.msra.mxu0 %v4977_v28 }
 0x57c   :  { %v4130_v63 = vmul.f32 0.5, %v4018_v35  ;;  %v3386_v54 = vpop.f32.mrf.mxu2  ;;  %v3435_v14 = vpop.f32.mrf.mxu3  ;;  %5739 = vtanh.f32 %v3807_v62 }
 0x57d   :  { %v3387_v3 = vadd.f32 %v3386_v54, %v8411_v39  ;;  %v3290_v48 = vpop.f32.mrf.mxu0  ;;  %v3339_v31 = vpop.f32.mrf.mxu1  ;;  %v4136_v25 = vmul.f32 0.5, %v4024_v5  ;;  %3706 = vmatpush.bf16.msra.mxu1 %v5201_v38  ;;  %v4948_v5 = vld [vmem:[%s8804_s11 + $0x18] sm:$0xf] }
 0x57e   :  { %v4222_v18 = vpack.c.bf16 %v4130_v63, %v4129_v21  ;;  %v3291_v1 = vadd.f32 %v3290_v48, %v8393_v11 }
 0x57f   :  { %v3436_v23 = vadd.f32 %v3435_v14, %v3387_v3 }
 0x580   :  { %4287 = vst [vmem:[%s8807_s13 + $0xb0] sm:$0xff] %v4222_v18  ;;  %v3340_v27 = vadd.f32 %v3339_v31, %v3291_v1 }
 0x581   :  { %v5738_v13 = vpop.eup %5737  ;;  %v3808_v4 = vmul.f32 0.5, %v3436_v23 }
 0x582   :  { %v4025_v33 = vadd.f32 1.0, %v5738_v13  ;;  %v3814_v16 = vmul.f32 0.5, %v3340_v27  ;;  %v5740_v52 = vpop.eup %5739  ;;  %v5518_v27 = vld [vmem:[%s8804_s11 + $0x30] sm:$0xf0] }
 0x583   :  { %5741 = vtanh.f32 %v3808_v4  ;;  %v4031_v34 = vadd.f32 1.0, %v5740_v52 }
 0x584   :  { %v4137_v6 = vmul.f32 0.5, %v4025_v33  ;;  %v3388_v7 = vpop.f32.mrf.mxu2  ;;  %v3437_v50 = vpop.f32.mrf.mxu3  ;;  %5743 = vtanh.f32 %v3814_v16 }
 0x585   :  { %v3389_v41 = vadd.f32 %v3388_v7, %v8411_v39  ;;  %v3293_v32 = vpop.f32.mrf.mxu0  ;;  %v3342_v8 = vpop.f32.mrf.mxu1  ;;  %v4143_v51 = vmul.f32 0.5, %v4031_v34  ;;  %v5574_v7 = vld [vmem:[%s8804_s11 + $0x1f0] sm:$0xf0] }
 0x586   :  { %v4226_v15 = vpack.c.bf16 %v4137_v6, %v4136_v25  ;;  %v3294_v0 = vadd.f32 %v3293_v32, %v8393_v11  ;;  %v4949_v25 = vor.u32 %v5518_v27, %v4948_v5  ;;  %v5172_v6 = vld [vmem:[%s8804_s11 + $0x1d8] sm:$0xf] }
 0x587   :  { %v3438_v30 = vadd.f32 %v3437_v50, %v3389_v41 }
 0x588   :  { %4291 = vst [vmem:[%s8807_s13 + $0xcc] sm:$0xff] %v4226_v15  ;;  %v3343_v37 = vadd.f32 %v3342_v8, %v3294_v0  ;;  %3488 = vmatmul.bf16.gmra.mxu0 %v7983_v59  ;;  %3537 = vmatmul.bf16.gmra.mxu1 %v7985_v40  ;;  %v5173_v8 = vor.u32 %v5574_v7, %v5172_v6 }
 0x589   :  { %v5742_v46 = vpop.eup %5741  ;;  %v3815_v45 = vmul.f32 0.5, %v3438_v30  ;;  %3586 = vmatmul.bf16.gmra.mxu2 %v7983_v59  ;;  %3635 = vmatmul.bf16.gmra.mxu3 %v7985_v40 }
 0x58a   :  { %v4032_v58 = vadd.f32 1.0, %v5742_v46  ;;  %v3821_v36 = vmul.f32 0.5, %v3343_v37  ;;  %v5744_v61 = vpop.eup %5743  ;;  %3658 = vmatpush.bf16.msra.mxu0 %v4949_v25  ;;  %3707 = vmatpush.bf16.msra.mxu1 %v5173_v8 }
 0x58b   :  { %5745 = vtanh.f32 %v3815_v45  ;;  %v4038_v3 = vadd.f32 1.0, %v5744_v61 }
 0x58c   :  { %v4144_v42 = vmul.f32 0.5, %v4032_v58  ;;  %v3391_v26 = vpop.f32.mrf.mxu2  ;;  %v3440_v35 = vpop.f32.mrf.mxu3  ;;  %5747 = vtanh.f32 %v3821_v36 }
 0x58d   :  { %v3392_v62 = vadd.f32 %v3391_v26, %v8411_v39  ;;  %v3295_v21 = vpop.f32.mrf.mxu0  ;;  %v3344_v63 = vpop.f32.mrf.mxu1  ;;  %v4150_v13 = vmul.f32 0.5, %v4038_v3 }
 0x58e   :  { %v4230_v54 = vpack.c.bf16 %v4144_v42, %v4143_v51  ;;  %v3296_v14 = vadd.f32 %v3295_v21, %v8393_v11 }
 0x58f   :  { %v3441_v10 = vadd.f32 %v3440_v35, %v3392_v62 }
 0x590   :  { %4295 = vst [vmem:[%s8807_s13 + $0xe8] sm:$0xff] %v4230_v54  ;;  %v3345_v48 = vadd.f32 %v3344_v63, %v3296_v14 }
 0x591   :  { %v5746_v31 = vpop.eup %5745  ;;  %v3822_v18 = vmul.f32 0.5, %v3441_v10 }
 0x592   :  { %v4039_v1 = vadd.f32 1.0, %v5746_v31  ;;  %v3828_v23 = vmul.f32 0.5, %v3345_v48  ;;  %v5748_v50 = vpop.eup %5747 }
 0x593   :  { %5749 = vtanh.f32 %v3822_v18  ;;  %v4045_v34 = vadd.f32 1.0, %v5748_v50 }
 0x594   :  { %v4151_v4 = vmul.f32 0.5, %v4039_v1  ;;  %v3393_v33 = vpop.f32.mrf.mxu2  ;;  %v3442_v16 = vpop.f32.mrf.mxu3  ;;  %5751 = vtanh.f32 %v3828_v23 }
 0x595   :  { %v3394_v52 = vadd.f32 %v3393_v33, %v8411_v39  ;;  %v3298_v41 = vpop.f32.mrf.mxu0  ;;  %v3347_v32 = vpop.f32.mrf.mxu1  ;;  %v4157_v28 = vmul.f32 0.5, %v4045_v34 }
 0x596   :  { %v4234_v15 = vpack.c.bf16 %v4151_v4, %v4150_v13  ;;  %v3299_v0 = vadd.f32 %v3298_v41, %v8393_v11 }
 0x597   :  { %v3443_v30 = vadd.f32 %v3442_v16, %v3394_v52 }
 0x598   :  { %4299 = vst [vmem:[%s8807_s13 + $0x104] sm:$0xff] %v4234_v15  ;;  %v3348_v37 = vadd.f32 %v3347_v32, %v3299_v0  ;;  %3493 = vmatmul.bf16.gmra.mxu0 %v8055_v55  ;;  %3542 = vmatmul.bf16.gmra.mxu1 %v8057_v2 }
 0x599   :  { %v5750_v44 = vpop.eup %5749  ;;  %v3829_v53 = vmul.f32 0.5, %v3443_v30  ;;  %3591 = vmatmul.bf16.gmra.mxu2 %v8055_v55  ;;  %3640 = vmatmul.bf16.gmra.mxu3 %v8057_v2 }
 0x59a   :  { %v4046_v46 = vadd.f32 1.0, %v5750_v44  ;;  %v3835_v45 = vmul.f32 0.5, %v3348_v37  ;;  %v5752_v38 = vpop.eup %5751 }
 0x59b   :  { %5753 = vtanh.f32 %v3829_v53  ;;  %v4052_v62 = vadd.f32 1.0, %v5752_v38  ;;  %v8597_v38 = vld [vmem:[%s8806_s12] sm:$0x7f] }
 0x59c   :  { %v4158_v17 = vmul.f32 0.5, %v4046_v46  ;;  %v3396_v22 = vpop.f32.mrf.mxu2  ;;  %v3445_v58 = vpop.f32.mrf.mxu3  ;;  %5755 = vtanh.f32 %v3835_v45 }
 0x59d   :  { %v3397_v36 = vadd.f32 %v3396_v22, %v8411_v39  ;;  %v3300_v51 = vpop.f32.mrf.mxu0  ;;  %v3349_v42 = vpop.f32.mrf.mxu1  ;;  %v4164_v3 = vmul.f32 0.5, %v4052_v62 }
 0x59e   :  { %v4238_v26 = vpack.c.bf16 %v4158_v17, %v4157_v28  ;;  %v3301_v35 = vadd.f32 %v3300_v51, %v8393_v11 }
 0x59f   :  { %v3446_v61 = vadd.f32 %v3445_v58, %v3397_v36  ;;  %v8600_v36 = vperm.slane %v8597_v38, 4 }
 0x5a0   :  { %4303 = vst [vmem:[%s8807_s13 + $0x120] sm:$0xff] %v4238_v26  ;;  %v3350_v21 = vadd.f32 %v3349_v42, %v3301_v35 }
 0x5a1   :  { %v5754_v63 = vpop.eup %5753  ;;  %v3836_v54 = vmul.f32 0.5, %v3446_v61 }
 0x5a2   :  { %v4053_v14 = vadd.f32 1.0, %v5754_v63  ;;  %v3842_v10 = vmul.f32 0.5, %v3350_v21  ;;  %v5756_v1 = vpop.eup %5755 }
 0x5a3   :  { %5757 = vtanh.f32 %v3836_v54  ;;  %v4059_v16 = vadd.f32 1.0, %v5756_v1 }
 0x5a4   :  { %v4165_v48 = vmul.f32 0.5, %v4053_v14  ;;  %v3398_v31 = vpop.f32.mrf.mxu2  ;;  %v3447_v18 = vpop.f32.mrf.mxu3  ;;  %5759 = vtanh.f32 %v3842_v10 }
 0x5a5   :  { %v3399_v23 = vadd.f32 %v3398_v31, %v8411_v39  ;;  %v3303_v5 = vpop.f32.mrf.mxu0  ;;  %v3352_v27 = vpop.f32.mrf.mxu1  ;;  %v4171_v41 = vmul.f32 0.5, %v4059_v16 }
 0x5a6   :  { %v4242_v13 = vpack.c.bf16 %v4165_v48, %v4164_v3  ;;  %v3304_v4 = vadd.f32 %v3303_v5, %v8393_v11 }
 0x5a7   :  { %v3448_v33 = vadd.f32 %v3447_v18, %v3399_v23 }
 0x5a8   :  { %4307 = vst [vmem:[%s8807_s13 + $0x13c] sm:$0xff] %v4242_v13  ;;  %v3353_v25 = vadd.f32 %v3352_v27, %v3304_v4  ;;  %3498 = vmatmul.bf16.gmra.mxu0 %v8076_v24  ;;  %3547 = vmatmul.bf16.gmra.mxu1 %v8078_v9 }
 0x5a9   :  { %v5758_v6 = vpop.eup %5757  ;;  %v3843_v7 = vmul.f32 0.5, %v3448_v33  ;;  %3596 = vmatmul.bf16.gmra.mxu2 %v8076_v24  ;;  %3645 = vmatmul.bf16.gmra.mxu3 %v8078_v9 }
 0x5aa   :  { %v4060_v50 = vadd.f32 1.0, %v5758_v6  ;;  %v3849_v52 = vmul.f32 0.5, %v3353_v25  ;;  %v5760_v0 = vpop.eup %5759 }
 0x5ab   :  { %5761 = vtanh.f32 %v3843_v7  ;;  %v4066_v45 = vadd.f32 1.0, %v5760_v0 }
 0x5ac   :  { %v4172_v32 = vmul.f32 0.5, %v4060_v50  ;;  %v3401_v8 = vpop.f32.mrf.mxu2  ;;  %v3450_v15 = vpop.f32.mrf.mxu3  ;;  %5763 = vtanh.f32 %v3849_v52 }
 0x5ad   :  { %v3402_v30 = vadd.f32 %v3401_v8, %v8411_v39  ;;  %v3305_v34 = vpop.f32.mrf.mxu0  ;;  %v3354_v37 = vpop.f32.mrf.mxu1  ;;  %v4178_v51 = vmul.f32 0.5, %v4066_v45 }
 0x5ae   :  { %v4246_v44 = vpack.c.bf16 %v4172_v32, %v4171_v41  ;;  %v3306_v53 = vadd.f32 %v3305_v34, %v8393_v11 }
 0x5af   :  { %v3451_v46 = vadd.f32 %v3450_v15, %v3402_v30 }
 0x5b0   :  { %4311 = vst [vmem:[%s8807_s13 + $0x158] sm:$0xff] %v4246_v44  ;;  %v3355_v28 = vadd.f32 %v3354_v37, %v3306_v53 }
 0x5b1   :  { %v5762_v17 = vpop.eup %5761  ;;  %v3850_v22 = vmul.f32 0.5, %v3451_v46 }
 0x5b2   :  { %v4067_v58 = vadd.f32 1.0, %v5762_v17  ;;  %v3856_v11 = vmul.f32 0.5, %v3355_v28  ;;  %v5764_v61 = vpop.eup %5763 }
 0x5b3   :  { %5765 = vtanh.f32 %v3850_v22  ;;  %v4073_v3 = vadd.f32 1.0, %v5764_v61 }
 0x5b4   :  { %v4179_v42 = vmul.f32 0.5, %v4067_v58  ;;  %v3403_v26 = vpop.f32.mrf.mxu2  ;;  %v3452_v35 = vpop.f32.mrf.mxu3  ;;  %5767 = vtanh.f32 %v3856_v11 }
 0x5b5   :  { %v3404_v62 = vadd.f32 %v3403_v26, %v8411_v39  ;;  %v3464_v21 = vpop.f32.mrf.mxu0  ;;  %v3513_v63 = vpop.f32.mrf.mxu1  ;;  %v8610_v39 = vperm.slane %v8597_v38, 5  ;;  %v4185_v5 = vmul.f32 0.5, %v4073_v3 }
 0x5b6   :  { %v4250_v54 = vpack.c.bf16 %v4179_v42, %v4178_v51  ;;  %v3465_v14 = vadd.f32 %v3464_v21, %v8600_v36 }
 0x5b7   :  { %v3453_v10 = vadd.f32 %v3452_v35, %v3404_v62 }
 0x5b8   :  { %4315 = vst [vmem:[%s8807_s13 + $0x174] sm:$0xff] %v4250_v54  ;;  %v3514_v48 = vadd.f32 %v3513_v63, %v3465_v14  ;;  %3659 = vmatmul.bf16.vlgmr.msra.gmra.mxu0 %v7815_v56  ;;  %3708 = vmatmul.bf16.vlgmr.msra.gmra.mxu1 %v7817_v29 }
 0x5b9   :  { %v5766_v31 = vpop.eup %5765  ;;  %v3857_v18 = vmul.f32 0.5, %v3453_v10 }
 0x5ba   :  { %v4074_v1 = vadd.f32 1.0, %v5766_v31  ;;  %v3753_v23 = vmul.f32 0.5, %v3514_v48  ;;  %v5768_v33 = vpop.eup %5767 }
 0x5bb   :  { %5769 = vtanh.f32 %v3857_v18  ;;  %v4080_v50 = vadd.f32 1.0, %v5768_v33 }
 0x5bc   :  { %v4186_v27 = vmul.f32 0.5, %v4074_v1  ;;  %v3562_v13 = vpop.f32.mrf.mxu2  ;;  %v3611_v4 = vpop.f32.mrf.mxu3  ;;  %5771 = vtanh.f32 %v3753_v23 }
 0x5bd   :  { %v3563_v16 = vadd.f32 %v3562_v13, %v8610_v39  ;;  %v3466_v25 = vpop.f32.mrf.mxu0  ;;  %v3515_v6 = vpop.f32.mrf.mxu1  ;;  %v4192_v0 = vmul.f32 0.5, %v4080_v50 }
 0x5be   :  { %v4254_v56 = vpack.c.bf16 %v4186_v27, %v4185_v5  ;;  %v3467_v29 = vadd.f32 %v3466_v25, %v8600_v36 }
 0x5bf   :  { %v3612_v7 = vadd.f32 %v3611_v4, %v3563_v16 }
 0x5c0   :  { %4319 = vst [vmem:[%s8807_s13 + $0x190] sm:$0xff] %v4254_v56  ;;  %v3516_v52 = vadd.f32 %v3515_v6, %v3467_v29 }
 0x5c1   :  { %v5770_v41 = vpop.eup %5769  ;;  %v3754_v32 = vmul.f32 0.5, %v3612_v7 }
 0x5c2   :  { %v4081_v8 = vadd.f32 1.0, %v5770_v41  ;;  %v3760_v15 = vmul.f32 0.5, %v3516_v52  ;;  %v5772_v44 = vpop.eup %5771 }
 0x5c3   :  { %5773 = vtanh.f32 %v3754_v32  ;;  %v3977_v58 = vadd.f32 1.0, %v5772_v44 }
 0x5c4   :  { %v4193_v30 = vmul.f32 0.5, %v4081_v8  ;;  %v3564_v34 = vpop.f32.mrf.mxu2  ;;  %v3613_v37 = vpop.f32.mrf.mxu3  ;;  %5775 = vtanh.f32 %v3760_v15 }
 0x5c5   :  { %v3565_v53 = vadd.f32 %v3564_v34, %v8610_v39  ;;  %v3469_v46 = vpop.f32.mrf.mxu0  ;;  %v3518_v45 = vpop.f32.mrf.mxu1  ;;  %v4089_v61 = vmul.f32 0.5, %v3977_v58 }
 0x5c6   :  { %v4258_v28 = vpack.c.bf16 %v4193_v30, %v4192_v0  ;;  %v3470_v17 = vadd.f32 %v3469_v46, %v8600_v36 }
 0x5c7   :  { %v3614_v22 = vadd.f32 %v3613_v37, %v3565_v53 }
 0x5c8   :  { %4323 = vst [vmem:[%s8807_s13 + $0x1ac] sm:$0xff] %v4258_v28  ;;  %v3519_v11 = vadd.f32 %v3518_v45, %v3470_v17  ;;  %3664 = vmatmul.bf16.gmra.mxu0 %v7839_v12  ;;  %3713 = vmatmul.bf16.gmra.mxu1 %v7841_v60 }
 0x5c9   :  { %v5774_v51 = vpop.eup %5773  ;;  %v3761_v42 = vmul.f32 0.5, %v3614_v22 }
 0x5ca   :  { %v3978_v26 = vadd.f32 1.0, %v5774_v51  ;;  %v3767_v35 = vmul.f32 0.5, %v3519_v11  ;;  %v5776_v54 = vpop.eup %5775 }
 0x5cb   :  { %5777 = vtanh.f32 %v3761_v42  ;;  %v3984_v60 = vadd.f32 1.0, %v5776_v54 }
 0x5cc   :  { %v4090_v62 = vmul.f32 0.5, %v3978_v26  ;;  %v3567_v21 = vpop.f32.mrf.mxu2  ;;  %v3616_v63 = vpop.f32.mrf.mxu3  ;;  %5779 = vtanh.f32 %v3767_v35 }
 0x5cd   :  { %v3568_v14 = vadd.f32 %v3567_v21, %v8610_v39  ;;  %v3471_v10 = vpop.f32.mrf.mxu0  ;;  %v3520_v3 = vpop.f32.mrf.mxu1  ;;  %v4096_v13 = vmul.f32 0.5, %v3984_v60 }
 0x5ce   :  { %v4199_v48 = vpack.c.bf16 %v4090_v62, %v4089_v61  ;;  %v3472_v31 = vadd.f32 %v3471_v10, %v8600_v36 }
 0x5cf   :  { %v3617_v12 = vadd.f32 %v3616_v63, %v3568_v14 }
 0x5d0   :  { %4263 = vst [vmem:[%s8807_s13 + $0x10] sm:$0xff] %v4199_v48  ;;  %v3521_v18 = vadd.f32 %v3520_v3, %v3472_v31 }
 0x5d1   :  { %v5778_v1 = vpop.eup %5777  ;;  %v3768_v23 = vmul.f32 0.5, %v3617_v12 }
 0x5d2   :  { %v3985_v5 = vadd.f32 1.0, %v5778_v1  ;;  %v3774_v27 = vmul.f32 0.5, %v3521_v18  ;;  %v5780_v25 = vpop.eup %5779 }
 0x5d3   :  { %5781 = vtanh.f32 %v3768_v23  ;;  %v3991_v41 = vadd.f32 1.0, %v5780_v25 }
 0x5d4   :  { %v4097_v4 = vmul.f32 0.5, %v3985_v5  ;;  %v3569_v33 = vpop.f32.mrf.mxu2  ;;  %v3618_v16 = vpop.f32.mrf.mxu3  ;;  %5783 = vtanh.f32 %v3774_v27 }
 0x5d5   :  { %v3570_v6 = vadd.f32 %v3569_v33, %v8610_v39  ;;  %v3474_v56 = vpop.f32.mrf.mxu0  ;;  %v3523_v29 = vpop.f32.mrf.mxu1  ;;  %v4103_v34 = vmul.f32 0.5, %v3991_v41 }
 0x5d6   :  { %v4203_v7 = vpack.c.bf16 %v4097_v4, %v4096_v13  ;;  %v3475_v50 = vadd.f32 %v3474_v56, %v8600_v36 }
 0x5d7   :  { %v3619_v52 = vadd.f32 %v3618_v16, %v3570_v6 }
 0x5d8   :  { %4268 = vst [vmem:[%s8807_s13 + $0x2c] sm:$0xff] %v4203_v7  ;;  %v3524_v32 = vadd.f32 %v3523_v29, %v3475_v50  ;;  %3669 = vmatmul.bf16.gmra.mxu0 %v7863_v47  ;;  %3718 = vmatmul.bf16.gmra.mxu1 %v7865_v43 }
 0x5d9   :  { %v5782_v8 = vpop.eup %5781  ;;  %v3775_v15 = vmul.f32 0.5, %v3619_v52 }
 0x5da   :  { %v3992_v0 = vadd.f32 1.0, %v5782_v8  ;;  %v3781_v30 = vmul.f32 0.5, %v3524_v32  ;;  %v5784_v46 = vpop.eup %5783 }
 0x5db   :  { %5785 = vtanh.f32 %v3775_v15  ;;  %v3998_v43 = vadd.f32 1.0, %v5784_v46 }
 0x5dc   :  { %v4104_v37 = vmul.f32 0.5, %v3992_v0  ;;  %v3572_v44 = vpop.f32.mrf.mxu2  ;;  %v3621_v53 = vpop.f32.mrf.mxu3  ;;  %5787 = vtanh.f32 %v3781_v30 }
 0x5dd   :  { %v3573_v45 = vadd.f32 %v3572_v44, %v8610_v39  ;;  %v3476_v28 = vpop.f32.mrf.mxu0  ;;  %v3525_v17 = vpop.f32.mrf.mxu1  ;;  %v4110_v61 = vmul.f32 0.5, %v3998_v43 }
 0x5de   :  { %v4207_v22 = vpack.c.bf16 %v4104_v37, %v4103_v34  ;;  %v3477_v58 = vadd.f32 %v3476_v28, %v8600_v36 }
 0x5df   :  { %v3622_v47 = vadd.f32 %v3621_v53, %v3573_v45 }
 0x5e0   :  { %4272 = vst [vmem:[%s8807_s13 + $0x48] sm:$0xff] %v4207_v22  ;;  %v3526_v11 = vadd.f32 %v3525_v17, %v3477_v58 }
 0x5e1   :  { %v5786_v51 = vpop.eup %5785  ;;  %v3782_v42 = vmul.f32 0.5, %v3622_v47 }
 0x5e2   :  { %v3999_v26 = vadd.f32 1.0, %v5786_v51  ;;  %v3788_v35 = vmul.f32 0.5, %v3526_v11  ;;  %v5788_v54 = vpop.eup %5787 }
 0x5e3   :  { %5789 = vtanh.f32 %v3782_v42  ;;  %v4005_v60 = vadd.f32 1.0, %v5788_v54 }
 0x5e4   :  { %v4111_v62 = vmul.f32 0.5, %v3999_v26  ;;  %v3574_v21 = vpop.f32.mrf.mxu2  ;;  %v3623_v63 = vpop.f32.mrf.mxu3  ;;  %5791 = vtanh.f32 %v3788_v35 }
 0x5e5   :  { %v3575_v14 = vadd.f32 %v3574_v21, %v8610_v39  ;;  %v3479_v10 = vpop.f32.mrf.mxu0  ;;  %v3528_v3 = vpop.f32.mrf.mxu1  ;;  %v4117_v13 = vmul.f32 0.5, %v4005_v60 }
 0x5e6   :  { %v4211_v48 = vpack.c.bf16 %v4111_v62, %v4110_v61  ;;  %v3480_v31 = vadd.f32 %v3479_v10, %v8600_v36 }
 0x5e7   :  { %v3624_v12 = vadd.f32 %v3623_v63, %v3575_v14 }
 0x5e8   :  { %4276 = vst [vmem:[%s8807_s13 + $0x64] sm:$0xff] %v4211_v48  ;;  %v3529_v18 = vadd.f32 %v3528_v3, %v3480_v31  ;;  %3674 = vmatmul.bf16.gmra.mxu0 %v7887_v49  ;;  %3723 = vmatmul.bf16.gmra.mxu1 %v7889_v19 }
 0x5e9   :  { %v5790_v1 = vpop.eup %5789  ;;  %v3789_v23 = vmul.f32 0.5, %v3624_v12 }
 0x5ea   :  { %v4006_v5 = vadd.f32 1.0, %v5790_v1  ;;  %v3795_v27 = vmul.f32 0.5, %v3529_v18  ;;  %v5792_v25 = vpop.eup %5791 }
 0x5eb   :  { %5793 = vtanh.f32 %v3789_v23  ;;  %v4012_v19 = vadd.f32 1.0, %v5792_v25 }
 0x5ec   :  { %v4118_v4 = vmul.f32 0.5, %v4006_v5  ;;  %v3577_v33 = vpop.f32.mrf.mxu2  ;;  %v3626_v16 = vpop.f32.mrf.mxu3  ;;  %5795 = vtanh.f32 %v3795_v27 }
 0x5ed   :  { %v3578_v6 = vadd.f32 %v3577_v33, %v8610_v39  ;;  %v3481_v56 = vpop.f32.mrf.mxu0  ;;  %v3530_v29 = vpop.f32.mrf.mxu1  ;;  %v4124_v0 = vmul.f32 0.5, %v4012_v19 }
 0x5ee   :  { %v4215_v7 = vpack.c.bf16 %v4118_v4, %v4117_v13  ;;  %v3482_v50 = vadd.f32 %v3481_v56, %v8600_v36 }
 0x5ef   :  { %v3627_v49 = vadd.f32 %v3626_v16, %v3578_v6 }
 0x5f0   :  { %4280 = vst [vmem:[%s8807_s13 + $0x80] sm:$0xff] %v4215_v7  ;;  %v3531_v52 = vadd.f32 %v3530_v29, %v3482_v50 }
 0x5f1   :  { %v5794_v41 = vpop.eup %5793  ;;  %v3796_v32 = vmul.f32 0.5, %v3627_v49 }
 0x5f2   :  { %v4013_v8 = vadd.f32 1.0, %v5794_v41  ;;  %v3802_v15 = vmul.f32 0.5, %v3531_v52  ;;  %v5796_v44 = vpop.eup %5795 }
 0x5f3   :  { %5797 = vtanh.f32 %v3796_v32  ;;  %v4019_v58 = vadd.f32 1.0, %v5796_v44 }
 0x5f4   :  { %v4125_v30 = vmul.f32 0.5, %v4013_v8  ;;  %v3579_v34 = vpop.f32.mrf.mxu2  ;;  %v3628_v37 = vpop.f32.mrf.mxu3  ;;  %5799 = vtanh.f32 %v3802_v15 }
 0x5f5   :  { %v3580_v53 = vadd.f32 %v3579_v34, %v8610_v39  ;;  %v3484_v46 = vpop.f32.mrf.mxu0  ;;  %v3533_v45 = vpop.f32.mrf.mxu1  ;;  %v4131_v26 = vmul.f32 0.5, %v4019_v58 }
 0x5f6   :  { %v4219_v28 = vpack.c.bf16 %v4125_v30, %v4124_v0  ;;  %v3485_v17 = vadd.f32 %v3484_v46, %v8600_v36 }
 0x5f7   :  { %v3629_v22 = vadd.f32 %v3628_v37, %v3580_v53 }
 0x5f8   :  { %4284 = vst [vmem:[%s8807_s13 + $0x9c] sm:$0xff] %v4219_v28  ;;  %v3534_v47 = vadd.f32 %v3533_v45, %v3485_v17  ;;  %3679 = vmatmul.bf16.gmra.mxu0 %v7911_v20  ;;  %3728 = vmatmul.bf16.gmra.mxu1 %v7913_v57 }
 0x5f9   :  { %v5798_v43 = vpop.eup %5797  ;;  %v3803_v11 = vmul.f32 0.5, %v3629_v22 }
 0x5fa   :  { %v4020_v51 = vadd.f32 1.0, %v5798_v43  ;;  %v3809_v42 = vmul.f32 0.5, %v3534_v47  ;;  %v5800_v21 = vpop.eup %5799 }
 0x5fb   :  { %5801 = vtanh.f32 %v3803_v11  ;;  %v4026_v57 = vadd.f32 1.0, %v5800_v21 }
 0x5fc   :  { %v4132_v35 = vmul.f32 0.5, %v4020_v51  ;;  %v3582_v61 = vpop.f32.mrf.mxu2  ;;  %v3631_v62 = vpop.f32.mrf.mxu3  ;;  %5803 = vtanh.f32 %v3809_v42 }
 0x5fd   :  { %v3583_v63 = vadd.f32 %v3582_v61, %v8610_v39  ;;  %v3486_v54 = vpop.f32.mrf.mxu0  ;;  %v3535_v14 = vpop.f32.mrf.mxu1  ;;  %v4138_v1 = vmul.f32 0.5, %v4026_v57 }
 0x5fe   :  { %v4223_v10 = vpack.c.bf16 %v4132_v35, %v4131_v26  ;;  %v3487_v3 = vadd.f32 %v3486_v54, %v8600_v36 }
 0x5ff   :  { %v3632_v20 = vadd.f32 %v3631_v62, %v3583_v63 }
 0x600   :  { %4288 = vst [vmem:[%s8807_s13 + $0xb8] sm:$0xff] %v4223_v10  ;;  %v3536_v48 = vadd.f32 %v3535_v14, %v3487_v3 }
 0x601   :  { %v5802_v31 = vpop.eup %5801  ;;  %v3810_v12 = vmul.f32 0.5, %v3632_v20 }
 0x602   :  { %v4027_v60 = vadd.f32 1.0, %v5802_v31  ;;  %v3816_v18 = vmul.f32 0.5, %v3536_v48  ;;  %v5804_v13 = vpop.eup %5803 }
 0x603   :  { %5805 = vtanh.f32 %v3810_v12  ;;  %v4033_v29 = vadd.f32 1.0, %v5804_v13 }
 0x604   :  { %v4139_v23 = vmul.f32 0.5, %v4027_v60  ;;  %v3584_v5 = vpop.f32.mrf.mxu2  ;;  %v3633_v27 = vpop.f32.mrf.mxu3  ;;  %5807 = vtanh.f32 %v3816_v18 }
 0x605   :  { %v3585_v4 = vadd.f32 %v3584_v5, %v8610_v39  ;;  %v3489_v33 = vpop.f32.mrf.mxu0  ;;  %v3538_v16 = vpop.f32.mrf.mxu1  ;;  %v4145_v41 = vmul.f32 0.5, %v4033_v29 }
 0x606   :  { %v4227_v25 = vpack.c.bf16 %v4139_v23, %v4138_v1  ;;  %v3490_v6 = vadd.f32 %v3489_v33, %v8600_v36 }
 0x607   :  { %v3634_v56 = vadd.f32 %v3633_v27, %v3585_v4 }
 0x608   :  { %4292 = vst [vmem:[%s8807_s13 + $0xd4] sm:$0xff] %v4227_v25  ;;  %v3539_v7 = vadd.f32 %v3538_v16, %v3490_v6  ;;  %3684 = vmatmul.bf16.gmra.mxu0 %v7983_v59  ;;  %3733 = vmatmul.bf16.gmra.mxu1 %v7985_v40 }
 0x609   :  { %v5806_v50 = vpop.eup %5805  ;;  %v3817_v49 = vmul.f32 0.5, %v3634_v56 }
 0x60a   :  { %v4034_v19 = vadd.f32 1.0, %v5806_v50  ;;  %v3823_v52 = vmul.f32 0.5, %v3539_v7  ;;  %v5808_v0 = vpop.eup %5807 }
 0x60b   :  { %5809 = vtanh.f32 %v3817_v49  ;;  %v4040_v40 = vadd.f32 1.0, %v5808_v0 }
 0x60c   :  { %v4146_v32 = vmul.f32 0.5, %v4034_v19  ;;  %v3587_v8 = vpop.f32.mrf.mxu2  ;;  %v3636_v15 = vpop.f32.mrf.mxu3  ;;  %5811 = vtanh.f32 %v3823_v52 }
 0x60d   :  { %v3588_v30 = vadd.f32 %v3587_v8, %v8610_v39  ;;  %v3491_v34 = vpop.f32.mrf.mxu0  ;;  %v3540_v37 = vpop.f32.mrf.mxu1  ;;  %v4152_v58 = vmul.f32 0.5, %v4040_v40 }
 0x60e   :  { %v4231_v44 = vpack.c.bf16 %v4146_v32, %v4145_v41  ;;  %v3492_v53 = vadd.f32 %v3491_v34, %v8600_v36 }
 0x60f   :  { %v3637_v59 = vadd.f32 %v3636_v15, %v3588_v30 }
 0x610   :  { %4296 = vst [vmem:[%s8807_s13 + $0xf0] sm:$0xff] %v4231_v44  ;;  %v3541_v46 = vadd.f32 %v3540_v37, %v3492_v53 }
 0x611   :  { %v5810_v45 = vpop.eup %5809  ;;  %v3824_v28 = vmul.f32 0.5, %v3637_v59 }
 0x612   :  { %v4041_v17 = vadd.f32 1.0, %v5810_v45  ;;  %v3830_v22 = vmul.f32 0.5, %v3541_v46  ;;  %v5812_v51 = vpop.eup %5811 }
 0x613   :  { %5813 = vtanh.f32 %v3824_v28  ;;  %v4047_v63 = vadd.f32 1.0, %v5812_v51 }
 0x614   :  { %v4153_v47 = vmul.f32 0.5, %v4041_v17  ;;  %v3589_v43 = vpop.f32.mrf.mxu2  ;;  %v3638_v11 = vpop.f32.mrf.mxu3  ;;  %5815 = vtanh.f32 %v3830_v22 }
 0x615   :  { %v3590_v42 = vadd.f32 %v3589_v43, %v8610_v39  ;;  %v3494_v26 = vpop.f32.mrf.mxu0  ;;  %v3543_v35 = vpop.f32.mrf.mxu1  ;;  %v4159_v57 = vmul.f32 0.5, %v4047_v63 }
 0x616   :  { %v4235_v61 = vpack.c.bf16 %v4153_v47, %v4152_v58  ;;  %v3495_v62 = vadd.f32 %v3494_v26, %v8600_v36  ;;  %v8702_v26 = vperm.slane %v8597_v38, 6 }
 0x617   :  { %v3639_v21 = vadd.f32 %v3638_v11, %v3590_v42 }
 0x618   :  { %4300 = vst [vmem:[%s8807_s13 + $0x10c] sm:$0xff] %v4235_v61  ;;  %v3544_v54 = vadd.f32 %v3543_v35, %v3495_v62  ;;  %3689 = vmatmul.bf16.gmra.mxu0 %v8055_v55  ;;  %3738 = vmatmul.bf16.gmra.mxu1 %v8057_v2 }
 0x619   :  { %v5814_v14 = vpop.eup %5813  ;;  %v3831_v10 = vmul.f32 0.5, %v3639_v21 }
 0x61a   :  { %v4048_v3 = vadd.f32 1.0, %v5814_v14  ;;  %v3837_v20 = vmul.f32 0.5, %v3544_v54  ;;  %v5816_v60 = vpop.eup %5815 }
 0x61b   :  { %5817 = vtanh.f32 %v3831_v10  ;;  %v4054_v2 = vadd.f32 1.0, %v5816_v60 }
 0x61c   :  { %v4160_v48 = vmul.f32 0.5, %v4048_v3  ;;  %v3592_v31 = vpop.f32.mrf.mxu2  ;;  %v3641_v12 = vpop.f32.mrf.mxu3  ;;  %5819 = vtanh.f32 %v3837_v20 }
 0x61d   :  { %v3593_v18 = vadd.f32 %v3592_v31, %v8610_v39  ;;  %v3496_v1 = vpop.f32.mrf.mxu0  ;;  %v3545_v23 = vpop.f32.mrf.mxu1  ;;  %v4166_v6 = vmul.f32 0.5, %v4054_v2 }
 0x61e   :  { %v4239_v5 = vpack.c.bf16 %v4160_v48, %v4159_v57  ;;  %v3497_v27 = vadd.f32 %v3496_v1, %v8600_v36 }
 0x61f   :  { %v3642_v55 = vadd.f32 %v3641_v12, %v3593_v18 }
 0x620   :  { %4304 = vst [vmem:[%s8807_s13 + $0x128] sm:$0xff] %v4239_v5  ;;  %v3546_v13 = vadd.f32 %v3545_v23, %v3497_v27 }
 0x621   :  { %v5818_v4 = vpop.eup %5817  ;;  %v3838_v33 = vmul.f32 0.5, %v3642_v55 }
 0x622   :  { %v4055_v16 = vadd.f32 1.0, %v5818_v4  ;;  %v3844_v25 = vmul.f32 0.5, %v3546_v13  ;;  %v5820_v50 = vpop.eup %5819 }
 0x623   :  { %5821 = vtanh.f32 %v3838_v33  ;;  %v4061_v15 = vadd.f32 1.0, %v5820_v50 }
 0x624   :  { %v4167_v56 = vmul.f32 0.5, %v4055_v16  ;;  %v3594_v29 = vpop.f32.mrf.mxu2  ;;  %v3643_v7 = vpop.f32.mrf.mxu3  ;;  %5823 = vtanh.f32 %v3844_v25 }
 0x625   :  { %v3595_v49 = vadd.f32 %v3594_v29, %v8610_v39  ;;  %v3499_v19 = vpop.f32.mrf.mxu0  ;;  %v3548_v52 = vpop.f32.mrf.mxu1  ;;  %v4173_v53 = vmul.f32 0.5, %v4061_v15 }
 0x626   :  { %v4243_v41 = vpack.c.bf16 %v4167_v56, %v4166_v6  ;;  %v3500_v32 = vadd.f32 %v3499_v19, %v8600_v36 }
 0x627   :  { %v3644_v8 = vadd.f32 %v3643_v7, %v3595_v49 }
 0x628   :  { %4308 = vst [vmem:[%s8807_s13 + $0x144] sm:$0xff] %v4243_v41  ;;  %v3549_v0 = vadd.f32 %v3548_v52, %v3500_v32  ;;  %3694 = vmatmul.bf16.gmra.mxu0 %v8076_v24  ;;  %3743 = vmatmul.bf16.gmra.mxu1 %v8078_v9 }
 0x629   :  { %v5822_v30 = vpop.eup %5821  ;;  %v3845_v34 = vmul.f32 0.5, %v3644_v8 }
 0x62a   :  { %v4062_v37 = vadd.f32 1.0, %v5822_v30  ;;  %v3851_v44 = vmul.f32 0.5, %v3549_v0  ;;  %v5824_v45 = vpop.eup %5823 }
 0x62b   :  { %5825 = vtanh.f32 %v3845_v34  ;;  %v4068_v9 = vadd.f32 1.0, %v5824_v45 }
 0x62c   :  { %v4174_v59 = vmul.f32 0.5, %v4062_v37  ;;  %v3597_v40 = vpop.f32.mrf.mxu2  ;;  %v3646_v46 = vpop.f32.mrf.mxu3  ;;  %5827 = vtanh.f32 %v3851_v44 }
 0x62d   :  { %v3598_v28 = vadd.f32 %v3597_v40, %v8610_v39  ;;  %v3501_v17 = vpop.f32.mrf.mxu0  ;;  %v3550_v22 = vpop.f32.mrf.mxu1  ;;  %v4180_v61 = vmul.f32 0.5, %v4068_v9 }
 0x62e   :  { %v4247_v58 = vpack.c.bf16 %v4174_v59, %v4173_v53  ;;  %v3502_v47 = vadd.f32 %v3501_v17, %v8600_v36 }
 0x62f   :  { %v3647_v24 = vadd.f32 %v3646_v46, %v3598_v28 }
 0x630   :  { %4312 = vst [vmem:[%s8807_s13 + $0x160] sm:$0xff] %v4247_v58  ;;  %v3551_v43 = vadd.f32 %v3550_v22, %v3502_v47 }
 0x631   :  { %v5826_v11 = vpop.eup %5825  ;;  %v3852_v51 = vmul.f32 0.5, %v3647_v24 }
 0x632   :  { %v4069_v42 = vadd.f32 1.0, %v5826_v11  ;;  %v3858_v35 = vmul.f32 0.5, %v3551_v43  ;;  %v5828_v36 = vpop.eup %5827 }
 0x633   :  { %5829 = vtanh.f32 %v3852_v51  ;;  %v4075_v38 = vadd.f32 1.0, %v5828_v36 }
 0x634   :  { %v4181_v62 = vmul.f32 0.5, %v4069_v42  ;;  %v3599_v21 = vpop.f32.mrf.mxu2  ;;  %v3648_v3 = vpop.f32.mrf.mxu3  ;;  %5831 = vtanh.f32 %v3858_v35 }
 0x635   :  { %v3600_v63 = vadd.f32 %v3599_v21, %v8610_v39  ;;  %v3660_v54 = vpop.f32.mrf.mxu0  ;;  %v3709_v14 = vpop.f32.mrf.mxu1  ;;  %v4187_v39 = vmul.f32 0.5, %v4075_v38 }
 0x636   :  { %v4251_v10 = vpack.c.bf16 %v4181_v62, %v4180_v61  ;;  %v3661_v20 = vadd.f32 %v3660_v54, %v8702_v26 }
 0x637   :  { %v3649_v57 = vadd.f32 %v3648_v3, %v3600_v63 }
 0x638   :  { %4316 = vst [vmem:[%s8807_s13 + $0x17c] sm:$0xff] %v4251_v10  ;;  %v3710_v48 = vadd.f32 %v3709_v14, %v3661_v20 }
 0x639   :  { %v5830_v31 = vpop.eup %5829  ;;  %v3859_v12 = vmul.f32 0.5, %v3649_v57 }
 0x63a   :  { %v4076_v60 = vadd.f32 1.0, %v5830_v31  ;;  %v3755_v18 = vmul.f32 0.5, %v3710_v48  ;;  %v5832_v23 = vpop.eup %5831 }
 0x63b   :  { %5833 = vtanh.f32 %v3859_v12  ;;  %v4082_v13 = vadd.f32 1.0, %v5832_v23 }
 0x63c   :  { %v4188_v1 = vmul.f32 0.5, %v4076_v60  ;;  %5835 = vtanh.f32 %v3755_v18 }
 0x63d   :  { %v3662_v5 = vpop.f32.mrf.mxu0  ;;  %v3711_v27 = vpop.f32.mrf.mxu1  ;;  %v4194_v29 = vmul.f32 0.5, %v4082_v13 }
 0x63e   :  { %v4255_v55 = vpack.c.bf16 %v4188_v1, %v4187_v39  ;;  %v3663_v2 = vadd.f32 %v3662_v5, %v8702_v26 }
 0x640   :  { %4320 = vst [vmem:[%s8807_s13 + $0x198] sm:$0xff] %v4255_v55  ;;  %v3712_v4 = vadd.f32 %v3711_v27, %v3663_v2 }
 0x641   :  { %v5834_v33 = vpop.eup %5833 }
 0x642   :  { %v5836_v16 = vpop.eup %5835  ;;  %v4083_v25 = vadd.f32 1.0, %v5834_v33  ;;  %v3762_v6 = vmul.f32 0.5, %v3712_v4 }
 0x643   :  { %v3979_v56 = vadd.f32 1.0, %v5836_v16 }
 0x644   :  { %v4195_v7 = vmul.f32 0.5, %v4083_v25  ;;  %5837 = vtanh.f32 %v3762_v6 }
 0x645   :  { %v4091_v50 = vmul.f32 0.5, %v3979_v56  ;;  %v3665_v49 = vpop.f32.mrf.mxu0  ;;  %v3714_v19 = vpop.f32.mrf.mxu1 }
 0x646   :  { %v4259_v52 = vpack.c.bf16 %v4195_v7, %v4194_v29  ;;  %v3666_v41 = vadd.f32 %v3665_v49, %v8702_v26 }
 0x647   :  { %v4200_v32 = vpack.c.bf16 %v4091_v50, %v4091_v50 }
 0x648   :  { %4324 = vst [vmem:[%s8807_s13 + $0x1b4] sm:$0xff] %v4259_v52  ;;  %v3715_v8 = vadd.f32 %v3714_v19, %v3666_v41 }
 0x649   :  { %4265 = vst.msk [vmem:[%s8807_s13 + $0x18] sm:$0xf] %vm4264_vm2, %v4200_v32 }
 0x64a   :  { %v5838_v15 = vpop.eup %5837  ;;  %v3769_v0 = vmul.f32 0.5, %v3715_v8 }
 0x64b   :  { %v3986_v30 = vadd.f32 1.0, %v5838_v15 }
 0x64c   :  { %5839 = vtanh.f32 %v3769_v0 }
 0x64d   :  { %v4098_v34 = vmul.f32 0.5, %v3986_v30  ;;  %v3667_v37 = vpop.f32.mrf.mxu0  ;;  %v3716_v44 = vpop.f32.mrf.mxu1 }
 0x64e   :  { %v3668_v53 = vadd.f32 %v3667_v37, %v8702_v26 }
 0x64f   :  { %v4204_v59 = vpack.c.bf16 %v4098_v34, %v4098_v34 }
 0x650   :  { %v3717_v40 = vadd.f32 %v3716_v44, %v3668_v53 }
 0x651   :  { %4269 = vst.msk [vmem:[%s8807_s13 + $0x34] sm:$0xf] %vm4264_vm2, %v4204_v59 }
 0x652   :  { %v5840_v46 = vpop.eup %5839  ;;  %v3776_v45 = vmul.f32 0.5, %v3717_v40 }
 0x653   :  { %v3993_v28 = vadd.f32 1.0, %v5840_v46 }
 0x654   :  { %5841 = vtanh.f32 %v3776_v45 }
 0x655   :  { %v4105_v17 = vmul.f32 0.5, %v3993_v28  ;;  %v3670_v22 = vpop.f32.mrf.mxu0  ;;  %v3719_v58 = vpop.f32.mrf.mxu1 }
 0x656   :  { %v3671_v47 = vadd.f32 %v3670_v22, %v8702_v26 }
 0x657   :  { %v4208_v24 = vpack.c.bf16 %v4105_v17, %v4105_v17 }
 0x658   :  { %v3720_v9 = vadd.f32 %v3719_v58, %v3671_v47 }
 0x659   :  { %4273 = vst.msk [vmem:[%s8807_s13 + $0x50] sm:$0xf] %vm4264_vm2, %v4208_v24 }
 0x65a   :  { %v5842_v43 = vpop.eup %5841  ;;  %v3783_v11 = vmul.f32 0.5, %v3720_v9 }
 0x65b   :  { %v4000_v51 = vadd.f32 1.0, %v5842_v43 }
 0x65c   :  { %5843 = vtanh.f32 %v3783_v11 }
 0x65d   :  { %v4112_v42 = vmul.f32 0.5, %v4000_v51  ;;  %v3672_v35 = vpop.f32.mrf.mxu0  ;;  %v3721_v61 = vpop.f32.mrf.mxu1 }
 0x65e   :  { %v3673_v62 = vadd.f32 %v3672_v35, %v8702_v26 }
 0x65f   :  { %v4212_v21 = vpack.c.bf16 %v4112_v42, %v4112_v42 }
 0x660   :  { %v3722_v36 = vadd.f32 %v3721_v61, %v3673_v62 }
 0x661   :  { %4277 = vst.msk [vmem:[%s8807_s13 + $0x6c] sm:$0xf] %vm4264_vm2, %v4212_v21 }
 0x662   :  { %v5844_v63 = vpop.eup %5843  ;;  %v3790_v54 = vmul.f32 0.5, %v3722_v36 }
 0x663   :  { %v4007_v14 = vadd.f32 1.0, %v5844_v63 }
 0x664   :  { %5845 = vtanh.f32 %v3790_v54 }
 0x665   :  { %v4119_v10 = vmul.f32 0.5, %v4007_v14  ;;  %v3675_v3 = vpop.f32.mrf.mxu0  ;;  %v3724_v20 = vpop.f32.mrf.mxu1 }
 0x666   :  { %v3676_v57 = vadd.f32 %v3675_v3, %v8702_v26 }
 0x667   :  { %v4216_v38 = vpack.c.bf16 %v4119_v10, %v4119_v10 }
 0x668   :  { %v3725_v48 = vadd.f32 %v3724_v20, %v3676_v57 }
 0x669   :  { %4281 = vst.msk [vmem:[%s8807_s13 + $0x88] sm:$0xf] %vm4264_vm2, %v4216_v38 }
 0x66a   :  { %v5846_v31 = vpop.eup %5845  ;;  %v3797_v12 = vmul.f32 0.5, %v3725_v48 }
 0x66b   :  { %v4014_v60 = vadd.f32 1.0, %v5846_v31 }
 0x66c   :  { %5847 = vtanh.f32 %v3797_v12 }
 0x66d   :  { %v4126_v18 = vmul.f32 0.5, %v4014_v60  ;;  %v3677_v39 = vpop.f32.mrf.mxu0  ;;  %v3726_v1 = vpop.f32.mrf.mxu1 }
 0x66e   :  { %v3678_v23 = vadd.f32 %v3677_v39, %v8702_v26 }
 0x66f   :  { %v4220_v5 = vpack.c.bf16 %v4126_v18, %v4126_v18 }
 0x670   :  { %v3727_v27 = vadd.f32 %v3726_v1, %v3678_v23 }
 0x671   :  { %4285 = vst.msk [vmem:[%s8807_s13 + $0xa4] sm:$0xf] %vm4264_vm2, %v4220_v5 }
 0x672   :  { %v5848_v55 = vpop.eup %5847  ;;  %v3804_v2 = vmul.f32 0.5, %v3727_v27 }
 0x673   :  { %v4021_v13 = vadd.f32 1.0, %v5848_v55 }
 0x674   :  { %5849 = vtanh.f32 %v3804_v2 }
 0x675   :  { %v4133_v4 = vmul.f32 0.5, %v4021_v13  ;;  %v3680_v33 = vpop.f32.mrf.mxu0  ;;  %v3729_v16 = vpop.f32.mrf.mxu1 }
 0x676   :  { %v3681_v25 = vadd.f32 %v3680_v33, %v8702_v26 }
 0x677   :  { %v4224_v6 = vpack.c.bf16 %v4133_v4, %v4133_v4 }
 0x678   :  { %v3730_v56 = vadd.f32 %v3729_v16, %v3681_v25 }
 0x679   :  { %4289 = vst.msk [vmem:[%s8807_s13 + $0xc0] sm:$0xf] %vm4264_vm2, %v4224_v6 }
 0x67a   :  { %v5850_v29 = vpop.eup %5849  ;;  %v3811_v7 = vmul.f32 0.5, %v3730_v56 }
 0x67b   :  { %v4028_v50 = vadd.f32 1.0, %v5850_v29 }
 0x67c   :  { %5851 = vtanh.f32 %v3811_v7 }
 0x67d   :  { %v4140_v49 = vmul.f32 0.5, %v4028_v50  ;;  %v3682_v19 = vpop.f32.mrf.mxu0  ;;  %v3731_v52 = vpop.f32.mrf.mxu1 }
 0x67e   :  { %v3683_v41 = vadd.f32 %v3682_v19, %v8702_v26 }
 0x67f   :  { %v4228_v32 = vpack.c.bf16 %v4140_v49, %v4140_v49 }
 0x680   :  { %v3732_v8 = vadd.f32 %v3731_v52, %v3683_v41 }
 0x681   :  { %4293 = vst.msk [vmem:[%s8807_s13 + $0xdc] sm:$0xf] %vm4264_vm2, %v4228_v32 }
 0x682   :  { %v5852_v15 = vpop.eup %5851  ;;  %v3818_v0 = vmul.f32 0.5, %v3732_v8 }
 0x683   :  { %v4035_v30 = vadd.f32 1.0, %v5852_v15 }
 0x684   :  { %5853 = vtanh.f32 %v3818_v0 }
 0x685   :  { %v4147_v34 = vmul.f32 0.5, %v4035_v30  ;;  %v3685_v37 = vpop.f32.mrf.mxu0  ;;  %v3734_v44 = vpop.f32.mrf.mxu1 }
 0x686   :  { %v3686_v53 = vadd.f32 %v3685_v37, %v8702_v26 }
 0x687   :  { %v4232_v59 = vpack.c.bf16 %v4147_v34, %v4147_v34 }
 0x688   :  { %v3735_v40 = vadd.f32 %v3734_v44, %v3686_v53 }
 0x689   :  { %4297 = vst.msk [vmem:[%s8807_s13 + $0xf8] sm:$0xf] %vm4264_vm2, %v4232_v59 }
 0x68a   :  { %v5854_v46 = vpop.eup %5853  ;;  %v3825_v45 = vmul.f32 0.5, %v3735_v40 }
 0x68b   :  { %v4042_v28 = vadd.f32 1.0, %v5854_v46 }
 0x68c   :  { %5855 = vtanh.f32 %v3825_v45 }
 0x68d   :  { %v4154_v17 = vmul.f32 0.5, %v4042_v28  ;;  %v3687_v22 = vpop.f32.mrf.mxu0  ;;  %v3736_v58 = vpop.f32.mrf.mxu1 }
 0x68e   :  { %v3688_v47 = vadd.f32 %v3687_v22, %v8702_v26 }
 0x68f   :  { %v4236_v24 = vpack.c.bf16 %v4154_v17, %v4154_v17 }
 0x690   :  { %v3737_v9 = vadd.f32 %v3736_v58, %v3688_v47 }
 0x691   :  { %4301 = vst.msk [vmem:[%s8807_s13 + $0x114] sm:$0xf] %vm4264_vm2, %v4236_v24 }
 0x692   :  { %v5856_v43 = vpop.eup %5855  ;;  %v3832_v11 = vmul.f32 0.5, %v3737_v9 }
 0x693   :  { %v4049_v51 = vadd.f32 1.0, %v5856_v43 }
 0x694   :  { %5857 = vtanh.f32 %v3832_v11 }
 0x695   :  { %v4161_v42 = vmul.f32 0.5, %v4049_v51  ;;  %v3690_v35 = vpop.f32.mrf.mxu0  ;;  %v3739_v61 = vpop.f32.mrf.mxu1 }
 0x696   :  { %v3691_v62 = vadd.f32 %v3690_v35, %v8702_v26 }
 0x697   :  { %v4240_v21 = vpack.c.bf16 %v4161_v42, %v4161_v42 }
 0x698   :  { %v3740_v36 = vadd.f32 %v3739_v61, %v3691_v62 }
 0x699   :  { %4305 = vst.msk [vmem:[%s8807_s13 + $0x130] sm:$0xf] %vm4264_vm2, %v4240_v21 }
 0x69a   :  { %v5858_v63 = vpop.eup %5857  ;;  %v3839_v54 = vmul.f32 0.5, %v3740_v36 }
 0x69b   :  { %v4056_v14 = vadd.f32 1.0, %v5858_v63 }
 0x69c   :  { %5859 = vtanh.f32 %v3839_v54 }
 0x69d   :  { %v4168_v10 = vmul.f32 0.5, %v4056_v14  ;;  %v3692_v3 = vpop.f32.mrf.mxu0  ;;  %v3741_v20 = vpop.f32.mrf.mxu1 }
 0x69e   :  { %v3693_v57 = vadd.f32 %v3692_v3, %v8702_v26 }
 0x69f   :  { %v4244_v38 = vpack.c.bf16 %v4168_v10, %v4168_v10 }
 0x6a0   :  { %v3742_v48 = vadd.f32 %v3741_v20, %v3693_v57 }
 0x6a1   :  { %4309 = vst.msk [vmem:[%s8807_s13 + $0x14c] sm:$0xf] %vm4264_vm2, %v4244_v38 }
 0x6a2   :  { %v5860_v31 = vpop.eup %5859  ;;  %v3846_v12 = vmul.f32 0.5, %v3742_v48 }
 0x6a3   :  { %v4063_v60 = vadd.f32 1.0, %v5860_v31 }
 0x6a4   :  { %5861 = vtanh.f32 %v3846_v12 }
 0x6a5   :  { %v4175_v18 = vmul.f32 0.5, %v4063_v60  ;;  %v3695_v39 = vpop.f32.mrf.mxu0  ;;  %v3744_v1 = vpop.f32.mrf.mxu1 }
 0x6a6   :  { %v3696_v23 = vadd.f32 %v3695_v39, %v8702_v26 }
 0x6a7   :  { %v4248_v5 = vpack.c.bf16 %v4175_v18, %v4175_v18 }
 0x6a8   :  { %v3745_v27 = vadd.f32 %v3744_v1, %v3696_v23 }
 0x6a9   :  { %4313 = vst.msk [vmem:[%s8807_s13 + $0x168] sm:$0xf] %vm4264_vm2, %v4248_v5 }
 0x6aa   :  { %v5862_v55 = vpop.eup %5861  ;;  %v3853_v2 = vmul.f32 0.5, %v3745_v27 }
 0x6ab   :  { %v4070_v13 = vadd.f32 1.0, %v5862_v55 }
 0x6ac   :  { %5863 = vtanh.f32 %v3853_v2 }
 0x6ad   :  { %v4182_v4 = vmul.f32 0.5, %v4070_v13  ;;  %v3697_v33 = vpop.f32.mrf.mxu0  ;;  %v3746_v6 = vpop.f32.mrf.mxu1 }
 0x6ae   :  { %v3698_v16 = vadd.f32 %v3697_v33, %v8702_v26 }
 0x6af   :  { %v4252_v25 = vpack.c.bf16 %v4182_v4, %v4182_v4 }
 0x6b0   :  { %v3747_v56 = vadd.f32 %v3746_v6, %v3698_v16 }
 0x6b1   :  { %4317 = vst.msk [vmem:[%s8807_s13 + $0x184] sm:$0xf] %vm4264_vm2, %v4252_v25 }
 0x6b2   :  { %v5864_v29 = vpop.eup %5863  ;;  %v3860_v7 = vmul.f32 0.5, %v3747_v56 }
 0x6b3   :  { %v4077_v50 = vadd.f32 1.0, %v5864_v29 }
 0x6b4   :  { %5865 = vtanh.f32 %v3860_v7 }
 0x6b5   :  { %v4189_v49 = vmul.f32 0.5, %v4077_v50 }
 0x6b7   :  { %v4256_v19 = vpack.c.bf16 %v4189_v49, %v4189_v49 }
 0x6b9   :  { %4321 = vst.msk [vmem:[%s8807_s13 + $0x1a0] sm:$0xf] %vm4264_vm2, %v4256_v19 }
 0x6ba   :  { %v5866_v26 = vpop.eup %5865 }
 0x6bb   :  { %v4084_v52 = vadd.f32 1.0, %v5866_v26 }
 0x6bd   :  { %v4196_v41 = vmul.f32 0.5, %v4084_v52 }
 0x6bf   :  { %v4260_v32 = vpack.c.bf16 %v4196_v41, %v4196_v41 }
 0x6c1   :  { %4325 = vst.msk [vmem:[%s8807_s13 + $0x1bc] sm:$0xf] %vm4264_vm2, %v4260_v32 }

</bundles_post_ra>
